<compile_context>
chip_gen: v6e
topology: v6e:2x2x1
jax: 0.10.0
libtpu: 0.0.40
codegen_flags: <defaults>
</compile_context>

<pallas_src>
import functools

import jax
import jax.numpy as jnp
from jax import lax
from jax.experimental import pallas as pl
from jax.experimental.pallas import tpu as pltpu


CMID = 512          # hidden channels of the 3x3 conv
CCLS = 18 * 2       # 36
CREG = 18 * 4       # 72
CPAD = 128          # fused [cls | reg | zero-pad] output width (lane-dense)


def _rpn_kernel(x_ref, w1_ref, b1_ref, wcr_ref, bcr_ref, out_ref):
    # x_ref:   (1, TH+2, W+2, Cin)  bf16 halo'd NHWC input rows for this tile
    # w1_ref:  (3, 3, Cin, 512)     bf16 3x3 conv weight (HWIO)
    # b1_ref:  (1, 512)             f32 bias
    # wcr_ref: (512, 128)           bf16 fused 1x1 weights [cls | reg | pad]
    # bcr_ref: (1, 128)             f32 fused bias
    # out_ref: (1, TH*W, 128)       f32 fused cls/reg outputs
    th = x_ref.shape[1] - 2
    w = x_ref.shape[2] - 2
    cin = x_ref.shape[3]
    rows = th * w

    # 3x3 conv as 9 shifted matmuls on the MXU, accumulated in f32.
    acc = None
    for ky in range(3):
        for kx in range(3):
            tap = x_ref[0, ky:ky + th, kx:kx + w, :].reshape(rows, cin)
            part = jnp.dot(tap, w1_ref[ky, kx],
                           preferred_element_type=jnp.float32)
            acc = part if acc is None else acc + part

    h = jnp.maximum(acc + b1_ref[...], 0.0)            # bias + ReLU in f32 (VPU)

    # Fused cls+reg 1x1 conv: one full-width (rows, 512) x (512, 128) matmul.
    out = jnp.dot(h.astype(jnp.bfloat16), wcr_ref[...],
                  preferred_element_type=jnp.float32)
    out_ref[0] = (out + bcr_ref[...]).astype(out_ref.dtype)


def _pick_tile_h(H, W, max_rows=2048):
    """Largest row-tile height dividing H with TILE_H*W rows <= max_rows
    (and a multiple of 8 unless it covers the whole image)."""
    cands = [d for d in range(1, H + 1)
             if H % d == 0 and (d == H or (d * W) % 8 == 0)]
    small = [d for d in cands if d * W <= max_rows]
    return max(small) if small else min(cands)


def rpn_forward(x_nchw, params, tile_h=None):
    """Forward pass matching the PyTorch RPN module. Returns NCHW outputs."""
    N, Cin, H, W = x_nchw.shape
    if tile_h is None:
        tile_h = _pick_tile_h(H, W)
    assert H % tile_h == 0, "tile_h must divide H"
    n_th = H // tile_h
    rows = tile_h * W                               # output rows per grid step

    # ---- layout glue only: NCHW -> NHWC (bf16), zero pad, halo'd row tiles ----
    x = jnp.transpose(x_nchw, (0, 2, 3, 1)).astype(jnp.bfloat16)   # (N,H,W,Cin)
    xp = jnp.pad(x, ((0, 0), (1, 1), (1, 1), (0, 0)))              # (N,H+2,W+2,Cin)
    tiles = jnp.stack(
        [lax.slice_in_dim(xp, t * tile_h, t * tile_h + tile_h + 2, axis=1)
         for t in range(n_th)],
        axis=1,
    ).reshape(N * n_th, tile_h + 2, W + 2, Cin)     # (N*n_th, TH+2, W+2, Cin)

    # ---- weights: bf16 for the MXU, f32 biases; fuse the two 1x1 convs ----
    w1 = params["w1"].astype(jnp.bfloat16)                          # (3,3,Cin,512)
    b1 = params["b1"].reshape(1, CMID).astype(jnp.float32)
    wcr = jnp.zeros((CMID, CPAD), jnp.bfloat16)
    wcr = wcr.at[:, :CCLS].set(params["wc"].astype(jnp.bfloat16))
    wcr = wcr.at[:, CCLS:CCLS + CREG].set(params["wr"].astype(jnp.bfloat16))
    bcr = jnp.zeros((1, CPAD), jnp.float32)
    bcr = bcr.at[0, :CCLS].set(params["bc"].astype(jnp.float32))
    bcr = bcr.at[0, CCLS:CCLS + CREG].set(params["br"].astype(jnp.float32))

    const = lambda shape: pl.BlockSpec(shape, lambda n, t: (0,) * len(shape))

    fused = pl.pallas_call(
        _rpn_kernel,
        out_shape=jax.ShapeDtypeStruct((N, H * W, CPAD), jnp.float32),
        grid_spec=pltpu.PrefetchScalarGridSpec(
            num_scalar_prefetch=0,
            grid=(N, n_th),
            in_specs=[
                pl.BlockSpec((1, tile_h + 2, W + 2, Cin),
                             lambda n, t: (n * n_th + t, 0, 0, 0)),
                const((3, 3, Cin, CMID)),   # weights: constant maps -> VMEM-resident
                const((1, CMID)),
                const((CMID, CPAD)),
                const((1, CPAD)),
            ],
            out_specs=pl.BlockSpec((1, rows, CPAD), lambda n, t: (n, t, 0)),
        ),
        compiler_params=pltpu.CompilerParams(
            dimension_semantics=("parallel", "parallel"),
            vmem_limit_bytes=48 * 1024 * 1024),
    )(tiles, w1, b1, wcr, bcr)

    # ---- glue: split fused columns and return NCHW to match PyTorch ----
    out = fused.reshape(N, H, W, CPAD)
    rpn_cls_logits = jnp.transpose(out[..., :CCLS], (0, 3, 1, 2))
    rpn_reg_deltas = jnp.transpose(out[..., CCLS:CCLS + CREG], (0, 3, 1, 2))
    return rpn_cls_logits, rpn_reg_deltas


def init_params(key, in_channels):
    k1, k2, k3, k4, k5, k6 = jax.random.split(key, 6)
    s = 0.05
    return {
        "w1": jax.random.normal(k1, (3, 3, in_channels, CMID), jnp.float32) * s,
        "b1": jax.random.normal(k2, (CMID,), jnp.float32) * s,
        "wc": jax.random.normal(k3, (CMID, CCLS), jnp.float32) * s,
        "bc": jax.random.normal(k4, (CCLS,), jnp.float32) * s,
        "wr": jax.random.normal(k5, (CMID, CREG), jnp.float32) * s,
        "br": jax.random.normal(k6, (CREG,), jnp.float32) * s,
    }


def _reference(x_nchw, params):
    """Pure-JAX reference (lax.conv, f32) for correctness checking."""
    x = jnp.transpose(x_nchw, (0, 2, 3, 1))                  # NHWC
    h = lax.conv_general_dilated(
        x, params["w1"], window_strides=(1, 1), padding="SAME",
        dimension_numbers=("NHWC", "HWIO", "NHWC"))
    h = jax.nn.relu(h + params["b1"].reshape(1, 1, 1, CMID))
    cls = jnp.einsum("nhwc,cd->nhwd", h, params["wc"]) + params["bc"]
    reg = jnp.einsum("nhwc,cd->nhwd", h, params["wr"]) + params["br"]
    return (jnp.transpose(cls, (0, 3, 1, 2)), jnp.transpose(reg, (0, 3, 1, 2)))


if __name__ == "__main__":
    key = jax.random.PRNGKey(0)
    k_x, k_p = jax.random.split(key)

    N, Cin, H, W = 2, 4, 16, 16
    x = jax.random.normal(k_x, (N, Cin, H, W), jnp.float32)
    params = init_params(k_p, Cin)

    # tile_h=8 exercises the multi-tile (grid = (N, 2)) path at this small size.
    fwd = jax.jit(functools.partial(rpn_forward, tile_h=8))
    cls_out, reg_out = fwd(x, params)
    jax.block_until_ready((cls_out, reg_out))

    assert cls_out.shape == (N, CCLS, H, W)
    assert reg_out.shape == (N, CREG, H, W)

    cls_ref, reg_ref = _reference(x, params)
    # bf16 matmuls with f32 accumulation -> relaxed tolerance.
    assert jnp.allclose(cls_out, cls_ref, rtol=2e-2, atol=2e-2), "cls mismatch"
    assert jnp.allclose(reg_out, reg_ref, rtol=2e-2, atol=2e-2), "reg mismatch"

    print("KERNEL_OK")
</pallas_src>

<mosaic_0001>
module attributes {stable_mosaic.version = 11 : i64} {
  func.func @_rpn_kernel(%arg0: i32, %arg1: i32, %arg2: memref<1x10x18x4xbf16, #tpu.memory_space<vmem>>, %arg3: memref<3x3x4x512xbf16, #tpu.memory_space<vmem>>, %arg4: memref<1x512xf32, #tpu.memory_space<vmem>>, %arg5: memref<512x128xbf16, #tpu.memory_space<vmem>>, %arg6: memref<1x128xf32, #tpu.memory_space<vmem>>, %arg7: memref<1x128x128xf32, #tpu.memory_space<vmem>>) attributes {dimension_semantics = [#tpu.dimension_semantics<parallel>, #tpu.dimension_semantics<parallel>], iteration_bounds = array<i64: 2, 2>, scalar_prefetch = 0 : i64, scratch_operands = 0 : i64, tpu.core_type = #tpu.core_type<tc>, window_params = [{transform_indices = @transform_0, window_bounds = array<i64: 1, 10, 18, 4>}, {pipeline_mode = #tpu.pipeline_mode<synchronous>, transform_indices = @transform_1, window_bounds = array<i64: 3, 3, 4, 512>}, {pipeline_mode = #tpu.pipeline_mode<synchronous>, transform_indices = @transform_2, window_bounds = array<i64: 1, 512>}, {pipeline_mode = #tpu.pipeline_mode<synchronous>, transform_indices = @transform_3, window_bounds = array<i64: 512, 128>}, {pipeline_mode = #tpu.pipeline_mode<synchronous>, transform_indices = @transform_4, window_bounds = array<i64: 1, 128>}, {transform_indices = @transform_5, window_bounds = array<i64: 1, 128, 128>}]} {
    %c0 = arith.constant 0 : index
    %c0_0 = arith.constant 0 : index
    %c0_1 = arith.constant 0 : index
    %c0_2 = arith.constant 0 : index
    %0 = vector.load %arg2[%c0, %c0_0, %c0_1, %c0_2] : memref<1x10x18x4xbf16, #tpu.memory_space<vmem>>, vector<1x8x16x4xbf16>
    %1 = vector.shape_cast %0 : vector<1x8x16x4xbf16> to vector<8x16x4xbf16>
    %2 = vector.shape_cast %1 : vector<8x16x4xbf16> to vector<128x4xbf16>
    %c0_3 = arith.constant 0 : index
    %c0_4 = arith.constant 0 : index
    %c0_5 = arith.constant 0 : index
    %c0_6 = arith.constant 0 : index
    %3 = vector.load %arg3[%c0_3, %c0_4, %c0_5, %c0_6] : memref<3x3x4x512xbf16, #tpu.memory_space<vmem>>, vector<1x1x4x512xbf16>
    %4 = vector.shape_cast %3 : vector<1x1x4x512xbf16> to vector<4x512xbf16>
    %cst = arith.constant dense<0.000000e+00> : vector<128x512xf32>
    %5 = tpu.matmul %2, %4, %cst {dimension_numbers = #tpu.dot_dimension_numbers<[1], [0], [0], [1], [0, 0, 1, 1], [], []>} : vector<128x4xbf16>, vector<4x512xbf16>, vector<128x512xf32> -> vector<128x512xf32>
    %c0_7 = arith.constant 0 : index
    %c0_8 = arith.constant 0 : index
    %c1 = arith.constant 1 : index
    %c0_9 = arith.constant 0 : index
    %6 = vector.load %arg2[%c0_7, %c0_8, %c1, %c0_9] : memref<1x10x18x4xbf16, #tpu.memory_space<vmem>>, vector<1x8x16x4xbf16>
    %7 = vector.shape_cast %6 : vector<1x8x16x4xbf16> to vector<8x16x4xbf16>
    %8 = vector.shape_cast %7 : vector<8x16x4xbf16> to vector<128x4xbf16>
    %c0_10 = arith.constant 0 : index
    %c1_11 = arith.constant 1 : index
    %c0_12 = arith.constant 0 : index
    %c0_13 = arith.constant 0 : index
    %9 = vector.load %arg3[%c0_10, %c1_11, %c0_12, %c0_13] : memref<3x3x4x512xbf16, #tpu.memory_space<vmem>>, vector<1x1x4x512xbf16>
    %10 = vector.shape_cast %9 : vector<1x1x4x512xbf16> to vector<4x512xbf16>
    %cst_14 = arith.constant dense<0.000000e+00> : vector<128x512xf32>
    %11 = tpu.matmul %8, %10, %cst_14 {dimension_numbers = #tpu.dot_dimension_numbers<[1], [0], [0], [1], [0, 0, 1, 1], [], []>} : vector<128x4xbf16>, vector<4x512xbf16>, vector<128x512xf32> -> vector<128x512xf32>
    %12 = arith.addf %5, %11 : vector<128x512xf32>
    %c0_15 = arith.constant 0 : index
    %c0_16 = arith.constant 0 : index
    %c2 = arith.constant 2 : index
    %c0_17 = arith.constant 0 : index
    %13 = vector.load %arg2[%c0_15, %c0_16, %c2, %c0_17] : memref<1x10x18x4xbf16, #tpu.memory_space<vmem>>, vector<1x8x16x4xbf16>
    %14 = vector.shape_cast %13 : vector<1x8x16x4xbf16> to vector<8x16x4xbf16>
    %15 = vector.shape_cast %14 : vector<8x16x4xbf16> to vector<128x4xbf16>
    %c0_18 = arith.constant 0 : index
    %c2_19 = arith.constant 2 : index
    %c0_20 = arith.constant 0 : index
    %c0_21 = arith.constant 0 : index
    %16 = vector.load %arg3[%c0_18, %c2_19, %c0_20, %c0_21] : memref<3x3x4x512xbf16, #tpu.memory_space<vmem>>, vector<1x1x4x512xbf16>
    %17 = vector.shape_cast %16 : vector<1x1x4x512xbf16> to vector<4x512xbf16>
    %cst_22 = arith.constant dense<0.000000e+00> : vector<128x512xf32>
    %18 = tpu.matmul %15, %17, %cst_22 {dimension_numbers = #tpu.dot_dimension_numbers<[1], [0], [0], [1], [0, 0, 1, 1], [], []>} : vector<128x4xbf16>, vector<4x512xbf16>, vector<128x512xf32> -> vector<128x512xf32>
    %19 = arith.addf %12, %18 : vector<128x512xf32>
    %c0_23 = arith.constant 0 : index
    %c1_24 = arith.constant 1 : index
    %c0_25 = arith.constant 0 : index
    %c0_26 = arith.constant 0 : index
    %20 = vector.load %arg2[%c0_23, %c1_24, %c0_25, %c0_26] : memref<1x10x18x4xbf16, #tpu.memory_space<vmem>>, vector<1x8x16x4xbf16>
    %21 = vector.shape_cast %20 : vector<1x8x16x4xbf16> to vector<8x16x4xbf16>
    %22 = vector.shape_cast %21 : vector<8x16x4xbf16> to vector<128x4xbf16>
    %c1_27 = arith.constant 1 : index
    %c0_28 = arith.constant 0 : index
    %c0_29 = arith.constant 0 : index
    %c0_30 = arith.constant 0 : index
    %23 = vector.load %arg3[%c1_27, %c0_28, %c0_29, %c0_30] : memref<3x3x4x512xbf16, #tpu.memory_space<vmem>>, vector<1x1x4x512xbf16>
    %24 = vector.shape_cast %23 : vector<1x1x4x512xbf16> to vector<4x512xbf16>
    %cst_31 = arith.constant dense<0.000000e+00> : vector<128x512xf32>
    %25 = tpu.matmul %22, %24, %cst_31 {dimension_numbers = #tpu.dot_dimension_numbers<[1], [0], [0], [1], [0, 0, 1, 1], [], []>} : vector<128x4xbf16>, vector<4x512xbf16>, vector<128x512xf32> -> vector<128x512xf32>
    %26 = arith.addf %19, %25 : vector<128x512xf32>
    %c0_32 = arith.constant 0 : index
    %c1_33 = arith.constant 1 : index
    %c1_34 = arith.constant 1 : index
    %c0_35 = arith.constant 0 : index
    %27 = vector.load %arg2[%c0_32, %c1_33, %c1_34, %c0_35] : memref<1x10x18x4xbf16, #tpu.memory_space<vmem>>, vector<1x8x16x4xbf16>
    %28 = vector.shape_cast %27 : vector<1x8x16x4xbf16> to vector<8x16x4xbf16>
    %29 = vector.shape_cast %28 : vector<8x16x4xbf16> to vector<128x4xbf16>
    %c1_36 = arith.constant 1 : index
    %c1_37 = arith.constant 1 : index
    %c0_38 = arith.constant 0 : index
    %c0_39 = arith.constant 0 : index
    %30 = vector.load %arg3[%c1_36, %c1_37, %c0_38, %c0_39] : memref<3x3x4x512xbf16, #tpu.memory_space<vmem>>, vector<1x1x4x512xbf16>
    %31 = vector.shape_cast %30 : vector<1x1x4x512xbf16> to vector<4x512xbf16>
    %cst_40 = arith.constant dense<0.000000e+00> : vector<128x512xf32>
    %32 = tpu.matmul %29, %31, %cst_40 {dimension_numbers = #tpu.dot_dimension_numbers<[1], [0], [0], [1], [0, 0, 1, 1], [], []>} : vector<128x4xbf16>, vector<4x512xbf16>, vector<128x512xf32> -> vector<128x512xf32>
    %33 = arith.addf %26, %32 : vector<128x512xf32>
    %c0_41 = arith.constant 0 : index
    %c1_42 = arith.constant 1 : index
    %c2_43 = arith.constant 2 : index
    %c0_44 = arith.constant 0 : index
    %34 = vector.load %arg2[%c0_41, %c1_42, %c2_43, %c0_44] : memref<1x10x18x4xbf16, #tpu.memory_space<vmem>>, vector<1x8x16x4xbf16>
    %35 = vector.shape_cast %34 : vector<1x8x16x4xbf16> to vector<8x16x4xbf16>
    %36 = vector.shape_cast %35 : vector<8x16x4xbf16> to vector<128x4xbf16>
    %c1_45 = arith.constant 1 : index
    %c2_46 = arith.constant 2 : index
    %c0_47 = arith.constant 0 : index
    %c0_48 = arith.constant 0 : index
    %37 = vector.load %arg3[%c1_45, %c2_46, %c0_47, %c0_48] : memref<3x3x4x512xbf16, #tpu.memory_space<vmem>>, vector<1x1x4x512xbf16>
    %38 = vector.shape_cast %37 : vector<1x1x4x512xbf16> to vector<4x512xbf16>
    %cst_49 = arith.constant dense<0.000000e+00> : vector<128x512xf32>
    %39 = tpu.matmul %36, %38, %cst_49 {dimension_numbers = #tpu.dot_dimension_numbers<[1], [0], [0], [1], [0, 0, 1, 1], [], []>} : vector<128x4xbf16>, vector<4x512xbf16>, vector<128x512xf32> -> vector<128x512xf32>
    %40 = arith.addf %33, %39 : vector<128x512xf32>
    %c0_50 = arith.constant 0 : index
    %c2_51 = arith.constant 2 : index
    %c0_52 = arith.constant 0 : index
    %c0_53 = arith.constant 0 : index
    %41 = vector.load %arg2[%c0_50, %c2_51, %c0_52, %c0_53] : memref<1x10x18x4xbf16, #tpu.memory_space<vmem>>, vector<1x8x16x4xbf16>
    %42 = vector.shape_cast %41 : vector<1x8x16x4xbf16> to vector<8x16x4xbf16>
    %43 = vector.shape_cast %42 : vector<8x16x4xbf16> to vector<128x4xbf16>
    %c2_54 = arith.constant 2 : index
    %c0_55 = arith.constant 0 : index
    %c0_56 = arith.constant 0 : index
    %c0_57 = arith.constant 0 : index
    %44 = vector.load %arg3[%c2_54, %c0_55, %c0_56, %c0_57] : memref<3x3x4x512xbf16, #tpu.memory_space<vmem>>, vector<1x1x4x512xbf16>
    %45 = vector.shape_cast %44 : vector<1x1x4x512xbf16> to vector<4x512xbf16>
    %cst_58 = arith.constant dense<0.000000e+00> : vector<128x512xf32>
    %46 = tpu.matmul %43, %45, %cst_58 {dimension_numbers = #tpu.dot_dimension_numbers<[1], [0], [0], [1], [0, 0, 1, 1], [], []>} : vector<128x4xbf16>, vector<4x512xbf16>, vector<128x512xf32> -> vector<128x512xf32>
    %47 = arith.addf %40, %46 : vector<128x512xf32>
    %c0_59 = arith.constant 0 : index
    %c2_60 = arith.constant 2 : index
    %c1_61 = arith.constant 1 : index
    %c0_62 = arith.constant 0 : index
    %48 = vector.load %arg2[%c0_59, %c2_60, %c1_61, %c0_62] : memref<1x10x18x4xbf16, #tpu.memory_space<vmem>>, vector<1x8x16x4xbf16>
    %49 = vector.shape_cast %48 : vector<1x8x16x4xbf16> to vector<8x16x4xbf16>
    %50 = vector.shape_cast %49 : vector<8x16x4xbf16> to vector<128x4xbf16>
    %c2_63 = arith.constant 2 : index
    %c1_64 = arith.constant 1 : index
    %c0_65 = arith.constant 0 : index
    %c0_66 = arith.constant 0 : index
    %51 = vector.load %arg3[%c2_63, %c1_64, %c0_65, %c0_66] : memref<3x3x4x512xbf16, #tpu.memory_space<vmem>>, vector<1x1x4x512xbf16>
    %52 = vector.shape_cast %51 : vector<1x1x4x512xbf16> to vector<4x512xbf16>
    %cst_67 = arith.constant dense<0.000000e+00> : vector<128x512xf32>
    %53 = tpu.matmul %50, %52, %cst_67 {dimension_numbers = #tpu.dot_dimension_numbers<[1], [0], [0], [1], [0, 0, 1, 1], [], []>} : vector<128x4xbf16>, vector<4x512xbf16>, vector<128x512xf32> -> vector<128x512xf32>
    %54 = arith.addf %47, %53 : vector<128x512xf32>
    %c0_68 = arith.constant 0 : index
    %c2_69 = arith.constant 2 : index
    %c2_70 = arith.constant 2 : index
    %c0_71 = arith.constant 0 : index
    %55 = vector.load %arg2[%c0_68, %c2_69, %c2_70, %c0_71] : memref<1x10x18x4xbf16, #tpu.memory_space<vmem>>, vector<1x8x16x4xbf16>
    %56 = vector.shape_cast %55 : vector<1x8x16x4xbf16> to vector<8x16x4xbf16>
    %57 = vector.shape_cast %56 : vector<8x16x4xbf16> to vector<128x4xbf16>
    %c2_72 = arith.constant 2 : index
    %c2_73 = arith.constant 2 : index
    %c0_74 = arith.constant 0 : index
    %c0_75 = arith.constant 0 : index
    %58 = vector.load %arg3[%c2_72, %c2_73, %c0_74, %c0_75] : memref<3x3x4x512xbf16, #tpu.memory_space<vmem>>, vector<1x1x4x512xbf16>
    %59 = vector.shape_cast %58 : vector<1x1x4x512xbf16> to vector<4x512xbf16>
    %cst_76 = arith.constant dense<0.000000e+00> : vector<128x512xf32>
    %60 = tpu.matmul %57, %59, %cst_76 {dimension_numbers = #tpu.dot_dimension_numbers<[1], [0], [0], [1], [0, 0, 1, 1], [], []>} : vector<128x4xbf16>, vector<4x512xbf16>, vector<128x512xf32> -> vector<128x512xf32>
    %61 = arith.addf %54, %60 : vector<128x512xf32>
    %c0_77 = arith.constant 0 : index
    %c0_78 = arith.constant 0 : index
    %62 = vector.load %arg4[%c0_77, %c0_78] : memref<1x512xf32, #tpu.memory_space<vmem>>, vector<1x512xf32>
    %63 = vector.broadcast %62 : vector<1x512xf32> to vector<128x512xf32>
    %64 = arith.addf %61, %63 : vector<128x512xf32>
    %cst_79 = arith.constant 0.000000e+00 : f32
    %65 = vector.broadcast %cst_79 : f32 to vector<128x512xf32>
    %66 = arith.maximumf %64, %65 : vector<128x512xf32>
    %67 = arith.truncf %66 : vector<128x512xf32> to vector<128x512xbf16>
    %c0_80 = arith.constant 0 : index
    %c0_81 = arith.constant 0 : index
    %68 = vector.load %arg5[%c0_80, %c0_81] : memref<512x128xbf16, #tpu.memory_space<vmem>>, vector<512x128xbf16>
    %cst_82 = arith.constant dense<0.000000e+00> : vector<128x128xf32>
    %69 = tpu.matmul %67, %68, %cst_82 {dimension_numbers = #tpu.dot_dimension_numbers<[1], [0], [0], [1], [0, 0, 1, 1], [], []>} : vector<128x512xbf16>, vector<512x128xbf16>, vector<128x128xf32> -> vector<128x128xf32>
    %c0_83 = arith.constant 0 : index
    %c0_84 = arith.constant 0 : index
    %70 = vector.load %arg6[%c0_83, %c0_84] : memref<1x128xf32, #tpu.memory_space<vmem>>, vector<1x128xf32>
    %71 = vector.broadcast %70 : vector<1x128xf32> to vector<128x128xf32>
    %72 = arith.addf %69, %71 : vector<128x128xf32>
    %c0_85 = arith.constant 0 : index
    %c0_86 = arith.constant 0 : index
    %c0_87 = arith.constant 0 : index
    %73 = vector.load %arg7[%c0_85, %c0_86, %c0_87] : memref<1x128x128xf32, #tpu.memory_space<vmem>>, vector<1x128x128xf32>
    %74 = vector.shape_cast %73 : vector<1x128x128xf32> to vector<128x128xf32>
    %75 = vector.shape_cast %72 : vector<128x128xf32> to vector<1x128x128xf32>
    tpu.vector_store %arg7[%c0_85, %c0_86, %c0_87], %75 {strides = array<i32>} : memref<1x128x128xf32, #tpu.memory_space<vmem>>, vector<1x128x128xf32>,
    return
  }
  func.func @transform_0(%arg0: i32, %arg1: i32) -> (i32, i32, i32, i32) {
    %c2_i32 = arith.constant 2 : i32
    %0 = arith.muli %arg0, %c2_i32 : i32
    %1 = arith.addi %0, %arg1 : i32
    %c0_i32 = arith.constant 0 : i32
    %c0_i32_0 = arith.constant 0 : i32
    %c0_i32_1 = arith.constant 0 : i32
    %c0_i32_2 = arith.constant 0 : i32
    return %1, %c0_i32, %c0_i32_0, %c0_i32_1 : i32, i32, i32, i32
  }
  func.func @transform_1(%arg0: i32, %arg1: i32) -> (i32, i32, i32, i32) {
    %c0_i32 = arith.constant 0 : i32
    %c0_i32_0 = arith.constant 0 : i32
    %c0_i32_1 = arith.constant 0 : i32
    %c0_i32_2 = arith.constant 0 : i32
    %c0_i32_3 = arith.constant 0 : i32
    return %c0_i32, %c0_i32_0, %c0_i32_1, %c0_i32_2 : i32, i32, i32, i32
  }
  func.func @transform_2(%arg0: i32, %arg1: i32) -> (i32, i32) {
    %c0_i32 = arith.constant 0 : i32
    %c0_i32_0 = arith.constant 0 : i32
    %c0_i32_1 = arith.constant 0 : i32
    return %c0_i32, %c0_i32_0 : i32, i32
  }
  func.func @transform_3(%arg0: i32, %arg1: i32) -> (i32, i32) {
    %c0_i32 = arith.constant 0 : i32
    %c0_i32_0 = arith.constant 0 : i32
    %c0_i32_1 = arith.constant 0 : i32
    return %c0_i32, %c0_i32_0 : i32, i32
  }
  func.func @transform_4(%arg0: i32, %arg1: i32) -> (i32, i32) {
    %c0_i32 = arith.constant 0 : i32
    %c0_i32_0 = arith.constant 0 : i32
    %c0_i32_1 = arith.constant 0 : i32
    return %c0_i32, %c0_i32_0 : i32, i32
  }
  func.func @transform_5(%arg0: i32, %arg1: i32) -> (i32, i32, i32) {
    %c0_i32 = arith.constant 0 : i32
    %c0_i32_0 = arith.constant 0 : i32
    return %arg0, %arg1, %c0_i32 : i32, i32, i32
  }
}

</mosaic_0001>

<bundles_post_ra>
// kernel: rpn_forward.1
= control target key start
LH: loop header
LB: loop body
LE: loop exit
PB: predicated region body
PF: predicated region fallthrough
CT: control target
= control target key end

     0   :  { %s6002_s18 = smov 0   ;;  %s6004_s19 = smov 0   ;;  %s8758_s0 = inlined_call_operand.vmem [shape: bf16[4,10,18,4], index: 0, kind: input, shape index: {}]   ;;  %s8759_s1 = inlined_call_operand.vmem [shape: bf16[3,3,4,512], index: 1, kind: input, shape index: {}]   ;;  %s8760_s2 = inlined_call_operand.vmem [shape: f32[1,512], index: 2, kind: input, shape index: {}]   ;;  %s8761_s3 = inlined_call_operand.vmem [shape: bf16[512,128], index: 3, kind: input, shape index: {}]   ;;  %s8762_s4 = inlined_call_operand.vmem [shape: f32[1,128], index: 4, kind: input, shape index: {}]   ;;  %s8763_s5 = inlined_call_operand.vmem [shape: f32[2,256,128], index: 5, kind: output, shape index: {}]  }
   0x1   :  { %s6006_s20 = smov 0   ;;  %s6008_s21 = smov 0  }
   0x2   :  { %s6010_s22 = smov 0  }
   0x3 LB: > { %s24_s23 = sadd.s32 1, %s5960_s20  ;;  %s27_s24 = sadd.s32 1, %s5964_s21  ;;  %s5968_s22 = sphi %s6010_s22, %s15_s22   ;;  %s5964_s21 = sphi %s6008_s21, %s9154_s21   ;;  %s5960_s20 = sphi %s6006_s20, %s9153_s20   ;;  %s5956_s19 = sphi %s6004_s19, %s9152_s19   ;;  %s5952_s18 = sphi %s6002_s18, %s9151_s18  }
   0x4   : > { %p25_p0 = scmp.ge.s32.totalorder %s24_s23, 2  ;;  %p5259_p1 = scmp.ge.s32.totalorder %s5968_s22, 1 }
   0x5   : > { %p209_p2 = scmp.lt.s32.totalorder %s5968_s22, 5 }
   0x6   : > { %s9156_s23 = smov (%p25_p0, %s24_s23), 0  ;;  %s9158_s24 = smov (!%p25_p0, %s27_s24), %s5964_s21 }
   0x7   : > { %p210_p3 = pnand %p5259_p1, %p209_p2  ;;  %p29_p4 = scmp.ge.s32.totalorder %s9158_s24, 2 }
   0x9   : > { %s9160_s24 = smov (%p29_p4, %s9158_s24), 0  ;;  %213 = sbr.rel (%p210_p3) target bundleno = 1018 (0x3fa), region = 40 }
   0xe   : > { %v5265_v0 = vld [vmem:[%s8759_s1 + $0x8] sm:$0xff]  ;;  %v514_v1 = vlaneseq  ;;  %v279_v2 = vld [vmem:[%s8759_s1] sm:$0xff]  ;;  %v5970_v3 = vmov 1983009808   ;;  %v8766_v5 = vmov 0   ;;  %s5260_s29 = sshll.u32 %s5956_s19, 1 }
   0xf   : > { %v512_v4 = vunpack.c.l.s4 %v5970_v3  ;;  %597 = vmatprep.mubr.bf16.mxu0 %v8766_v5  ;;  %710 = vmatprep.mubr.bf16.mxu1 %v8766_v5  ;;  %s244_s30 = sadd.s32 %s5952_s18, %s5260_s29  ;;  %vm552_vm0 = vcmask 1041408   ;;  %v510_v8 = vcombine.high %v5265_v0, %v5265_v0  ;;  %v832_v9 = vcombine.high %v279_v2, %v279_v2  ;;  %v5326_v11 = vld [vmem:[%s8759_s1 + $0x10] sm:$0xff]  ;;  %s5262_s27 = sshll.u32 %s5952_s18, 4 }
  0x10   : > { %v6045_v6 = vshrl.u32 %v514_v1, 7  ;;  %p245_p5 = scmp.lt.s32.totalorder %s244_s30, 3  ;;  %vm288_vm1 = vsmask.f32 3328  ;;  %vm289_vm2 = vsmask.f32 7440  ;;  %v1245_v16 = vcombine.high %v5326_v11, %v5326_v11 }
  0x11   : > { %v513_v7 = vunpack.c.0.s8 %v512_v4  ;;  %vm527_vm3 = vcmask 31744   ;;  %vm6110_vm4 = vmor %vm288_vm1, %vm289_vm2  ;;  %v8778_v52 = vmov 0  ;;  %vm1159_vm5 = vcmask 1042432   ;;  %p253_p6 = scmp.lt.s32.totalorder %s5956_s19, 1  ;;  %p255_p7 = scmp.lt.s32.totalorder %s5262_s27, 31 }
  0x12   : > { %8776 = vst [vmem:[#allocation2_spill] sm:$0xff] %v6045_v6  ;;  %s9162_s30 = smov (!%p245_p5, %s244_s30), 3  ;;  %v8779_v52 = vsel %vm6110_vm4, 4294967295, %v8778_v52  ;;  %vm1160_vm6 = vcmask 1046532  }
  0x13   : > { %v6049_v10 = vsub.s32 %v513_v7, %v6045_v6  ;;  %s5822_s8 = smul.u32 120, %s9162_s30  ;;  %8780 = vst [vmem:[#allocation4_spill] sm:$0xff] %v8779_v52  ;;  %vm6310_vm7 = vmor %vm1159_vm5, %vm1160_vm6  ;;  %s9164_s19 = smov (!%p253_p6, %s5956_s19), 1 }
  0x14   : > { %s9166_s27 = smov (!%p255_p7, %s5262_s27), 31  ;;  %s5263_s28 = sshll.u32 %s9164_s19, 5 }
  0x15   : > { %8777 = vst [vmem:[#allocation3_spill] sm:$0xff] %v6049_v10  ;;  %v517_v12 = vrot.slane %v5265_v0, %v6049_v10  ;;  %v524_v13 = vrot.slane %v510_v8, %v6049_v10  ;;  %v839_v14 = vrot.slane %v279_v2, %v6049_v10  ;;  %v6058_v15 = vrot.slane %v832_v9, %v6049_v10  ;;  %s6065_s11 = scalar_lea.vmem %s8758_s0, %s5822_s8 }
  0x16   : > { %v6068_v22 = vld [vmem:[%s6065_s11] sm:$0xf]  ;;  %v6071_v23 = vld [vmem:[%s6065_s11 + $0x4] sm:$0xf]  ;;  %v280_v24 = vld [vmem:[%s6065_s11 + $0x8] sm:$0x1]  ;;  %v6077_v26 = vrot.slane %v5326_v11, %v6049_v10  ;;  %v6094_v36 = vrot.slane %v1245_v16, %v6049_v10 }
  0x17   : > { %v525_v17 = vcombine.high %v517_v12, %v517_v12  ;;  %v554_v18 = vsel %vm552_vm0, %v517_v12, 0  ;;  %v526_v19 = vcombine.high %v524_v13, %v524_v13  ;;  %v560_v20 = vsel %vm552_vm0, %v524_v13, 0  ;;  %v6086_v31 = vld [vmem:[%s6065_s11 + $0xc] sm:$0xf]  ;;  %v6090_v34 = vld [vmem:[%s6065_s11 + $0x10] sm:$0xf] }
  0x18   : > { %v847_v21 = vcombine.high %v839_v14, %v839_v14  ;;  %v848_v25 = vcombine.high %v6058_v15, %v6058_v15  ;;  %v292_v27 = vshrl.u32 %v6068_v22, 16  ;;  %v295_v28 = vshll.u32 %v6068_v22, 16  ;;  %v281_v41 = vld [vmem:[%s6065_s11 + $0x14] sm:$0x1]  ;;  %v6102_v46 = vld [vmem:[%s6065_s11 + $0x18] sm:$0xf] }
  0x19   : > { %5274 = vmatprep.subr.msk.bf16.mxu0 %vm552_vm0, %v525_v17  ;;  %5283 = vmatprep.subr.msk.bf16.mxu1 %vm552_vm0, %v526_v19  ;;  %v301_v29 = vshll.u32 %v6071_v23, 16  ;;  %v305_v30 = vshrl.u32 %v6071_v23, 16  ;;  %v311_v32 = vshll.u32 %v280_v24, 16  ;;  %v874_v33 = vsel %vm552_vm0, %v839_v14, 0  ;;  %v6106_v51 = vld [vmem:[%s6065_s11 + $0x1c] sm:$0xf] }
  0x1a   : > { %580 = vmatpush1.bf16.msra.mxu0 %v554_v18  ;;  %693 = vmatpush1.bf16.msra.mxu1 %v560_v20  ;;  %v316_v35 = vshrl.u32 %v6086_v31, 16  ;;  %v294_v37 = vrot.slane %v292_v27, 4  ;;  %v297_v38 = vrot.slane %v295_v28, 5  ;;  %v319_v44 = vshll.u32 %v6086_v31, 16  ;;  %v282_v4 = vld [vmem:[%s6065_s11 + $0x20] sm:$0x1] }
  0x1b   : > { %5300 = vmatprep.subr.msk.bf16.mxu0 %vm552_vm0, %v847_v21  ;;  %v303_v39 = vrot.slane %v301_v29, 5  ;;  %v307_v40 = vrot.slane %v305_v30, 4  ;;  %5309 = vmatprep.subr.msk.bf16.mxu1 %vm552_vm0, %v848_v25  ;;  %v313_v42 = vrot.slane %v311_v32, 5  ;;  %v325_v45 = vshll.u32 %v6090_v34, 16  ;;  %v6124_v8 = vld [vmem:[%s6065_s11 + $0x24] sm:$0xf] }
  0x1c   : > { %v318_v43 = vrot.slane %v316_v35, 4  ;;  %v298_v47 = vor.u32 %v297_v38, %v294_v37  ;;  %v329_v49 = vshrl.u32 %v6090_v34, 16  ;;  %v335_v50 = vshll.u32 %v281_v41, 16  ;;  %v6129_v14 = vld [vmem:[%s6065_s11 + $0x28] sm:$0xf] }
  0x1d   : > { %v308_v48 = vor.u32 %v307_v40, %v303_v39  ;;  %v321_v53 = vrot.slane %v319_v44, 5  ;;  %v327_v54 = vrot.slane %v325_v45, 5  ;;  %v340_v55 = vshrl.u32 %v6102_v46, 16  ;;  %v6148_v32 = vld [vmem:[%s6065_s11 + $0x30] sm:$0xf] }
  0x1e   : > { %v343_v56 = vshll.u32 %v6102_v46, 16  ;;  %v299_v57 = vrot.slane %v298_v47, 4  ;;  %v331_v59 = vrot.slane %v329_v49, 4  ;;  %v337_v60 = vrot.slane %v335_v50, 5  ;;  %v283_v44 = vld [vmem:[%s6065_s11 + $0x2c] sm:$0x1] }
  0x1f   : > { %v309_v58 = vrot.slane %v308_v48, 4  ;;  %v322_v61 = vor.u32 %v321_v53, %v318_v43  ;;  %v342_v62 = vrot.slane %v340_v55, 4  ;;  %v349_v0 = vshll.u32 %v6106_v51, 16  ;;  %v272_v43 = vld [vmem:[%s6065_s11 + $0x34] sm:$0xf] }
  0x20   : > { %v345_v63 = vrot.slane %v343_v56, 5  ;;  %v304_v1 = vsel %vm6110_vm4, %v299_v57, %v303_v39  ;;  %v332_v3 = vor.u32 %v331_v59, %v327_v54  ;;  %v353_v7 = vshrl.u32 %v6106_v51, 16  ;;  %v284_v59 = vld [vmem:[%s6065_s11 + $0x38] sm:$0x1] }
  0x21   : > { %v314_v2 = vsel %vm6110_vm4, %v309_v58, %v313_v42  ;;  %v880_v11 = vsel %vm552_vm0, %v6058_v15, 0  ;;  %v323_v12 = vrot.slane %v322_v61, 4  ;;  %v351_v13 = vrot.slane %v349_v0, 5 }
  0x22   : > { %v5266_v9 = vcombine.low %v304_v1, %v314_v2  ;;  %v333_v16 = vrot.slane %v332_v3, 4  ;;  %v355_v17 = vrot.slane %v353_v7, 4  ;;  %v1260_v18 = vcombine.high %v6077_v26, %v6077_v26 }
  0x23   : > { %v1261_v19 = vcombine.high %v6094_v36, %v6094_v36  ;;  %v328_v15 = vsel %vm6110_vm4, %v323_v12, %v327_v54  ;;  %v346_v20 = vor.u32 %v345_v63, %v342_v62  ;;  %v359_v21 = vshll.u32 %v282_v4, 16  ;;  %v273_v63 = vld [vmem:[%s6065_s11 + $0x3c] sm:$0xf]  ;;  %v274_v4 = vld [vmem:[%s6065_s11 + $0x40] sm:$0xf] }
  0x24   : > { %5275 = vmatmul.mubr.msk.bf16.vlgmr.msra.gmra.mxu0 %vm527_vm3, %v5266_v9  ;;  %5284 = vmatmul.mubr.msk.bf16.vlgmr.msra.gmra.mxu1 %vm527_vm3, %v5266_v9  ;;  %v364_v24 = vshrl.u32 %v6124_v8, 16  ;;  %v338_v25 = vsel %vm6110_vm4, %v333_v16, %v337_v60  ;;  %v356_v27 = vor.u32 %v355_v17, %v351_v13  ;;  %v367_v28 = vshll.u32 %v6124_v8, 16 }
  0x25   : > { %900 = vmatpush1.bf16.msra.mxu0 %v874_v33  ;;  %1013 = vmatpush1.bf16.msra.mxu1 %v880_v11  ;;  %v373_v29 = vshll.u32 %v6129_v14, 16  ;;  %v377_v30 = vshrl.u32 %v6129_v14, 16  ;;  %v5267_v33 = vcombine.low %v328_v15, %v338_v25  ;;  %v347_v35 = vrot.slane %v346_v20, 4  ;;  %v275_v15 = vld [vmem:[%s6065_s11 + $0x48] sm:$0xf] }
  0x26   : > { %607 = vmatprep.mubr.bf16.mxu0 %v8766_v5  ;;  %720 = vmatprep.mubr.bf16.mxu1 %v8766_v5  ;;  %v361_v37 = vrot.slane %v359_v21, 5  ;;  %v366_v38 = vrot.slane %v364_v24, 4  ;;  %v357_v39 = vrot.slane %v356_v27, 4  ;;  %v369_v40 = vrot.slane %v367_v28, 5  ;;  %v285_v28 = vld [vmem:[%s6065_s11 + $0x44] sm:$0x1] }
  0x27   : > { %5335 = vmatprep.subr.msk.bf16.mxu0 %vm552_vm0, %v1260_v18  ;;  %5344 = vmatprep.subr.msk.bf16.mxu1 %vm552_vm0, %v1261_v19  ;;  %v375_v41 = vrot.slane %v373_v29, 5  ;;  %v379_v42 = vrot.slane %v377_v30, 4  ;;  %v388_v45 = vshrl.u32 %v6148_v32, 16  ;;  %v391_v47 = vshll.u32 %v6148_v32, 16 }
  0x28   : > { %v352_v48 = vsel %vm6110_vm4, %v347_v35, %v351_v13  ;;  %v397_v49 = vshll.u32 %v272_v43, 16  ;;  %v401_v50 = vshrl.u32 %v272_v43, 16  ;;  %v362_v53 = vsel %vm6110_vm4, %v357_v39, %v361_v37  ;;  %v276_v35 = vld [vmem:[%s6065_s11 + $0x4c] sm:$0xf] }
  0x29   : > { %v370_v54 = vor.u32 %v369_v40, %v366_v38  ;;  %v380_v55 = vor.u32 %v379_v42, %v375_v41  ;;  %v383_v56 = vshll.u32 %v283_v44, 16  ;;  %v390_v57 = vrot.slane %v388_v45, 4  ;;  %v277_v40 = vld [vmem:[%s6065_s11 + $0x54] sm:$0xf] }
  0x2a   : > { %v393_v58 = vrot.slane %v391_v47, 5  ;;  %v5268_v60 = vcombine.low %v352_v48, %v362_v53  ;;  %v399_v61 = vrot.slane %v397_v49, 5  ;;  %v403_v62 = vrot.slane %v401_v50, 4  ;;  %v278_v47 = vld [vmem:[%s6065_s11 + $0x58] sm:$0xf] }
  0x2b   : > { %v371_v0 = vrot.slane %v370_v54, 4  ;;  %v381_v1 = vrot.slane %v380_v55, 4  ;;  %v385_v2 = vrot.slane %v383_v56, 5  ;;  %v412_v7 = vshrl.u32 %v273_v63, 16 }
  0x2c   : > { %5276 = vmatmul.mubr.msk.bf16.gmra.mxu0 %vm527_vm3, %v5267_v33  ;;  %5285 = vmatmul.mubr.msk.bf16.gmra.mxu1 %vm527_vm3, %v5267_v33  ;;  %v394_v3 = vor.u32 %v393_v58, %v390_v57  ;;  %v415_v9 = vshll.u32 %v273_v63, 16  ;;  %v404_v11 = vor.u32 %v403_v62, %v399_v61  ;;  %v407_v12 = vshll.u32 %v284_v59, 16 }
  0x2d   : > { %617 = vmatprep.mubr.bf16.mxu0 %v8766_v5  ;;  %730 = vmatprep.mubr.bf16.mxu1 %v8766_v5  ;;  %v376_v13 = vsel %vm6110_vm4, %v371_v0, %v375_v41  ;;  %v386_v16 = vsel %vm6110_vm4, %v381_v1, %v385_v2  ;;  %v421_v17 = vshll.u32 %v274_v4, 16  ;;  %v425_v18 = vshrl.u32 %v274_v4, 16 }
  0x2e   : > { %v395_v19 = vrot.slane %v394_v3, 4  ;;  %v414_v20 = vrot.slane %v412_v7, 4  ;;  %v417_v21 = vrot.slane %v415_v9, 5  ;;  %v5269_v24 = vcombine.low %v376_v13, %v386_v16  ;;  %v287_v3 = vld [vmem:[%s6065_s11 + $0x5c] sm:$0x1] }
  0x2f   : > { %v405_v25 = vrot.slane %v404_v11, 4  ;;  %v409_v27 = vrot.slane %v407_v12, 5  ;;  %v6179_v29 = vcombine.low %v6068_v22, %v6071_v23  ;;  %v423_v30 = vrot.slane %v421_v17, 5 }
  0x30   : > { %v427_v33 = vrot.slane %v425_v18, 4  ;;  %v400_v37 = vsel %vm6110_vm4, %v395_v19, %v399_v61  ;;  %v436_v38 = vshrl.u32 %v275_v15, 16  ;;  %v439_v39 = vshll.u32 %v275_v15, 16 }
  0x31   : > { %v6187_v41 = vcombine.low %v6086_v31, %v6090_v34  ;;  %v418_v42 = vor.u32 %v417_v21, %v414_v20  ;;  %v6191_v44 = vcombine.low %v6102_v46, %v6106_v51  ;;  %v6195_v22 = vcombine.low %v6124_v8, %v6129_v14 }
  0x32   : > { %v6198_v23 = vcombine.low %v6148_v32, %v272_v43  ;;  %v410_v31 = vsel %vm6110_vm4, %v405_v25, %v409_v27  ;;  %v445_v34 = vshll.u32 %v276_v35, 16  ;;  %v449_v45 = vshrl.u32 %v276_v35, 16  ;;  %v286_v43 = vld [vmem:[%s6065_s11 + $0x50] sm:$0x1] }
  0x33   : > { %v6205_v46 = vcombine.low %v273_v63, %v274_v4  ;;  %v428_v51 = vor.u32 %v427_v33, %v423_v30  ;;  %v431_v8 = vshll.u32 %v285_v28, 16  ;;  %v6209_v14 = vcombine.low %v275_v15, %v276_v35  ;;  %v5369_v35 = vld [vmem:[%s8759_s1 + $0x18] sm:$0xff] }
  0x34   : > { %5277 = vmatmul.mubr.msk.bf16.gmra.mxu0 %vm527_vm3, %v5268_v60  ;;  %5286 = vmatmul.mubr.msk.bf16.gmra.mxu1 %vm527_vm3, %v5268_v60  ;;  %v6211_v32 = vcombine.low %v277_v40, %v278_v47  ;;  %v438_v48 = vrot.slane %v436_v38, 4  ;;  %v441_v49 = vrot.slane %v439_v39, 5  ;;  %v5270_v50 = vcombine.low %v400_v37, %v410_v31 }
  0x35   : > { %627 = vmatprep.mubr.bf16.mxu0 %v8766_v5  ;;  %740 = vmatprep.mubr.bf16.mxu1 %v8766_v5  ;;  %v447_v53 = vrot.slane %v445_v34, 5  ;;  %v451_v54 = vrot.slane %v449_v45, 4  ;;  %v419_v55 = vrot.slane %v418_v42, 4  ;;  %v429_v56 = vrot.slane %v428_v51, 4  ;;  %v1115_v51 = vld [vmem:[%s6065_s11 + $0x10] sm:$0xf] }
  0x36   : > { %v433_v57 = vrot.slane %v431_v8, 5  ;;  %v460_v58 = vshrl.u32 %v277_v40, 16  ;;  %v463_v59 = vshll.u32 %v277_v40, 16  ;;  %v469_v60 = vshll.u32 %v278_v47, 16 }
  0x37   : > { %v473_v61 = vshrl.u32 %v278_v47, 16  ;;  %v442_v62 = vor.u32 %v441_v49, %v438_v48  ;;  %v452_v63 = vor.u32 %v451_v54, %v447_v53  ;;  %v455_v0 = vshll.u32 %v286_v43, 16  ;;  %v1114_v49 = vld [vmem:[%s6065_s11 + $0xc] sm:$0xe] }
  0x38   : > { %v424_v1 = vsel %vm6110_vm4, %v419_v55, %v423_v30  ;;  %v434_v2 = vsel %vm6110_vm4, %v429_v56, %v433_v57  ;;  %v462_v4 = vrot.slane %v460_v58, 4  ;;  %v465_v7 = vrot.slane %v463_v59, 5 }
  0x39   : > { %v471_v9 = vrot.slane %v469_v60, 5  ;;  %v475_v11 = vrot.slane %v473_v61, 4  ;;  %v5271_v12 = vcombine.low %v424_v1, %v434_v2  ;;  %v443_v13 = vrot.slane %v442_v62, 4  ;;  %v1118_v60 = vld [vmem:[%s6065_s11 + $0x1c] sm:$0xf] }
  0x3a   : > { %v453_v16 = vrot.slane %v452_v63, 4  ;;  %v457_v17 = vrot.slane %v455_v0, 5  ;;  %v479_v18 = vshll.u32 %v287_v3, 16  ;;  %v466_v19 = vor.u32 %v465_v7, %v462_v4  ;;  %v1117_v2 = vld [vmem:[%s6065_s11 + $0x18] sm:$0xe] }
  0x3b   : > { %v476_v15 = vor.u32 %v475_v11, %v471_v9  ;;  %v448_v20 = vsel %vm6110_vm4, %v443_v13, %v447_v53  ;;  %v1648_v38 = vcombine.high %v5369_v35, %v5369_v35  ;;  %v6247_v39 = vrot.slane %v5369_v35, %v6049_v10  ;;  %v1119_v3 = vld [vmem:[%s6065_s11 + $0x20] sm:$0x1]  ;;  %v1125_v35 = vld [vmem:[%s6065_s11 + $0x38] sm:$0x1] }
  0x3c   : > { %5278 = vmatmul.mubr.msk.bf16.gmra.mxu0 %vm527_vm3, %v5269_v24  ;;  %5287 = vmatmul.mubr.msk.bf16.gmra.mxu1 %vm527_vm3, %v5269_v24  ;;  %v458_v21 = vsel %vm6110_vm4, %v453_v16, %v457_v17  ;;  %v481_v24 = vrot.slane %v479_v18, 5  ;;  %v467_v25 = vrot.slane %v466_v19, 4  ;;  %v1287_v42 = vsel %vm552_vm0, %v6077_v26, 0  ;;  %v1112_v26 = vld [vmem:[%s6065_s11 + $0x4] sm:$0xf] }
  0x3d   : > { %637 = vmatprep.mubr.bf16.mxu0 %v8766_v5  ;;  %750 = vmatprep.mubr.bf16.mxu1 %v8766_v5  ;;  %v477_v27 = vrot.slane %v476_v15, 4  ;;  %v5272_v28 = vcombine.low %v448_v20, %v458_v21  ;;  %v6250_v40 = vrot.slane %v1648_v38, %v6049_v10  ;;  %v1293_v31 = vsel %vm552_vm0, %v6094_v36, 0  ;;  %v1120_v18 = vld [vmem:[%s6065_s11 + $0x24] sm:$0xe]  ;;  %v1122_v19 = vld [vmem:[%s6065_s11 + $0x2c] sm:$0x1] }
  0x3e   : > { %v472_v30 = vsel %vm6110_vm4, %v467_v25, %v471_v9  ;;  %v1663_v34 = vcombine.high %v6247_v39, %v6247_v39  ;;  %v1164_v36 = vrot.slane %v1112_v26, 5  ;;  %v1171_v48 = vrot.slane %v1115_v51, 5  ;;  %v1124_v25 = vld [vmem:[%s6065_s11 + $0x34] sm:$0xf]  ;;  %v1126_v26 = vld [vmem:[%s6065_s11 + $0x3c] sm:$0xe] }
  0x3f   : > { %v482_v33 = vsel %vm6110_vm4, %v477_v27, %v481_v24  ;;  %v1664_v45 = vcombine.high %v6250_v40, %v6250_v40  ;;  %v5319_v55 = vrot.slane %v1114_v49, 9  ;;  %v1690_v58 = vsel %vm552_vm0, %v6247_v39, 0 }
  0x40   : > { %v5273_v37 = vcombine.low %v472_v30, %v482_v33  ;;  %v1173_v56 = vrot.slane %v1171_v48, 4  ;;  %v1696_v59 = vsel %vm552_vm0, %v6250_v40, 0  ;;  %v1178_v1 = vrot.slane %v1118_v60, 5  ;;  %v1123_v33 = vld [vmem:[%s6065_s11 + $0x30] sm:$0xe] }
  0x41   : > { %v1172_v63 = vsel %vm6310_vm7, %v5319_v55, %v1171_v48  ;;  %v5320_v7 = vrot.slane %v1117_v2, 9  ;;  %v1181_v11 = vrot.slane %v1119_v3, 5  ;;  %v5321_v20 = vrot.slane %v1120_v18, 9  ;;  %v1133_v55 = vld [vmem:[%s6065_s11 + $0x58] sm:$0xf] }
  0x42   : > { %v1180_v9 = vrot.slane %v1178_v1, 4  ;;  %v1188_v24 = vrot.slane %v1122_v19, 5  ;;  %v1192_v30 = vrot.slane %v1124_v25, 5  ;;  %v5322_v38 = vrot.slane %v1123_v33, 9  ;;  %v1134_v60 = vld [vmem:[%s6065_s11 + $0x5c] sm:$0x1] }
  0x43   : > { %v1179_v13 = vsel %vm6310_vm7, %v5320_v7, %v1178_v1  ;;  %v1195_v40 = vrot.slane %v1125_v35, 5 }
  0x44   : > { %5279 = vmatmul.mubr.msk.bf16.gmra.mxu0 %vm527_vm3, %v5270_v50  ;;  %5288 = vmatmul.mubr.msk.bf16.gmra.mxu1 %vm527_vm3, %v5270_v50  ;;  %v1116_v50 = vld [vmem:[%s6065_s11 + $0x14] sm:$0x1]  ;;  %v1182_v16 = vsel %vm6310_vm7, %v1180_v9, %v1181_v11  ;;  %v1194_v39 = vrot.slane %v1192_v30, 4 }
  0x45   : > { %647 = vmatprep.mubr.bf16.mxu0 %v8766_v5  ;;  %760 = vmatprep.mubr.bf16.mxu1 %v8766_v5  ;;  %v1174_v57 = vrot.slane %v1116_v50, 5  ;;  %v5329_v15 = vcombine.low %v1179_v13, %v1182_v16 }
  0x47   : > { %v1175_v0 = vsel %vm6310_vm7, %v1173_v56, %v1174_v57 }
  0x48   : > { %v5328_v4 = vcombine.low %v1172_v63, %v1175_v0  ;;  %v1216_v0 = vrot.slane %v1134_v60, 5  ;;  %v5883_v60 = vld [vmem:[%s6065_s11 + $0x48] sm:$0xff]  }
  0x4c   : > { %5280 = vmatmul.mubr.msk.bf16.gmra.mxu0 %vm527_vm3, %v5271_v12  ;;  %5289 = vmatmul.mubr.msk.bf16.gmra.mxu1 %vm527_vm3, %v5271_v12  ;;  %v1121_v12 = vld [vmem:[%s6065_s11 + $0x28] sm:$0xf] }
  0x4d   : > { %657 = vmatprep.mubr.bf16.mxu0 %v8766_v5  ;;  %770 = vmatprep.mubr.bf16.mxu1 %v8766_v5  ;;  %v1185_v17 = vrot.slane %v1121_v12, 5  ;;  %v5877_v12 = vld [vmem:[%s6065_s11 + $0xc] sm:$0xff]  }
  0x4f   : > { %v1187_v21 = vrot.slane %v1185_v17, 4  ;;  %v1186_v27 = vsel %vm6310_vm7, %v5321_v20, %v1185_v17 }
  0x54   : > { %5281 = vmatmul.mubr.msk.bf16.gmra.mxu0 %vm527_vm3, %v5272_v28  ;;  %5290 = vmatmul.mubr.msk.bf16.gmra.mxu1 %vm527_vm3, %v5272_v28  ;;  %v1189_v28 = vsel %vm6310_vm7, %v1187_v21, %v1188_v24  ;;  %v5879_v24 = vld [vmem:[%s6065_s11 + $0x18] sm:$0xff]  }
  0x55   : > { %667 = vmatprep.mubr.bf16.mxu0 %v8766_v5  ;;  %780 = vmatprep.mubr.bf16.mxu1 %v8766_v5 }
  0x5c   : > { %5282 = vmatmul.mubr.msk.bf16.gmra.mxu0 %vm527_vm3, %v5273_v37  ;;  %5291 = vmatmul.mubr.msk.bf16.gmra.mxu1 %vm527_vm3, %v5273_v37  ;;  %v5330_v37 = vcombine.low %v1186_v27, %v1189_v28 }
  0x5d   : > { %917 = vmatprep.mubr.bf16.mxu0 %v8766_v5  ;;  %1030 = vmatprep.mubr.bf16.mxu1 %v8766_v5 }
  0x64   : > { %5301 = vmatmul.mubr.msk.bf16.vlgmr.msra.gmra.mxu0 %vm527_vm3, %v6179_v29  ;;  %5310 = vmatmul.mubr.msk.bf16.vlgmr.msra.gmra.mxu1 %vm527_vm3, %v6179_v29  ;;  %v1111_v29 = vld [vmem:[%s6065_s11] sm:$0xe] }
  0x65   : > { %1313 = vmatpush1.bf16.msra.mxu0 %v1287_v42  ;;  %1426 = vmatpush1.bf16.msra.mxu1 %v1293_v31  ;;  %v1127_v42 = vld [vmem:[%s6065_s11 + $0x40] sm:$0xf]  ;;  %v1193_v31 = vsel %vm6310_vm7, %v5322_v38, %v1192_v30 }
  0x66   : > { %927 = vmatprep.mubr.bf16.mxu0 %v8766_v5  ;;  %1040 = vmatprep.mubr.bf16.mxu1 %v8766_v5 }
  0x67   : > { %5378 = vmatprep.subr.msk.bf16.mxu0 %vm552_vm0, %v1663_v34  ;;  %5387 = vmatprep.subr.msk.bf16.mxu1 %vm552_vm0, %v1664_v45  ;;  %v1196_v34 = vsel %vm6310_vm7, %v1194_v39, %v1195_v40  ;;  %v1199_v45 = vrot.slane %v1127_v42, 5  ;;  %v5880_v39 = vld [vmem:[%s6065_s11 + $0x24] sm:$0xff]  }
  0x6c   : > { %5302 = vmatmul.mubr.msk.bf16.gmra.mxu0 %vm527_vm3, %v6187_v41  ;;  %5311 = vmatmul.mubr.msk.bf16.gmra.mxu1 %vm527_vm3, %v6187_v41  ;;  %v1113_v41 = vld [vmem:[%s6065_s11 + $0x8] sm:$0x1] }
  0x6d   : > { %937 = vmatprep.mubr.bf16.mxu0 %v8766_v5  ;;  %1050 = vmatprep.mubr.bf16.mxu1 %v8766_v5  ;;  %v1167_v47 = vrot.slane %v1113_v41, 5  ;;  %v5323_v41 = vrot.slane %v1126_v26, 9 }
  0x74   : > { %5303 = vmatmul.mubr.msk.bf16.gmra.mxu0 %vm527_vm3, %v6191_v44  ;;  %5312 = vmatmul.mubr.msk.bf16.gmra.mxu1 %vm527_vm3, %v6191_v44  ;;  %v5420_v44 = vld [vmem:[%s8759_s1 + $0x20] sm:$0xff] }
  0x75   : > { %947 = vmatprep.mubr.bf16.mxu0 %v8766_v5  ;;  %1060 = vmatprep.mubr.bf16.mxu1 %v8766_v5  ;;  %v2234_v8 = vcombine.high %v5420_v44, %v5420_v44  ;;  %v6328_v53 = vrot.slane %v5420_v44, %v6049_v10  ;;  %v1201_v44 = vrot.slane %v1199_v45, 4 }
  0x77   : > { %v6331_v54 = vrot.slane %v2234_v8, %v6049_v10  ;;  %v2249_v61 = vcombine.high %v6328_v53, %v6328_v53  ;;  %v2276_v13 = vsel %vm552_vm0, %v6328_v53, 0 }
  0x79   : > { %v2250_v62 = vcombine.high %v6331_v54, %v6331_v54  ;;  %v2282_v16 = vsel %vm552_vm0, %v6331_v54, 0 }
  0x7c   : > { %5304 = vmatmul.mubr.msk.bf16.gmra.mxu0 %vm527_vm3, %v6195_v22  ;;  %5313 = vmatmul.mubr.msk.bf16.gmra.mxu1 %vm527_vm3, %v6195_v22  ;;  %v5318_v22 = vrot.slane %v1111_v29, 9  ;;  %v5331_v29 = vcombine.low %v1193_v31, %v1196_v34 }
  0x7d   : > { %957 = vmatprep.mubr.bf16.mxu0 %v8766_v5  ;;  %1070 = vmatprep.mubr.bf16.mxu1 %v8766_v5 }
  0x84   : > { %5305 = vmatmul.mubr.msk.bf16.gmra.mxu0 %vm527_vm3, %v6198_v23  ;;  %5314 = vmatmul.mubr.msk.bf16.gmra.mxu1 %vm527_vm3, %v6198_v23  ;;  %v1166_v23 = vrot.slane %v1164_v36, 4 }
  0x85   : > { %967 = vmatprep.mubr.bf16.mxu0 %v8766_v5  ;;  %1080 = vmatprep.mubr.bf16.mxu1 %v8766_v5 }
  0x86   : > { %v1168_v43 = vsel %vm6310_vm7, %v1166_v23, %v1167_v47  ;;  %v1130_v23 = vld [vmem:[%s6065_s11 + $0x4c] sm:$0xf]  ;;  %v1200_v47 = vsel %vm6310_vm7, %v5323_v41, %v1199_v45  ;;  %v5881_v41 = vld [vmem:[%s6065_s11 + $0x30] sm:$0xff]  }
  0x87   : > { %v1206_v8 = vrot.slane %v1130_v23, 5 }
  0x89   : > { %v1208_v50 = vrot.slane %v1206_v8, 4 }
  0x8c   : > { %5306 = vmatmul.mubr.msk.bf16.gmra.mxu0 %vm527_vm3, %v6205_v46  ;;  %5315 = vmatmul.mubr.msk.bf16.gmra.mxu1 %vm527_vm3, %v6205_v46  ;;  %v8781_v46 = vmov 0 }
  0x8d   : > { %977 = vmatprep.mubr.bf16.mxu0 %v8766_v5  ;;  %1090 = vmatprep.mubr.bf16.mxu1 %v8766_v5  ;;  %v8782_v46 = vsel %vm6310_vm7, 4294967295, %v8781_v46 }
  0x8e   : > { %8783 = vst [vmem:[#allocation5_spill] sm:$0xff] %v8782_v46  ;;  %v5400_v46 = vld [vmem:[%s6065_s11 + $0x1c] sm:$0xf] }
  0x94   : > { %5307 = vmatmul.mubr.msk.bf16.gmra.mxu0 %vm527_vm3, %v6209_v14  ;;  %5316 = vmatmul.mubr.msk.bf16.gmra.mxu1 %vm527_vm3, %v6209_v14  ;;  %v1165_v14 = vsel %vm6310_vm7, %v5318_v22, %v1164_v36  ;;  %v1128_v36 = vld [vmem:[%s6065_s11 + $0x44] sm:$0x1] }
  0x95   : > { %987 = vmatprep.mubr.bf16.mxu0 %v8766_v5  ;;  %1100 = vmatprep.mubr.bf16.mxu1 %v8766_v5  ;;  %v1202_v22 = vrot.slane %v1128_v36, 5 }
  0x97   : > { %v1203_v51 = vsel %vm6310_vm7, %v1201_v44, %v1202_v22 }
  0x98   : > { %v5332_v48 = vcombine.low %v1200_v47, %v1203_v51 }
  0x9c   : > { %5308 = vmatmul.mubr.msk.bf16.gmra.mxu0 %vm527_vm3, %v6211_v32  ;;  %5317 = vmatmul.mubr.msk.bf16.gmra.mxu1 %vm527_vm3, %v6211_v32  ;;  %v5327_v32 = vcombine.low %v1165_v14, %v1168_v43  ;;  %v1129_v14 = vld [vmem:[%s6065_s11 + $0x48] sm:$0xe]  ;;  %v1131_v43 = vld [vmem:[%s6065_s11 + $0x50] sm:$0x1] }
  0x9d   : > { %1330 = vmatprep.mubr.bf16.mxu0 %v8766_v5  ;;  %1443 = vmatprep.mubr.bf16.mxu1 %v8766_v5  ;;  %v5324_v49 = vrot.slane %v1129_v14, 9 }
  0x9f   : > { %v1207_v56 = vsel %vm6310_vm7, %v5324_v49, %v1206_v8 }
  0xa4   : > { %5336 = vmatmul.mubr.msk.bf16.vlgmr.msra.gmra.mxu0 %vm527_vm3, %v5327_v32  ;;  %5345 = vmatmul.mubr.msk.bf16.vlgmr.msra.gmra.mxu1 %vm527_vm3, %v5327_v32  ;;  %v1209_v32 = vrot.slane %v1131_v43, 5 }
  0xa5   : > { %1716 = vmatpush1.bf16.msra.mxu0 %v1690_v58  ;;  %1829 = vmatpush1.bf16.msra.mxu1 %v1696_v59  ;;  %v1213_v58 = vrot.slane %v1133_v55, 5  ;;  %v1132_v59 = vld [vmem:[%s6065_s11 + $0x54] sm:$0xe] }
  0xa6   : > { %1340 = vmatprep.mubr.bf16.mxu0 %v8766_v5  ;;  %1453 = vmatprep.mubr.bf16.mxu1 %v8766_v5  ;;  %v1210_v57 = vsel %vm6310_vm7, %v1208_v50, %v1209_v32 }
  0xa7   : > { %5429 = vmatprep.subr.msk.bf16.mxu0 %vm552_vm0, %v2249_v61  ;;  %5438 = vmatprep.subr.msk.bf16.mxu1 %vm552_vm0, %v2250_v62  ;;  %v5333_v61 = vcombine.low %v1207_v56, %v1210_v57  ;;  %v5325_v62 = vrot.slane %v1132_v59, 9  ;;  %v1215_v63 = vrot.slane %v1213_v58, 4 }
  0xa9   : > { %v1214_v1 = vsel %vm6310_vm7, %v5325_v62, %v1213_v58  ;;  %v1217_v2 = vsel %vm6310_vm7, %v1215_v63, %v1216_v0  ;;  %v5397_v0 = vld [vmem:[%s6065_s11 + $0x10] sm:$0xf] }
  0xaa   : > { %v5334_v3 = vcombine.low %v1214_v1, %v1217_v2 }
  0xac   : > { %5337 = vmatmul.mubr.msk.bf16.gmra.mxu0 %vm527_vm3, %v5328_v4  ;;  %5346 = vmatmul.mubr.msk.bf16.gmra.mxu1 %vm527_vm3, %v5328_v4  ;;  %v5479_v4 = vld [vmem:[%s8759_s1 + $0x28] sm:$0xff] }
  0xad   : > { %1350 = vmatprep.mubr.bf16.mxu0 %v8766_v5  ;;  %1463 = vmatprep.mubr.bf16.mxu1 %v8766_v5  ;;  %v2708_v7 = vcombine.high %v5479_v4, %v5479_v4  ;;  %v6425_v9 = vrot.slane %v5479_v4, %v6049_v10 }
  0xaf   : > { %v6428_v11 = vrot.slane %v2708_v7, %v6049_v10  ;;  %v2723_v17 = vcombine.high %v6425_v9, %v6425_v9  ;;  %v2025_v7 = vshll.u32 %v5397_v0, 16 }
  0xb1   : > { %v2724_v18 = vcombine.high %v6428_v11, %v6428_v11 }
  0xb4   : > { %5338 = vmatmul.mubr.msk.bf16.gmra.mxu0 %vm527_vm3, %v5329_v15  ;;  %5347 = vmatmul.mubr.msk.bf16.gmra.mxu1 %vm527_vm3, %v5329_v15 }
  0xb5   : > { %1360 = vmatprep.mubr.bf16.mxu0 %v8766_v5  ;;  %1473 = vmatprep.mubr.bf16.mxu1 %v8766_v5 }
  0xbc   : > { %5339 = vmatmul.mubr.msk.bf16.gmra.mxu0 %vm527_vm3, %v5330_v37  ;;  %5348 = vmatmul.mubr.msk.bf16.gmra.mxu1 %vm527_vm3, %v5330_v37 }
  0xbd   : > { %1370 = vmatprep.mubr.bf16.mxu0 %v8766_v5  ;;  %1483 = vmatprep.mubr.bf16.mxu1 %v8766_v5 }
  0xc4   : > { %5340 = vmatmul.mubr.msk.bf16.gmra.mxu0 %vm527_vm3, %v5331_v29  ;;  %5349 = vmatmul.mubr.msk.bf16.gmra.mxu1 %vm527_vm3, %v5331_v29 }
  0xc5   : > { %1380 = vmatprep.mubr.bf16.mxu0 %v8766_v5  ;;  %1493 = vmatprep.mubr.bf16.mxu1 %v8766_v5 }
  0xcc   : > { %5341 = vmatmul.mubr.msk.bf16.gmra.mxu0 %vm527_vm3, %v5332_v48  ;;  %5350 = vmatmul.mubr.msk.bf16.gmra.mxu1 %vm527_vm3, %v5332_v48  ;;  %v5882_v48 = vld [vmem:[%s6065_s11 + $0x3c] sm:$0xff]  }
  0xcd   : > { %1390 = vmatprep.mubr.bf16.mxu0 %v8766_v5  ;;  %1503 = vmatprep.mubr.bf16.mxu1 %v8766_v5 }
  0xd4   : > { %5342 = vmatmul.mubr.msk.bf16.gmra.mxu0 %vm527_vm3, %v5333_v61  ;;  %5351 = vmatmul.mubr.msk.bf16.gmra.mxu1 %vm527_vm3, %v5333_v61  ;;  %v5396_v61 = vld [vmem:[%s6065_s11 + $0xc] sm:$0xf] }
  0xd5   : > { %1400 = vmatprep.mubr.bf16.mxu0 %v8766_v5  ;;  %1513 = vmatprep.mubr.bf16.mxu1 %v8766_v5  ;;  %v2019_v4 = vshll.u32 %v5396_v61, 16 }
  0xdc   : > { %5343 = vmatmul.mubr.msk.bf16.gmra.mxu0 %vm527_vm3, %v5334_v3  ;;  %5352 = vmatmul.mubr.msk.bf16.gmra.mxu1 %vm527_vm3, %v5334_v3  ;;  %v2016_v3 = vshrl.u32 %v5396_v61, 16  ;;  %v5399_v61 = vld [vmem:[%s6065_s11 + $0x18] sm:$0xf] }
  0xdd   : > { %1733 = vmatprep.mubr.bf16.mxu0 %v8766_v5  ;;  %1846 = vmatprep.mubr.bf16.mxu1 %v8766_v5 }
  0xe4   : > { %v6439_v19 = vpop.f32.mrf.mxu0  ;;  %v6441_v15 = vpop.f32.mrf.mxu1  ;;  %5379 = vmatmul.mubr.msk.bf16.vlgmr.msra.gmra.mxu0 %vm527_vm3, %v5877_v12  ;;  %5388 = vmatmul.mubr.msk.bf16.vlgmr.msra.gmra.mxu1 %vm527_vm3, %v5877_v12  ;;  %v2029_v12 = vshrl.u32 %v5397_v0, 16  ;;  %v5398_v0 = vld [vmem:[%s6065_s11 + $0x14] sm:$0x1] }
  0xe5   : > { %2302 = vmatpush1.bf16.msra.mxu0 %v2276_v13  ;;  %2415 = vmatpush1.bf16.msra.mxu1 %v2282_v16 }
  0xe6   : > { %v6445_v53 = vpop.f32.mrf.mxu0  ;;  %v6447_v54 = vpop.f32.mrf.mxu1  ;;  %1743 = vmatprep.mubr.bf16.mxu0 %v8766_v5  ;;  %1856 = vmatprep.mubr.bf16.mxu1 %v8766_v5 }
  0xe7   : > { %5488 = vmatprep.subr.msk.bf16.mxu0 %vm552_vm0, %v2723_v17  ;;  %5497 = vmatprep.subr.msk.bf16.mxu1 %vm552_vm0, %v2724_v18 }
  0xe8   : > { %v6453_v20 = vpop.f32.mrf.mxu0  ;;  %v6455_v21 = vpop.f32.mrf.mxu1 }
  0xea   : > { %v6458_v25 = vpop.f32.mrf.mxu0  ;;  %v6460_v27 = vpop.f32.mrf.mxu1 }
  0xec   : > { %v6462_v28 = vpop.f32.mrf.mxu0  ;;  %v6464_v30 = vpop.f32.mrf.mxu1  ;;  %5380 = vmatmul.mubr.msk.bf16.gmra.mxu0 %vm527_vm3, %v5879_v24  ;;  %5389 = vmatmul.mubr.msk.bf16.gmra.mxu1 %vm527_vm3, %v5879_v24  ;;  %v5884_v24 = vld [vmem:[%s6065_s11 + $0x54] sm:$0xff]  }
  0xed   : > { %1753 = vmatprep.mubr.bf16.mxu0 %v8766_v5  ;;  %1866 = vmatprep.mubr.bf16.mxu1 %v8766_v5 }
  0xee   : > { %v6470_v33 = vpop.f32.mrf.mxu0  ;;  %v6472_v35 = vpop.f32.mrf.mxu1 }
  0xf0   : > { %v6474_v37 = vpop.f32.mrf.mxu0  ;;  %v6476_v38 = vpop.f32.mrf.mxu1 }
  0xf2   : > { %v6479_v40 = vpop.f32.mrf.mxu0  ;;  %v6481_v42 = vpop.f32.mrf.mxu1 }
  0xf4   : > { %v6483_v31 = vpop.f32.mrf.mxu0  ;;  %v6485_v34 = vpop.f32.mrf.mxu1  ;;  %5381 = vmatmul.mubr.msk.bf16.gmra.mxu0 %vm527_vm3, %v5880_v39  ;;  %5390 = vmatmul.mubr.msk.bf16.gmra.mxu1 %vm527_vm3, %v5880_v39  ;;  %v2018_v39 = vrot.slane %v2016_v3, 4 }
  0xf5   : > { %1763 = vmatprep.mubr.bf16.mxu0 %v8766_v5  ;;  %1876 = vmatprep.mubr.bf16.mxu1 %v8766_v5 }
  0xf6   : > { %v6491_v45 = vpop.f32.mrf.mxu0  ;;  %v6493_v26 = vpop.f32.mrf.mxu1 }
  0xf8   : > { %v6495_v36 = vpop.f32.mrf.mxu0  ;;  %v6497_v29 = vpop.f32.mrf.mxu1 }
  0xfa   : > { %v6500_v44 = vpop.f32.mrf.mxu0  ;;  %v6502_v22 = vpop.f32.mrf.mxu1 }
  0xfc   : > { %v6504_v23 = vpop.f32.mrf.mxu0  ;;  %v6506_v47 = vpop.f32.mrf.mxu1  ;;  %5382 = vmatmul.mubr.msk.bf16.gmra.mxu0 %vm527_vm3, %v5881_v41  ;;  %5391 = vmatmul.mubr.msk.bf16.gmra.mxu1 %vm527_vm3, %v5881_v41  ;;  %v2021_v41 = vrot.slane %v2019_v4, 5  ;;  %v2040_v4 = vshrl.u32 %v5399_v61, 16 }
  0xfd   : > { %1773 = vmatprep.mubr.bf16.mxu0 %v8766_v5  ;;  %1886 = vmatprep.mubr.bf16.mxu1 %v8766_v5 }
  0xfe   : > { %v6512_v51 = vpop.f32.mrf.mxu0  ;;  %v6514_v8 = vpop.f32.mrf.mxu1  ;;  %v2022_v3 = vor.u32 %v2021_v41, %v2018_v39  ;;  %v5885_v41 = vld [vmem:[%s6065_s11 + $0x60] sm:$0xff]  }
 0x100   : > { %v6516_v14 = vpop.f32.mrf.mxu0  ;;  %v6518_v43 = vpop.f32.mrf.mxu1 }
 0x102   : > { %v6521_v49 = vpop.f32.mrf.mxu0  ;;  %v6523_v50 = vpop.f32.mrf.mxu1 }
 0x104   : > { %v6525_v32 = vpop.f32.mrf.mxu0  ;;  %v6527_v55 = vpop.f32.mrf.mxu1  ;;  %5383 = vmatmul.mubr.msk.bf16.gmra.mxu0 %vm527_vm3, %v5882_v48  ;;  %5392 = vmatmul.mubr.msk.bf16.gmra.mxu1 %vm527_vm3, %v5882_v48  ;;  %v6565_v48 = vrot.slane %v2025_v7, 5  ;;  %v2043_v7 = vshll.u32 %v5399_v61, 16  ;;  %v2023_v61 = vrot.slane %v2022_v3, 4 }
 0x105   : > { %8784 = vst [vmem:[#allocation6_spill] sm:$0xff] %v6527_v55  ;;  %1783 = vmatprep.mubr.bf16.mxu0 %v8766_v5  ;;  %1896 = vmatprep.mubr.bf16.mxu1 %v8766_v5 }
 0x106   : > { %v6533_v56 = vpop.f32.mrf.mxu0  ;;  %v6535_v57 = vpop.f32.mrf.mxu1 }
 0x107   : > { %8785 = vst [vmem:[#allocation7_spill] sm:$0xff] %v6533_v56  ;;  %8786 = vst [vmem:[#allocation8_spill] sm:$0xff] %v6535_v57 }
 0x108   : > { %v6537_v58 = vpop.f32.mrf.mxu0  ;;  %v6539_v59 = vpop.f32.mrf.mxu1 }
 0x109   : > { %8787 = vst [vmem:[#allocation9_spill] sm:$0xff] %v6537_v58  ;;  %8788 = vst [vmem:[#allocation10_spill] sm:$0xff] %v6539_v59 }
 0x10a   : > { %v6543_v62 = vpop.f32.mrf.mxu0  ;;  %v6545_v63 = vpop.f32.mrf.mxu1 }
 0x10b   : > { %8789 = vst [vmem:[#allocation11_spill] sm:$0xff] %v6543_v62  ;;  %8790 = vst [vmem:[#allocation12_spill] sm:$0xff] %v6545_v63  ;;  %v2042_v63 = vrot.slane %v2040_v4, 4  ;;  %v2045_v62 = vrot.slane %v2043_v7, 5 }
 0x10c   : > { %v6548_v1 = vpop.f32.mrf.mxu0  ;;  %v6550_v2 = vpop.f32.mrf.mxu1  ;;  %5384 = vmatmul.mubr.msk.bf16.gmra.mxu0 %vm527_vm3, %v5883_v60  ;;  %5393 = vmatmul.mubr.msk.bf16.gmra.mxu1 %vm527_vm3, %v5883_v60  ;;  %v2031_v60 = vrot.slane %v2029_v12, 4  ;;  %v8801_v12 = vmov 0  }
 0x10d   : > { %8791 = vst [vmem:[#allocation13_spill] sm:$0xff] %v6548_v1  ;;  %8792 = vst [vmem:[#allocation14_spill] sm:$0xff] %v6550_v2  ;;  %1793 = vmatprep.mubr.bf16.mxu0 %v8766_v5  ;;  %1906 = vmatprep.mubr.bf16.mxu1 %v8766_v5  ;;  %v5402_v2 = vld [vmem:[%s6065_s11 + $0x24] sm:$0xf] }
 0x10e   : > { %v6556_v13 = vpop.f32.mrf.mxu0  ;;  %v6558_v16 = vpop.f32.mrf.mxu1  ;;  %v2064_v57 = vshrl.u32 %v5402_v2, 16 }
 0x10f   : > { %8793 = vst [vmem:[#allocation15_spill] sm:$0xff] %v6556_v13  ;;  %8794 = vst [vmem:[#allocation16_spill] sm:$0xff] %v6558_v16 }
 0x110   : > { %v6560_v17 = vpop.f32.mrf.mxu0  ;;  %v6562_v18 = vpop.f32.mrf.mxu1 }
 0x111   : > { %8795 = vst [vmem:[#allocation17_spill] sm:$0xff] %v6560_v17  ;;  %8796 = vst [vmem:[#allocation18_spill] sm:$0xff] %v6562_v18  ;;  %v2049_v18 = vshll.u32 %v5400_v46, 16 }
 0x112   : > { %v6568_v6 = vpop.f32.mrf.mxu0  ;;  %v6570_v5 = vpop.f32.mrf.mxu1 }
 0x113   : > { %8797 = vst [vmem:[#allocation19_spill] sm:$0xff] %v6568_v6  ;;  %8798 = vst [vmem:[#allocation20_spill] sm:$0xff] %v6570_v5  ;;  %v2032_v5 = vor.u32 %v2031_v60, %v6565_v48  ;;  %v2035_v6 = vshll.u32 %v5398_v0, 16  ;;  %v5522_v60 = vld [vmem:[%s8759_s1 + $0x30] sm:$0xff] }
 0x114   : > { %v6574_v13 = vpop.f32.mrf.mxu0  ;;  %v6576_v17 = vpop.f32.mrf.mxu1  ;;  %5385 = vmatmul.mubr.msk.bf16.gmra.mxu0 %vm527_vm3, %v5884_v24  ;;  %5394 = vmatmul.mubr.msk.bf16.gmra.mxu1 %vm527_vm3, %v5884_v24  ;;  %v5403_v24 = vld [vmem:[%s6065_s11 + $0x28] sm:$0xf]  ;;  %v3111_v4 = vcombine.high %v5522_v60, %v5522_v60 }
 0x115   : > { %8799 = vst [vmem:[#allocation21_spill] sm:$0xff] %v6574_v13  ;;  %8800 = vst [vmem:[#allocation22_spill] sm:$0xff] %v6576_v17  ;;  %1803 = vmatprep.mubr.bf16.mxu0 %v8801_v12  ;;  %1916 = vmatprep.mubr.bf16.mxu1 %v8801_v12  ;;  %v2053_v13 = vshrl.u32 %v5400_v46, 16  ;;  %v2033_v46 = vrot.slane %v2032_v5, 4  ;;  %v2037_v0 = vrot.slane %v2035_v6, 5  ;;  %v2073_v56 = vshll.u32 %v5403_v24, 16 }
 0x116   : > { %v6583_v16 = vpop.f32.mrf.mxu0  ;;  %v6585_v17 = vpop.f32.mrf.mxu1  ;;  %v2077_v3 = vshrl.u32 %v5403_v24, 16  ;;  %v2046_v5 = vor.u32 %v2045_v62, %v2042_v63  ;;  %v2028_v6 = vsel %vm6110_vm4, %v2023_v61, %v6565_v48  ;;  %v2066_v62 = vrot.slane %v2064_v57, 4 }
 0x117   : > { %8802 = vst [vmem:[#allocation23_spill] sm:$0xff] %v6583_v16  ;;  %8803 = vst [vmem:[#allocation24_spill] sm:$0xff] %v6585_v17  ;;  %v6597_v16 = vrot.slane %v2049_v18, 5  ;;  %v2055_v17 = vrot.slane %v2053_v13, 4  ;;  %v6626_v48 = vrot.slane %v5522_v60, %v6049_v10  ;;  %v6629_v61 = vrot.slane %v3111_v4, %v6049_v10 }
 0x118   : > { %v6589_v1 = vpop.f32.mrf.mxu0  ;;  %v6591_v39 = vpop.f32.mrf.mxu1  ;;  %v2750_v57 = vsel %vm552_vm0, %v6425_v9, 0  ;;  %v2756_v4 = vsel %vm552_vm0, %v6428_v11, 0 }
 0x119   : > { %8804 = vst [vmem:[#allocation25_spill] sm:$0xff] %v6589_v1  ;;  %8805 = vst [vmem:[#allocation26_spill] sm:$0xff] %v6591_v39  ;;  %v5401_v1 = vld [vmem:[%s6065_s11 + $0x20] sm:$0x1]  ;;  %v2067_v39 = vshll.u32 %v5402_v2, 16  ;;  %v2038_v2 = vsel %vm6110_vm4, %v2033_v46, %v2037_v0  ;;  %v2056_v13 = vor.u32 %v2055_v17, %v6597_v16  ;;  %v2047_v0 = vrot.slane %v2046_v5, 4 }
 0x11a   : > { %v6599_v59 = vpop.f32.mrf.mxu0  ;;  %v6601_v58 = vpop.f32.mrf.mxu1  ;;  %v2059_v18 = vshll.u32 %v5401_v1, 16  ;;  %v5421_v17 = vcombine.low %v2028_v6, %v2038_v2  ;;  %v3126_v2 = vcombine.high %v6626_v48, %v6626_v48  ;;  %v3127_v9 = vcombine.high %v6629_v61, %v6629_v61 }
 0x11b   : > { %8806 = vst [vmem:[#allocation27_spill] sm:$0xff] %v6601_v58  ;;  %v2069_v63 = vrot.slane %v2067_v39, 5  ;;  %v5404_v58 = vld [vmem:[%s6065_s11 + $0x2c] sm:$0x1]  ;;  %v2052_v11 = vsel %vm6110_vm4, %v2047_v0, %v6597_v16 }
 0x11c   : > { %v6604_v7 = vpop.f32.mrf.mxu0  ;;  %v6606_v55 = vpop.f32.mrf.mxu1  ;;  %5386 = vmatmul.mubr.msk.bf16.gmra.mxu0 %vm527_vm3, %v5885_v41  ;;  %5395 = vmatmul.mubr.msk.bf16.gmra.mxu1 %vm527_vm3, %v5885_v41  ;;  %v6622_v41 = vrot.slane %v2073_v56, 5  ;;  %v2057_v56 = vrot.slane %v2056_v13, 4  ;;  %v2061_v39 = vrot.slane %v2059_v18, 5 }
 0x11d   : > { %8807 = vst [vmem:[#allocation28_spill] sm:$0xff] %v6604_v7  ;;  %8808 = vst [vmem:[#allocation29_spill] sm:$0xff] %v6606_v55  ;;  %2319 = vmatprep.mubr.bf16.mxu0 %v8801_v12  ;;  %2432 = vmatprep.mubr.bf16.mxu1 %v8801_v12  ;;  %v2079_v7 = vrot.slane %v2077_v3, 4  ;;  %v5406_v3 = vld [vmem:[%s6065_s11 + $0x34] sm:$0xf]  ;;  %v2070_v10 = vor.u32 %v2069_v63, %v2066_v62 }
 0x11e   : > { %v6618_v24 = vpop.f32.mrf.mxu0  ;;  %v6620_v55 = vpop.f32.mrf.mxu1  ;;  %v2062_v63 = vsel %vm6110_vm4, %v2057_v56, %v2061_v39 }
 0x11f   : > { %8809 = vst [vmem:[#allocation30_spill] sm:$0xff] %v6618_v24  ;;  %8810 = vst [vmem:[#allocation31_spill] sm:$0xff] %v6620_v55  ;;  %v5405_v55 = vld [vmem:[%s6065_s11 + $0x30] sm:$0xf]  ;;  %v2071_v16 = vrot.slane %v2070_v10, 4  ;;  %v5422_v10 = vcombine.low %v2052_v11, %v2062_v63 }
 0x120   : > { %v6631_v46 = vpop.f32.mrf.mxu0  ;;  %v6633_v1 = vpop.f32.mrf.mxu1  ;;  %v2088_v6 = vshrl.u32 %v5405_v55, 16  ;;  %v2091_v5 = vshll.u32 %v5405_v55, 16  ;;  %v8851_v52 = vld [vmem:[#allocation26_spill] sm:$0xff] }
 0x121   : > { %8811 = vst [vmem:[#allocation32_spill] sm:$0xff] %v6631_v46  ;;  %8812 = vst [vmem:[#allocation33_spill] sm:$0xff] %v6633_v1  ;;  %v2080_v46 = vor.u32 %v2079_v7, %v6622_v41  ;;  %v2083_v1 = vshll.u32 %v5404_v58, 16  ;;  %v2097_v7 = vshll.u32 %v5406_v3, 16  ;;  %v2101_v58 = vshrl.u32 %v5406_v3, 16 }
 0x122   : > { %v6639_v24 = vpop.f32.mrf.mxu0  ;;  %v6641_v60 = vpop.f32.mrf.mxu1  ;;  %v2093_v56 = vrot.slane %v2091_v5, 5  ;;  %v2076_v5 = vsel %vm6110_vm4, %v2071_v16, %v6622_v41 }
 0x123   : > { %8813 = vst [vmem:[#allocation34_spill] sm:$0xff] %v6639_v24  ;;  %8814 = vst [vmem:[#allocation35_spill] sm:$0xff] %v6641_v60 }
 0x124   : > { %v919_v13 = vpop.f32.mrf.mxu0  ;;  %v1032_v18 = vpop.f32.mrf.mxu1  ;;  %5430 = vmatmul.mubr.msk.bf16.vlgmr.msra.gmra.mxu0 %vm527_vm3, %v5421_v17  ;;  %5439 = vmatmul.mubr.msk.bf16.vlgmr.msra.gmra.mxu1 %vm527_vm3, %v5421_v17  ;;  %v2081_v17 = vrot.slane %v2080_v46, 4  ;;  %v2103_v46 = vrot.slane %v2101_v58, 4 }
 0x125   : > { %v6656_v55 = vadd.f32 %v919_v13, %v6439_v19  ;;  %v6659_v62 = vadd.f32 %v1032_v18, %v6441_v15  ;;  %2776 = vmatpush1.bf16.msra.mxu0 %v2750_v57  ;;  %2889 = vmatpush1.bf16.msra.mxu1 %v2756_v4  ;;  %v2085_v19 = vrot.slane %v2083_v1, 5  ;;  %v2090_v57 = vrot.slane %v2088_v6, 4 }
 0x126   : > { %v921_v60 = vpop.f32.mrf.mxu0  ;;  %v1034_v24 = vpop.f32.mrf.mxu1  ;;  %2329 = vmatprep.mubr.bf16.mxu0 %v8801_v12  ;;  %2442 = vmatprep.mubr.bf16.mxu1 %v8801_v12  ;;  %v6673_v4 = vrot.slane %v2097_v7, 5 }
 0x127   : > { %v6666_v0 = vadd.f32 %v921_v60, %v6445_v53  ;;  %v6669_v15 = vadd.f32 %v1034_v24, %v6447_v54  ;;  %5531 = vmatprep.subr.msk.bf16.mxu0 %vm552_vm0, %v3126_v2  ;;  %5540 = vmatprep.subr.msk.bf16.mxu1 %vm552_vm0, %v3127_v9  ;;  %v5407_v54 = vld [vmem:[%s6065_s11 + $0x38] sm:$0x1]  ;;  %v5408_v24 = vld [vmem:[%s6065_s11 + $0x3c] sm:$0xf]  ;;  %v5409_v2 = vld [vmem:[%s6065_s11 + $0x40] sm:$0xf] }
 0x128   : > { %v923_v39 = vpop.f32.mrf.mxu0  ;;  %v1036_v3 = vpop.f32.mrf.mxu1  ;;  %v2104_v7 = vor.u32 %v2103_v46, %v6673_v4  ;;  %v2107_v41 = vshll.u32 %v5407_v54, 16  ;;  %v2115_v58 = vshll.u32 %v5408_v24, 16  ;;  %v2121_v16 = vshll.u32 %v5409_v2, 16 }
 0x129   : > { %v6676_v1 = vadd.f32 %v923_v39, %v6453_v20  ;;  %v6679_v53 = vadd.f32 %v1036_v3, %v6455_v21  ;;  %v2086_v20 = vsel %vm6110_vm4, %v2081_v17, %v2085_v19  ;;  %v2094_v21 = vor.u32 %v2093_v56, %v2090_v57 }
 0x12a   : > { %v925_v60 = vpop.f32.mrf.mxu0  ;;  %v1038_v6 = vpop.f32.mrf.mxu1  ;;  %v2125_v17 = vshrl.u32 %v5409_v2, 16  ;;  %v5423_v3 = vcombine.low %v2076_v5, %v2086_v20 }
 0x12b   : > { %v6688_v9 = vadd.f32 %v925_v60, %v6458_v25  ;;  %v6691_v13 = vadd.f32 %v1038_v6, %v6460_v27  ;;  %v2112_v25 = vshrl.u32 %v5408_v24, 16  ;;  %v2105_v24 = vrot.slane %v2104_v7, 4 }
 0x12c   : > { %v929_v18 = vpop.f32.mrf.mxu0  ;;  %v1042_v11 = vpop.f32.mrf.mxu1  ;;  %5431 = vmatmul.mubr.msk.bf16.gmra.mxu0 %vm527_vm3, %v5422_v10  ;;  %5440 = vmatmul.mubr.msk.bf16.gmra.mxu1 %vm527_vm3, %v5422_v10  ;;  %v5411_v10 = vld [vmem:[%s6065_s11 + $0x48] sm:$0xf]  ;;  %v2109_v60 = vrot.slane %v2107_v41, 5 }
 0x12d   : > { %v6699_v27 = vadd.f32 %v929_v18, %v6462_v28  ;;  %v6702_v63 = vadd.f32 %v1042_v11, %v6464_v30  ;;  %2339 = vmatprep.mubr.bf16.mxu0 %v8801_v12  ;;  %2452 = vmatprep.mubr.bf16.mxu1 %v8801_v12  ;;  %v2095_v28 = vrot.slane %v2094_v21, 4  ;;  %v5412_v30 = vld [vmem:[%s6065_s11 + $0x4c] sm:$0xf]  ;;  %v2114_v6 = vrot.slane %v2112_v25, 4  ;;  %v5410_v21 = vld [vmem:[%s6065_s11 + $0x44] sm:$0x1] }
 0x12e   : > { %v931_v19 = vpop.f32.mrf.mxu0  ;;  %v1044_v57 = vpop.f32.mrf.mxu1  ;;  %v2117_v18 = vrot.slane %v2115_v58, 5  ;;  %v6720_v11 = vrot.slane %v2121_v16, 5  ;;  %v2110_v58 = vsel %vm6110_vm4, %v2105_v24, %v2109_v60  ;;  %v5413_v24 = vld [vmem:[%s6065_s11 + $0x50] sm:$0x1] }
 0x12f   : > { %v6707_v56 = vadd.f32 %v931_v19, %v6470_v33  ;;  %v6710_v39 = vadd.f32 %v1044_v57, %v6472_v35  ;;  %v2127_v35 = vrot.slane %v2125_v17, 4  ;;  %v2136_v19 = vshrl.u32 %v5411_v10, 16 }
 0x130   : > { %v933_v46 = vpop.f32.mrf.mxu0  ;;  %v1046_v54 = vpop.f32.mrf.mxu1  ;;  %v2139_v57 = vshll.u32 %v5411_v10, 16  ;;  %v2118_v16 = vor.u32 %v2117_v18, %v2114_v6 }
 0x131   : > { %8815 = vst [vmem:[#allocation36_spill] sm:$0xff] %v6707_v56  ;;  %8816 = vst [vmem:[#allocation37_spill] sm:$0xff] %v6710_v39  ;;  %v6715_v2 = vadd.f32 %v933_v46, %v6474_v37  ;;  %v6718_v33 = vadd.f32 %v1046_v54, %v6476_v38  ;;  %v2145_v39 = vshll.u32 %v5412_v30, 16  ;;  %v2149_v56 = vshrl.u32 %v5412_v30, 16 }
 0x132   : > { %v935_v5 = vpop.f32.mrf.mxu0  ;;  %v1048_v20 = vpop.f32.mrf.mxu1  ;;  %v2100_v38 = vsel %vm6110_vm4, %v2095_v28, %v6673_v4  ;;  %v2128_v17 = vor.u32 %v2127_v35, %v6720_v11  ;;  %v2138_v10 = vrot.slane %v2136_v19, 4  ;;  %v2141_v30 = vrot.slane %v2139_v57, 5  ;;  %v5415_v19 = vld [vmem:[%s6065_s11 + $0x58] sm:$0xf] }
 0x133   : > { %v6724_v7 = vadd.f32 %v935_v5, %v6479_v40  ;;  %v6727_v41 = vadd.f32 %v1048_v20, %v6481_v42  ;;  %v6745_v46 = vrot.slane %v2145_v39, 5  ;;  %v5424_v18 = vcombine.low %v2100_v38, %v2110_v58  ;;  %v5414_v5 = vld [vmem:[%s6065_s11 + $0x54] sm:$0xf] }
 0x134   : > { %v939_v37 = vpop.f32.mrf.mxu0  ;;  %v1052_v25 = vpop.f32.mrf.mxu1  ;;  %5432 = vmatmul.mubr.msk.bf16.gmra.mxu0 %vm527_vm3, %v5423_v3  ;;  %5441 = vmatmul.mubr.msk.bf16.gmra.mxu1 %vm527_vm3, %v5423_v3  ;;  %v2131_v3 = vshll.u32 %v5410_v21, 16  ;;  %v2119_v35 = vrot.slane %v2118_v16, 4  ;;  %v2129_v39 = vrot.slane %v2128_v17, 4  ;;  %v2163_v58 = vshll.u32 %v5414_v5, 16 }
 0x135   : > { %v6737_v40 = vadd.f32 %v939_v37, %v6483_v31  ;;  %v6740_v42 = vadd.f32 %v1052_v25, %v6485_v34  ;;  %2349 = vmatprep.mubr.bf16.mxu0 %v8801_v12  ;;  %2462 = vmatprep.mubr.bf16.mxu1 %v8801_v12  ;;  %v2151_v31 = vrot.slane %v2149_v56, 4  ;;  %v2142_v37 = vor.u32 %v2141_v30, %v2138_v10 }
 0x136   : > { %v941_v4 = vpop.f32.mrf.mxu0  ;;  %v1054_v28 = vpop.f32.mrf.mxu1  ;;  %v2133_v56 = vrot.slane %v2131_v3, 5  ;;  %v2155_v25 = vshll.u32 %v5413_v24, 16  ;;  %v2124_v17 = vsel %vm6110_vm4, %v2119_v35, %v6720_v11  ;;  %v2169_v3 = vshll.u32 %v5415_v19, 16 }
 0x137   : > { %v6748_v54 = vadd.f32 %v941_v4, %v6491_v45  ;;  %v6751_v34 = vadd.f32 %v1054_v28, %v6493_v26  ;;  %v2152_v26 = vor.u32 %v2151_v31, %v6745_v46  ;;  %v2173_v28 = vshrl.u32 %v5415_v19, 16 }
 0x138   : > { %v943_v60 = vpop.f32.mrf.mxu0  ;;  %v1056_v6 = vpop.f32.mrf.mxu1  ;;  %v2134_v10 = vsel %vm6110_vm4, %v2129_v39, %v2133_v56  ;;  %v2143_v11 = vrot.slane %v2142_v37, 4  ;;  %v6790_v39 = vrot.slane %v2169_v3, 5  ;;  %v5417_v37 = vld [vmem:[%s6065_s11 + $0x60] sm:$0xf] }
 0x139   : > { %v6756_v20 = vadd.f32 %v943_v60, %v6495_v36  ;;  %v6759_v21 = vadd.f32 %v1056_v6, %v6497_v29  ;;  %v2160_v36 = vshrl.u32 %v5414_v5, 16  ;;  %v2153_v24 = vrot.slane %v2152_v26, 4 }
 0x13a   : > { %v945_v45 = vpop.f32.mrf.mxu0  ;;  %v1058_v57 = vpop.f32.mrf.mxu1  ;;  %v2157_v60 = vrot.slane %v2155_v25, 5  ;;  %v5425_v19 = vcombine.low %v2124_v17, %v2134_v10  ;;  %v2175_v56 = vrot.slane %v2173_v28, 4  ;;  %v2184_v28 = vshrl.u32 %v5417_v37, 16 }
 0x13b   : > { %v6764_v4 = vadd.f32 %v945_v45, %v6500_v44  ;;  %v6767_v38 = vadd.f32 %v1058_v57, %v6502_v22  ;;  %v2162_v6 = vrot.slane %v2160_v36, 4  ;;  %v5418_v36 = vld [vmem:[%s6065_s11 + $0x64] sm:$0xf]  ;;  %v2187_v10 = vshll.u32 %v5417_v37, 16 }
 0x13c   : > { %v949_v16 = vpop.f32.mrf.mxu0  ;;  %v1062_v29 = vpop.f32.mrf.mxu1  ;;  %5433 = vmatmul.mubr.msk.bf16.gmra.mxu0 %vm527_vm3, %v5424_v18  ;;  %5442 = vmatmul.mubr.msk.bf16.gmra.mxu1 %vm527_vm3, %v5424_v18  ;;  %v2165_v18 = vrot.slane %v2163_v58, 5  ;;  %v2176_v3 = vor.u32 %v2175_v56, %v6790_v39 }
 0x13d   : > { %v6775_v44 = vadd.f32 %v949_v16, %v6504_v23  ;;  %v6778_v22 = vadd.f32 %v1062_v29, %v6506_v47  ;;  %2359 = vmatprep.mubr.bf16.mxu0 %v8801_v12  ;;  %2472 = vmatprep.mubr.bf16.mxu1 %v8801_v12 }
 0x13e   : > { %v951_v30 = vpop.f32.mrf.mxu0  ;;  %v1064_v31 = vpop.f32.mrf.mxu1  ;;  %v2177_v37 = vrot.slane %v2176_v3, 4 }
 0x13f   : > { %v6785_v23 = vadd.f32 %v951_v30, %v6512_v51  ;;  %v6788_v47 = vadd.f32 %v1064_v31, %v6514_v8  ;;  %v5416_v51 = vld [vmem:[%s6065_s11 + $0x5c] sm:$0x1]  ;;  %v2148_v8 = vsel %vm6110_vm4, %v2143_v11, %v6745_v46  ;;  %v2193_v31 = vshll.u32 %v5418_v36, 16 }
 0x140   : > { %v953_v35 = vpop.f32.mrf.mxu0  ;;  %v1066_v5 = vpop.f32.mrf.mxu1  ;;  %v2179_v46 = vshll.u32 %v5416_v51, 16  ;;  %v2197_v11 = vshrl.u32 %v5418_v36, 16  ;;  %v8824_v36 = vld [vmem:[#allocation10_spill] sm:$0xff] }
 0x141   : > { %v6793_v45 = vadd.f32 %v953_v35, %v6516_v14  ;;  %v6796_v57 = vadd.f32 %v1066_v5, %v6518_v43  ;;  %v2158_v14 = vsel %vm6110_vm4, %v2153_v24, %v2157_v60  ;;  %v2166_v43 = vor.u32 %v2165_v18, %v2162_v6  ;;  %v8820_v6 = vld [vmem:[#allocation7_spill] sm:$0xff]  ;;  %v8822_v35 = vld [vmem:[#allocation8_spill] sm:$0xff] }
 0x142   : > { %v955_v26 = vpop.f32.mrf.mxu0  ;;  %v1068_v25 = vpop.f32.mrf.mxu1 }
 0x143   : > { %v6805_v58 = vadd.f32 %v955_v26, %v6521_v49  ;;  %v6808_v16 = vadd.f32 %v1068_v25, %v6523_v50  ;;  %v8818_v50 = vld [vmem:[#allocation6_spill] sm:$0xff]  ;;  %v2181_v26 = vrot.slane %v2179_v46, 5  ;;  %v2186_v25 = vrot.slane %v2184_v28, 4 }
 0x144   : > { %v959_v29 = vpop.f32.mrf.mxu0  ;;  %v1072_v17 = vpop.f32.mrf.mxu1  ;;  %5434 = vmatmul.mubr.msk.bf16.gmra.mxu0 %vm527_vm3, %v5425_v19  ;;  %5443 = vmatmul.mubr.msk.bf16.gmra.mxu1 %vm527_vm3, %v5425_v19  ;;  %v2167_v19 = vrot.slane %v2166_v43, 4 }
 0x145   : > { %v6816_v49 = vadd.f32 %v959_v29, %v6525_v32  ;;  %v6819_v30 = vadd.f32 %v1072_v17, %v8818_v50  ;;  %2369 = vmatprep.mubr.bf16.mxu0 %v8801_v12  ;;  %2482 = vmatprep.mubr.bf16.mxu1 %v8801_v12  ;;  %v5426_v32 = vcombine.low %v2148_v8, %v2158_v14  ;;  %v2189_v29 = vrot.slane %v2187_v10, 5  ;;  %v8823_v17 = vld [vmem:[#allocation9_spill] sm:$0xff]  ;;  %v8826_v14 = vld [vmem:[#allocation12_spill] sm:$0xff] }
 0x146   : > { %v961_v24 = vpop.f32.mrf.mxu0  ;;  %v1074_v60 = vpop.f32.mrf.mxu1  ;;  %v2172_v28 = vsel %vm6110_vm4, %v2167_v19, %v6790_v39  ;;  %v2182_v10 = vsel %vm6110_vm4, %v2177_v37, %v2181_v26  ;;  %v8831_v39 = vld [vmem:[#allocation15_spill] sm:$0xff]  ;;  %v8833_v37 = vld [vmem:[#allocation16_spill] sm:$0xff] }
 0x147   : > { %8817 = vst [vmem:[#allocation38_spill] sm:$0xff] %v6816_v49  ;;  %8819 = vst [vmem:[#allocation6_spill] sm:$0xff] %v6819_v30  ;;  %v6824_v18 = vadd.f32 %v961_v24, %v8820_v6  ;;  %v6827_v5 = vadd.f32 %v1074_v60, %v8822_v35  ;;  %v2195_v24 = vrot.slane %v2193_v31, 5  ;;  %v2199_v6 = vrot.slane %v2197_v11, 4  ;;  %v5419_v60 = vld [vmem:[%s6065_s11 + $0x68] sm:$0x1] }
 0x148   : > { %v963_v56 = vpop.f32.mrf.mxu0  ;;  %v1076_v51 = vpop.f32.mrf.mxu1  ;;  %v8825_v35 = vld [vmem:[#allocation11_spill] sm:$0xff]  ;;  %v2190_v31 = vor.u32 %v2189_v29, %v2186_v25  ;;  %v8827_v11 = vld [vmem:[#allocation13_spill] sm:$0xff] }
 0x149   : > { %8821 = vst [vmem:[#allocation7_spill] sm:$0xff] %v6824_v18  ;;  %v6830_v50 = vadd.f32 %v963_v56, %v8823_v17  ;;  %v6833_v30 = vadd.f32 %v1076_v51, %v8824_v36  ;;  %v8829_v56 = vld [vmem:[#allocation14_spill] sm:$0xff]  ;;  %v2200_v51 = vor.u32 %v2199_v6, %v2195_v24 }
 0x14a   : > { %v965_v18 = vpop.f32.mrf.mxu0  ;;  %v1078_v49 = vpop.f32.mrf.mxu1 }
 0x14b   : > { %v6837_v8 = vadd.f32 %v965_v18, %v8825_v35  ;;  %v6840_v43 = vadd.f32 %v1078_v49, %v8826_v14  ;;  %v5427_v35 = vcombine.low %v2172_v28, %v2182_v10  ;;  %v2191_v14 = vrot.slane %v2190_v31, 4 }
 0x14c   : > { %v969_v3 = vpop.f32.mrf.mxu0  ;;  %v1082_v46 = vpop.f32.mrf.mxu1  ;;  %5435 = vmatmul.mubr.msk.bf16.gmra.mxu0 %vm527_vm3, %v5426_v32  ;;  %5444 = vmatmul.mubr.msk.bf16.gmra.mxu1 %vm527_vm3, %v5426_v32  ;;  %v2203_v32 = vshll.u32 %v5419_v60, 16  ;;  %v2201_v6 = vrot.slane %v2200_v51, 4  ;;  %v8841_v51 = vld [vmem:[#allocation21_spill] sm:$0xff] }
 0x14d   : > { %v6850_v18 = vadd.f32 %v969_v3, %v8827_v11  ;;  %v6853_v49 = vadd.f32 %v1082_v46, %v8829_v56  ;;  %2379 = vmatprep.mubr.bf16.mxu0 %v8801_v12  ;;  %2492 = vmatprep.mubr.bf16.mxu1 %v8801_v12  ;;  %v8834_v3 = vld [vmem:[#allocation17_spill] sm:$0xff]  ;;  %v8835_v11 = vld [vmem:[#allocation18_spill] sm:$0xff]  ;;  %v2196_v31 = vsel %vm6110_vm4, %v2191_v14, %v2195_v24  ;;  %v8845_v24 = vld [vmem:[#allocation23_spill] sm:$0xff] }
 0x14e   : > { %v971_v17 = vpop.f32.mrf.mxu0  ;;  %v1084_v36 = vpop.f32.mrf.mxu1  ;;  %v2205_v60 = vrot.slane %v2203_v32, 5 }
 0x14f   : > { %8828 = vst [vmem:[#allocation8_spill] sm:$0xff] %v6850_v18  ;;  %8830 = vst [vmem:[#allocation9_spill] sm:$0xff] %v6853_v49  ;;  %v6858_v19 = vadd.f32 %v971_v17, %v8831_v39  ;;  %v6861_v26 = vadd.f32 %v1084_v36, %v8833_v37  ;;  %v5448_v17 = vld [vmem:[%s6065_s11 + $0x10] sm:$0xf]  ;;  %v8837_v39 = vld [vmem:[#allocation19_spill] sm:$0xff] }
 0x150   : > { %v973_v25 = vpop.f32.mrf.mxu0  ;;  %v1086_v29 = vpop.f32.mrf.mxu1  ;;  %v8839_v36 = vld [vmem:[#allocation20_spill] sm:$0xff] }
 0x151   : > { %8832 = vst [vmem:[#allocation10_spill] sm:$0xff] %v6858_v19  ;;  %v6864_v46 = vadd.f32 %v973_v25, %v8834_v3  ;;  %v6867_v56 = vadd.f32 %v1086_v29, %v8835_v11  ;;  %v8843_v25 = vld [vmem:[#allocation22_spill] sm:$0xff]  ;;  %v2627_v3 = vrot.slane %v5448_v17, 5 }
 0x152   : > { %v975_v49 = vpop.f32.mrf.mxu0  ;;  %v1088_v18 = vpop.f32.mrf.mxu1 }
 0x153   : > { %8836 = vst [vmem:[#allocation11_spill] sm:$0xff] %v6867_v56  ;;  %v6871_v19 = vadd.f32 %v975_v49, %v8837_v39  ;;  %v6874_v37 = vadd.f32 %v1088_v18, %v8839_v36  ;;  %v2206_v18 = vsel %vm6110_vm4, %v2201_v6, %v2205_v60  ;;  %v5447_v49 = vld [vmem:[%s6065_s11 + $0xc] sm:$0xe]  ;;  %v5449_v39 = vld [vmem:[%s6065_s11 + $0x14] sm:$0x1]  ;;  %v5573_v6 = vld [vmem:[%s8759_s1 + $0x38] sm:$0xff] }
 0x154   : > { %v979_v28 = vpop.f32.mrf.mxu0  ;;  %v1092_v10 = vpop.f32.mrf.mxu1  ;;  %5436 = vmatmul.mubr.msk.bf16.gmra.mxu0 %vm527_vm3, %v5427_v35  ;;  %5445 = vmatmul.mubr.msk.bf16.gmra.mxu1 %vm527_vm3, %v5427_v35  ;;  %v8847_v36 = vld [vmem:[#allocation24_spill] sm:$0xff]  ;;  %v8849_v60 = vld [vmem:[#allocation25_spill] sm:$0xff] }
 0x155   : > { %8838 = vst [vmem:[#allocation12_spill] sm:$0xff] %v6871_v19  ;;  %8840 = vst [vmem:[#allocation13_spill] sm:$0xff] %v6874_v37  ;;  %v6881_v32 = vadd.f32 %v979_v28, %v8841_v51  ;;  %v6884_v29 = vadd.f32 %v1092_v10, %v8843_v25  ;;  %2389 = vmatprep.mubr.bf16.mxu0 %v8801_v12  ;;  %2502 = vmatprep.mubr.bf16.mxu1 %v8801_v12  ;;  %v2629_v37 = vrot.slane %v2627_v3, 4  ;;  %v8866_v56 = vld [vmem:[#allocation33_spill] sm:$0xff] }
 0x156   : > { %v981_v11 = vpop.f32.mrf.mxu0  ;;  %v1094_v35 = vpop.f32.mrf.mxu1  ;;  %v5428_v25 = vcombine.low %v2196_v31, %v2206_v18  ;;  %v8854_v31 = vld [vmem:[#allocation27_spill] sm:$0xff] }
 0x157   : > { %8842 = vst [vmem:[#allocation14_spill] sm:$0xff] %v6881_v32  ;;  %8844 = vst [vmem:[#allocation15_spill] sm:$0xff] %v6884_v29  ;;  %v6893_v14 = vadd.f32 %v981_v11, %v8845_v24  ;;  %v6896_v28 = vadd.f32 %v1094_v35, %v8847_v36  ;;  %v5471_v29 = vrot.slane %v5447_v49, 9  ;;  %v2630_v11 = vrot.slane %v5449_v39, 5  ;;  %v5451_v36 = vld [vmem:[%s6065_s11 + $0x1c] sm:$0xf] }
 0x158   : > { %v983_v10 = vpop.f32.mrf.mxu0  ;;  %v1096_v51 = vpop.f32.mrf.mxu1  ;;  %v3697_v49 = vcombine.high %v5573_v6, %v5573_v6 }
 0x159   : > { %8846 = vst [vmem:[#allocation16_spill] sm:$0xff] %v6893_v14  ;;  %8848 = vst [vmem:[#allocation17_spill] sm:$0xff] %v6896_v28  ;;  %v6902_v17 = vadd.f32 %v983_v10, %v8849_v60  ;;  %v6905_v32 = vadd.f32 %v1096_v51, %v8851_v52  ;;  %v2628_v39 = vsel %vm6310_vm7, %v5471_v29, %v2627_v3  ;;  %v8857_v51 = vld [vmem:[#allocation28_spill] sm:$0xff]  ;;  %v8863_v3 = vld [vmem:[#allocation31_spill] sm:$0xff] }
 0x15a   : > { %v985_v24 = vpop.f32.mrf.mxu0  ;;  %v1098_v35 = vpop.f32.mrf.mxu1 }
 0x15b   : > { %8850 = vst [vmem:[#allocation18_spill] sm:$0xff] %v6902_v17  ;;  %8852 = vst [vmem:[#allocation19_spill] sm:$0xff] %v6905_v32  ;;  %v6909_v28 = vadd.f32 %v985_v24, %v6599_v59  ;;  %v6912_v18 = vadd.f32 %v1098_v35, %v8854_v31  ;;  %v8859_v32 = vld [vmem:[#allocation29_spill] sm:$0xff]  ;;  %v2631_v24 = vsel %vm6310_vm7, %v2629_v37, %v2630_v11  ;;  %v2634_v31 = vrot.slane %v5451_v36, 5  ;;  %v8861_v17 = vld [vmem:[#allocation30_spill] sm:$0xff] }
 0x15c   : > { %v989_v14 = vpop.f32.mrf.mxu0  ;;  %v1102_v10 = vpop.f32.mrf.mxu1  ;;  %5437 = vmatmul.mubr.msk.bf16.gmra.mxu0 %vm527_vm3, %v5428_v25  ;;  %5446 = vmatmul.mubr.msk.bf16.gmra.mxu1 %vm527_vm3, %v5428_v25  ;;  %v5450_v35 = vld [vmem:[%s6065_s11 + $0x18] sm:$0xe]  ;;  %v5480_v11 = vcombine.low %v2628_v39, %v2631_v24  ;;  %v8867_v39 = vld [vmem:[#allocation34_spill] sm:$0xff] }
 0x15d   : > { %8853 = vst [vmem:[#allocation20_spill] sm:$0xff] %v6909_v28  ;;  %8855 = vst [vmem:[#allocation21_spill] sm:$0xff] %v6912_v18  ;;  %v6919_v60 = vadd.f32 %v989_v14, %v8857_v51  ;;  %v6922_v59 = vadd.f32 %v1102_v10, %v8859_v32  ;;  %2793 = vmatprep.mubr.bf16.mxu0 %v8801_v12  ;;  %2906 = vmatprep.mubr.bf16.mxu1 %v8801_v12  ;;  %v5452_v28 = vld [vmem:[%s6065_s11 + $0x20] sm:$0x1]  ;;  %v8864_v32 = vld [vmem:[#allocation3_spill] sm:$0xff]  ;;  %v5472_v36 = vrot.slane %v5450_v35, 9 }
 0x15e   : > { %v991_v18 = vpop.f32.mrf.mxu0  ;;  %v1104_v25 = vpop.f32.mrf.mxu1  ;;  %v6937_v10 = vrot.slane %v5573_v6, %v8864_v32  ;;  %v6940_v51 = vrot.slane %v3697_v49, %v8864_v32  ;;  %v3153_v6 = vsel %vm552_vm0, %v6626_v48, 0  ;;  %v3159_v49 = vsel %vm552_vm0, %v6629_v61, 0  ;;  %v5454_v32 = vld [vmem:[%s6065_s11 + $0x28] sm:$0xf] }
 0x15f   : > { %8858 = vst [vmem:[#allocation22_spill] sm:$0xff] %v6919_v60  ;;  %8860 = vst [vmem:[#allocation23_spill] sm:$0xff] %v6922_v59  ;;  %v6931_v29 = vadd.f32 %v991_v18, %v8861_v17  ;;  %v6934_v14 = vadd.f32 %v1104_v25, %v8863_v3  ;;  %v8865_v60 = vld [vmem:[#allocation32_spill] sm:$0xff]  ;;  %v2636_v18 = vrot.slane %v2634_v31, 4  ;;  %v2635_v61 = vsel %vm6310_vm7, %v5472_v36, %v2634_v31  ;;  %v5455_v31 = vld [vmem:[%s6065_s11 + $0x2c] sm:$0x1] }
 0x160   : > { %v993_v59 = vpop.f32.mrf.mxu0  ;;  %v1106_v37 = vpop.f32.mrf.mxu1 }
 0x161   : > { %8862 = vst [vmem:[#allocation24_spill] sm:$0xff] %v6931_v29  ;;  %v6943_v19 = vadd.f32 %v993_v59, %v8865_v60  ;;  %v6946_v17 = vadd.f32 %v1106_v37, %v8866_v56  ;;  %v2637_v29 = vrot.slane %v5452_v28, 5  ;;  %v8869_v60 = vld [vmem:[#allocation35_spill] sm:$0xff]  ;;  %v3712_v56 = vcombine.high %v6937_v10, %v6937_v10 }
 0x162   : > { %v995_v25 = vpop.f32.mrf.mxu0  ;;  %v1108_v3 = vpop.f32.mrf.mxu1  ;;  %v3713_v28 = vcombine.high %v6940_v51, %v6940_v51 }
 0x163   : > { %v6954_v24 = vadd.f32 %v995_v25, %v8867_v39  ;;  %v6957_v59 = vadd.f32 %v1108_v3, %v8869_v60  ;;  %v2638_v3 = vsel %vm6310_vm7, %v2636_v18, %v2637_v29  ;;  %v5453_v39 = vld [vmem:[%s6065_s11 + $0x24] sm:$0xe]  ;;  %v2641_v60 = vrot.slane %v5454_v32, 5 }
 0x164   : > { %v1332_v35 = vpop.f32.mrf.mxu0  ;;  %v1445_v48 = vpop.f32.mrf.mxu1  ;;  %5489 = vmatmul.mubr.msk.bf16.vlgmr.msra.gmra.mxu0 %vm527_vm3, %v5480_v11  ;;  %5498 = vmatmul.mubr.msk.bf16.vlgmr.msra.gmra.mxu1 %vm527_vm3, %v5480_v11  ;;  %v5481_v11 = vcombine.low %v2635_v61, %v2638_v3  ;;  %v5473_v36 = vrot.slane %v5453_v39, 9 }
 0x165   : > { %8868 = vst [vmem:[#allocation25_spill] sm:$0xff] %v6954_v24  ;;  %8870 = vst [vmem:[#allocation26_spill] sm:$0xff] %v6957_v59  ;;  %v6968_v37 = vadd.f32 %v1332_v35, %v6656_v55  ;;  %v6971_v25 = vadd.f32 %v1445_v48, %v6659_v62  ;;  %3179 = vmatpush1.bf16.msra.mxu0 %v3153_v6  ;;  %3292 = vmatpush1.bf16.msra.mxu1 %v3159_v49  ;;  %v2643_v49 = vrot.slane %v2641_v60, 4 }
 0x166   : > { %v1334_v59 = vpop.f32.mrf.mxu0  ;;  %v1447_v24 = vpop.f32.mrf.mxu1  ;;  %2803 = vmatprep.mubr.bf16.mxu0 %v8801_v12  ;;  %2916 = vmatprep.mubr.bf16.mxu1 %v8801_v12 }
 0x167   : > { %v6980_v55 = vadd.f32 %v1334_v59, %v6666_v0  ;;  %v6983_v62 = vadd.f32 %v1447_v24, %v6669_v15  ;;  %5582 = vmatprep.subr.msk.bf16.mxu0 %vm552_vm0, %v3712_v56  ;;  %5591 = vmatprep.subr.msk.bf16.mxu1 %vm552_vm0, %v3713_v28  ;;  %v2644_v0 = vrot.slane %v5455_v31, 5  ;;  %v5457_v24 = vld [vmem:[%s6065_s11 + $0x34] sm:$0xf] }
 0x168   : > { %v1336_v29 = vpop.f32.mrf.mxu0  ;;  %v1449_v32 = vpop.f32.mrf.mxu1  ;;  %v2648_v3 = vrot.slane %v5457_v24, 5 }
 0x169   : > { %v6988_v18 = vadd.f32 %v1336_v29, %v6676_v1  ;;  %v6991_v6 = vadd.f32 %v1449_v32, %v6679_v53  ;;  %v2642_v1 = vsel %vm6310_vm7, %v5473_v36, %v2641_v60  ;;  %v5458_v29 = vld [vmem:[%s6065_s11 + $0x38] sm:$0x1]  ;;  %v8872_v60 = vld [vmem:[#allocation36_spill] sm:$0xff] }
 0x16a   : > { %v1338_v59 = vpop.f32.mrf.mxu0  ;;  %v1451_v15 = vpop.f32.mrf.mxu1  ;;  %v2651_v24 = vrot.slane %v5458_v29, 5 }
 0x16b   : > { %v6995_v56 = vadd.f32 %v1338_v59, %v6688_v9  ;;  %v6998_v28 = vadd.f32 %v1451_v15, %v6691_v13  ;;  %v2645_v9 = vsel %vm6310_vm7, %v2643_v49, %v2644_v0  ;;  %v5456_v13 = vld [vmem:[%s6065_s11 + $0x30] sm:$0xe]  ;;  %v2650_v0 = vrot.slane %v2648_v3, 4 }
 0x16c   : > { %v1342_v35 = vpop.f32.mrf.mxu0  ;;  %v1455_v48 = vpop.f32.mrf.mxu1  ;;  %5490 = vmatmul.mubr.msk.bf16.gmra.mxu0 %vm527_vm3, %v5481_v11  ;;  %5499 = vmatmul.mubr.msk.bf16.gmra.mxu1 %vm527_vm3, %v5481_v11  ;;  %v5482_v59 = vcombine.low %v2642_v1, %v2645_v9  ;;  %v5474_v15 = vrot.slane %v5456_v13, 9 }
 0x16d   : > { %v7005_v53 = vadd.f32 %v1342_v35, %v6699_v27  ;;  %v7008_v61 = vadd.f32 %v1455_v48, %v6702_v63  ;;  %2813 = vmatprep.mubr.bf16.mxu0 %v8801_v12  ;;  %2926 = vmatprep.mubr.bf16.mxu1 %v8801_v12  ;;  %v8873_v27 = vld [vmem:[#allocation37_spill] sm:$0xff] }
 0x16e   : > { %v1344_v39 = vpop.f32.mrf.mxu0  ;;  %v1457_v31 = vpop.f32.mrf.mxu1 }
 0x16f   : > { %8871 = vst [vmem:[#allocation27_spill] sm:$0xff] %v7008_v61  ;;  %v7017_v32 = vadd.f32 %v1344_v39, %v8872_v60  ;;  %v7020_v11 = vadd.f32 %v1457_v31, %v8873_v27  ;;  %v5460_v39 = vld [vmem:[%s6065_s11 + $0x40] sm:$0xf] }
 0x170   : > { %v1346_v63 = vpop.f32.mrf.mxu0  ;;  %v1459_v36 = vpop.f32.mrf.mxu1 }
 0x171   : > { %v7023_v35 = vadd.f32 %v1346_v63, %v6715_v2  ;;  %v7026_v49 = vadd.f32 %v1459_v36, %v6718_v33  ;;  %v2649_v2 = vsel %vm6310_vm7, %v5474_v15, %v2648_v3  ;;  %v5461_v63 = vld [vmem:[%s6065_s11 + $0x44] sm:$0x1] }
 0x172   : > { %v1348_v48 = vpop.f32.mrf.mxu0  ;;  %v1461_v61 = vpop.f32.mrf.mxu1 }
 0x173   : > { %v7030_v60 = vadd.f32 %v1348_v48, %v6724_v7  ;;  %v7033_v31 = vadd.f32 %v1461_v61, %v6727_v41  ;;  %v2652_v7 = vsel %vm6310_vm7, %v2650_v0, %v2651_v24  ;;  %v5459_v41 = vld [vmem:[%s6065_s11 + $0x3c] sm:$0xe]  ;;  %v2655_v61 = vrot.slane %v5460_v39, 5 }
 0x174   : > { %v1352_v1 = vpop.f32.mrf.mxu0  ;;  %v1465_v9 = vpop.f32.mrf.mxu1  ;;  %5491 = vmatmul.mubr.msk.bf16.gmra.mxu0 %vm527_vm3, %v5482_v59  ;;  %5500 = vmatmul.mubr.msk.bf16.gmra.mxu1 %vm527_vm3, %v5482_v59  ;;  %v5483_v59 = vcombine.low %v2649_v2, %v2652_v7  ;;  %v5475_v15 = vrot.slane %v5459_v41, 9  ;;  %v2658_v39 = vrot.slane %v5461_v63, 5 }
 0x175   : > { %v7040_v33 = vadd.f32 %v1352_v1, %v6737_v40  ;;  %v7043_v13 = vadd.f32 %v1465_v9, %v6740_v42  ;;  %2823 = vmatprep.mubr.bf16.mxu0 %v8801_v12  ;;  %2936 = vmatprep.mubr.bf16.mxu1 %v8801_v12  ;;  %v2657_v24 = vrot.slane %v2655_v61, 4 }
 0x176   : > { %v1354_v29 = vpop.f32.mrf.mxu0  ;;  %v1467_v27 = vpop.f32.mrf.mxu1 }
 0x177   : > { %v7052_v3 = vadd.f32 %v1354_v29, %v6748_v54  ;;  %v7055_v40 = vadd.f32 %v1467_v27, %v6751_v34  ;;  %v5463_v54 = vld [vmem:[%s6065_s11 + $0x4c] sm:$0xf] }
 0x178   : > { %v1356_v42 = vpop.f32.mrf.mxu0  ;;  %v1469_v36 = vpop.f32.mrf.mxu1  ;;  %v2662_v27 = vrot.slane %v5463_v54, 5 }
 0x179   : > { %v7058_v48 = vadd.f32 %v1356_v42, %v6756_v20  ;;  %v7061_v0 = vadd.f32 %v1469_v36, %v6759_v21  ;;  %v2656_v20 = vsel %vm6310_vm7, %v5475_v15, %v2655_v61  ;;  %v5464_v36 = vld [vmem:[%s6065_s11 + $0x50] sm:$0x1] }
 0x17a   : > { %v1358_v1 = vpop.f32.mrf.mxu0  ;;  %v1471_v9 = vpop.f32.mrf.mxu1  ;;  %v2665_v54 = vrot.slane %v5464_v36, 5 }
 0x17b   : > { %v7065_v29 = vadd.f32 %v1358_v1, %v6764_v4  ;;  %v7068_v34 = vadd.f32 %v1471_v9, %v6767_v38  ;;  %v2659_v4 = vsel %vm6310_vm7, %v2657_v24, %v2658_v39  ;;  %v5462_v38 = vld [vmem:[%s6065_s11 + $0x48] sm:$0xe]  ;;  %v2664_v39 = vrot.slane %v2662_v27, 4 }
 0x17c   : > { %v1362_v2 = vpop.f32.mrf.mxu0  ;;  %v1475_v7 = vpop.f32.mrf.mxu1  ;;  %5492 = vmatmul.mubr.msk.bf16.gmra.mxu0 %vm527_vm3, %v5483_v59  ;;  %5501 = vmatmul.mubr.msk.bf16.gmra.mxu1 %vm527_vm3, %v5483_v59  ;;  %v5484_v15 = vcombine.low %v2656_v20, %v2659_v4  ;;  %v5476_v1 = vrot.slane %v5462_v38, 9 }
 0x17d   : > { %v7075_v21 = vadd.f32 %v1362_v2, %v6775_v44  ;;  %v7078_v41 = vadd.f32 %v1475_v7, %v6778_v22  ;;  %2833 = vmatprep.mubr.bf16.mxu0 %v8801_v12  ;;  %2946 = vmatprep.mubr.bf16.mxu1 %v8801_v12 }
 0x17e   : > { %v1364_v63 = vpop.f32.mrf.mxu0  ;;  %v1477_v42 = vpop.f32.mrf.mxu1 }
 0x17f   : > { %v7087_v61 = vadd.f32 %v1364_v63, %v6785_v23  ;;  %v7090_v44 = vadd.f32 %v1477_v42, %v6788_v47  ;;  %v5466_v23 = vld [vmem:[%s6065_s11 + $0x58] sm:$0xf]  ;;  %v8877_v42 = vld [vmem:[#allocation6_spill] sm:$0xff] }
 0x180   : > { %v1366_v22 = vpop.f32.mrf.mxu0  ;;  %v1479_v59 = vpop.f32.mrf.mxu1 }
 0x181   : > { %v7093_v9 = vadd.f32 %v1366_v22, %v6793_v45  ;;  %v7096_v24 = vadd.f32 %v1479_v59, %v6796_v57  ;;  %v2663_v45 = vsel %vm6310_vm7, %v5476_v1, %v2662_v27  ;;  %v8875_v57 = vld [vmem:[#allocation38_spill] sm:$0xff]  ;;  %v2669_v22 = vrot.slane %v5466_v23, 5  ;;  %v8879_v27 = vld [vmem:[#allocation7_spill] sm:$0xff] }
 0x182   : > { %v1368_v2 = vpop.f32.mrf.mxu0  ;;  %v1481_v7 = vpop.f32.mrf.mxu1 }
 0x183   : > { %v7100_v63 = vadd.f32 %v1368_v2, %v6805_v58  ;;  %v7103_v47 = vadd.f32 %v1481_v7, %v6808_v16  ;;  %v2666_v58 = vsel %vm6310_vm7, %v2664_v39, %v2665_v54  ;;  %v5465_v16 = vld [vmem:[%s6065_s11 + $0x54] sm:$0xe]  ;;  %v5467_v2 = vld [vmem:[%s6065_s11 + $0x5c] sm:$0x1]  ;;  %v2671_v54 = vrot.slane %v2669_v22, 4 }
 0x184   : > { %v1372_v20 = vpop.f32.mrf.mxu0  ;;  %v1485_v4 = vpop.f32.mrf.mxu1  ;;  %5493 = vmatmul.mubr.msk.bf16.gmra.mxu0 %vm527_vm3, %v5484_v15  ;;  %5502 = vmatmul.mubr.msk.bf16.gmra.mxu1 %vm527_vm3, %v5484_v15  ;;  %v2672_v23 = vrot.slane %v5467_v2, 5 }
 0x185   : > { %8874 = vst [vmem:[#allocation28_spill] sm:$0xff] %v7103_v47  ;;  %v7110_v38 = vadd.f32 %v1372_v20, %v8875_v57  ;;  %v7113_v36 = vadd.f32 %v1485_v4, %v8877_v42  ;;  %2843 = vmatprep.mubr.bf16.mxu0 %v8801_v12  ;;  %2956 = vmatprep.mubr.bf16.mxu1 %v8801_v12  ;;  %v5477_v42 = vrot.slane %v5465_v16, 9 }
 0x186   : > { %v1374_v59 = vpop.f32.mrf.mxu0  ;;  %v1487_v15 = vpop.f32.mrf.mxu1  ;;  %v5485_v57 = vcombine.low %v2663_v45, %v2666_v58 }
 0x187   : > { %8876 = vst [vmem:[#allocation29_spill] sm:$0xff] %v7110_v38  ;;  %8878 = vst [vmem:[#allocation30_spill] sm:$0xff] %v7113_v36  ;;  %v7122_v1 = vadd.f32 %v1374_v59, %v8879_v27  ;;  %v7125_v7 = vadd.f32 %v1487_v15, %v6827_v5  ;;  %v5469_v59 = vld [vmem:[%s6065_s11 + $0x64] sm:$0xf]  ;;  %v8885_v15 = vld [vmem:[#allocation9_spill] sm:$0xff] }
 0x188   : > { %v1376_v20 = vpop.f32.mrf.mxu0  ;;  %v1489_v4 = vpop.f32.mrf.mxu1 }
 0x189   : > { %v7128_v36 = vadd.f32 %v1376_v20, %v6830_v50  ;;  %v7131_v39 = vadd.f32 %v1489_v4, %v6833_v30  ;;  %v2670_v30 = vsel %vm6310_vm7, %v5477_v42, %v2669_v22  ;;  %v8883_v50 = vld [vmem:[#allocation8_spill] sm:$0xff]  ;;  %v5470_v4 = vld [vmem:[%s6065_s11 + $0x68] sm:$0x1] }
 0x18a   : > { %v1378_v38 = vpop.f32.mrf.mxu0  ;;  %v1491_v47 = vpop.f32.mrf.mxu1 }
 0x18b   : > { %8880 = vst [vmem:[#allocation31_spill] sm:$0xff] %v7131_v39  ;;  %v7135_v27 = vadd.f32 %v1378_v38, %v6837_v8  ;;  %v7138_v5 = vadd.f32 %v1491_v47, %v6840_v43  ;;  %v2673_v8 = vsel %vm6310_vm7, %v2671_v54, %v2672_v23  ;;  %v5468_v43 = vld [vmem:[%s6065_s11 + $0x60] sm:$0xe]  ;;  %v2676_v47 = vrot.slane %v5469_v59, 5  ;;  %v8890_v39 = vld [vmem:[#allocation12_spill] sm:$0xff] }
 0x18c   : > { %v1382_v45 = vpop.f32.mrf.mxu0  ;;  %v1495_v58 = vpop.f32.mrf.mxu1  ;;  %5494 = vmatmul.mubr.msk.bf16.gmra.mxu0 %vm527_vm3, %v5485_v57  ;;  %5503 = vmatmul.mubr.msk.bf16.gmra.mxu1 %vm527_vm3, %v5485_v57  ;;  %v8887_v57 = vld [vmem:[#allocation10_spill] sm:$0xff]  ;;  %v2679_v59 = vrot.slane %v5470_v4, 5  ;;  %v8894_v4 = vld [vmem:[#allocation16_spill] sm:$0xff] }
 0x18d   : > { %8881 = vst [vmem:[#allocation32_spill] sm:$0xff] %v7135_v27  ;;  %8882 = vst [vmem:[#allocation33_spill] sm:$0xff] %v7138_v5  ;;  %v7145_v16 = vadd.f32 %v1382_v45, %v8883_v50  ;;  %v7148_v2 = vadd.f32 %v1495_v58, %v8885_v15  ;;  %2853 = vmatprep.mubr.bf16.mxu0 %v8801_v12  ;;  %2966 = vmatprep.mubr.bf16.mxu1 %v8801_v12  ;;  %v5478_v15 = vrot.slane %v5468_v43, 9 }
 0x18e   : > { %v1384_v38 = vpop.f32.mrf.mxu0  ;;  %v1497_v20 = vpop.f32.mrf.mxu1  ;;  %v5486_v50 = vcombine.low %v2670_v30, %v2673_v8  ;;  %v2678_v23 = vrot.slane %v2676_v47, 4  ;;  %v8892_v30 = vld [vmem:[#allocation14_spill] sm:$0xff]  ;;  %v8893_v8 = vld [vmem:[#allocation15_spill] sm:$0xff] }
 0x18f   : > { %8884 = vst [vmem:[#allocation34_spill] sm:$0xff] %v7145_v16  ;;  %8886 = vst [vmem:[#allocation35_spill] sm:$0xff] %v7148_v2  ;;  %v7157_v22 = vadd.f32 %v1384_v38, %v8887_v57  ;;  %v7160_v42 = vadd.f32 %v1497_v20, %v6861_v26  ;;  %v8889_v16 = vld [vmem:[#allocation11_spill] sm:$0xff]  ;;  %v8891_v57 = vld [vmem:[#allocation13_spill] sm:$0xff] }
 0x190   : > { %v1386_v45 = vpop.f32.mrf.mxu0  ;;  %v1499_v58 = vpop.f32.mrf.mxu1 }
 0x191   : > { %8888 = vst [vmem:[#allocation36_spill] sm:$0xff] %v7160_v42  ;;  %v7163_v2 = vadd.f32 %v1386_v45, %v6864_v46  ;;  %v7166_v54 = vadd.f32 %v1499_v58, %v8889_v16  ;;  %v2677_v46 = vsel %vm6310_vm7, %v5478_v15, %v2676_v47  ;;  %v8895_v58 = vld [vmem:[#allocation17_spill] sm:$0xff] }
 0x192   : > { %v1388_v5 = vpop.f32.mrf.mxu0  ;;  %v1501_v27 = vpop.f32.mrf.mxu1 }
 0x193   : > { %v7169_v38 = vadd.f32 %v1388_v5, %v8890_v39  ;;  %v7172_v26 = vadd.f32 %v1501_v27, %v8891_v57  ;;  %v2680_v39 = vsel %vm6310_vm7, %v2678_v23, %v2679_v59 }
 0x194   : > { %v1392_v20 = vpop.f32.mrf.mxu0  ;;  %v1505_v42 = vpop.f32.mrf.mxu1  ;;  %5495 = vmatmul.mubr.msk.bf16.gmra.mxu0 %vm527_vm3, %v5486_v50  ;;  %5504 = vmatmul.mubr.msk.bf16.gmra.mxu1 %vm527_vm3, %v5486_v50  ;;  %v5487_v57 = vcombine.low %v2677_v46, %v2680_v39 }
 0x195   : > { %v7179_v16 = vadd.f32 %v1392_v20, %v8892_v30  ;;  %v7182_v43 = vadd.f32 %v1505_v42, %v8893_v8  ;;  %2863 = vmatprep.mubr.bf16.mxu0 %v8801_v12  ;;  %2976 = vmatprep.mubr.bf16.mxu1 %v8801_v12  ;;  %v5632_v42 = vld [vmem:[%s8759_s1 + $0x40] sm:$0xff]  ;;  %v8898_v8 = vld [vmem:[#allocation19_spill] sm:$0xff] }
 0x196   : > { %v1394_v27 = vpop.f32.mrf.mxu0  ;;  %v1507_v5 = vpop.f32.mrf.mxu1  ;;  %v8897_v20 = vld [vmem:[#allocation18_spill] sm:$0xff] }
 0x197   : > { %v7189_v45 = vadd.f32 %v1394_v27, %v8894_v4  ;;  %v7192_v47 = vadd.f32 %v1507_v5, %v8895_v58  ;;  %v8899_v27 = vld [vmem:[#allocation20_spill] sm:$0xff]  ;;  %v8901_v5 = vld [vmem:[#allocation21_spill] sm:$0xff] }
 0x198   : > { %v1396_v50 = vpop.f32.mrf.mxu0  ;;  %v1509_v15 = vpop.f32.mrf.mxu1 }
 0x199   : > { %8896 = vst [vmem:[#allocation37_spill] sm:$0xff] %v7192_v47  ;;  %v7198_v30 = vadd.f32 %v1396_v50, %v8897_v20  ;;  %v7201_v23 = vadd.f32 %v1509_v15, %v8898_v8  ;;  %v4171_v47 = vcombine.high %v5632_v42, %v5632_v42  ;;  %v8903_v50 = vld [vmem:[#allocation22_spill] sm:$0xff]  ;;  %v8905_v15 = vld [vmem:[#allocation23_spill] sm:$0xff] }
 0x19a   : > { %v1398_v59 = vpop.f32.mrf.mxu0  ;;  %v1511_v52 = vpop.f32.mrf.mxu1 }
 0x19b   : > { %v7204_v4 = vadd.f32 %v1398_v59, %v8899_v27  ;;  %v7207_v58 = vadd.f32 %v1511_v52, %v8901_v5  ;;  %v8907_v27 = vld [vmem:[#allocation24_spill] sm:$0xff] }
 0x19c   : > { %v1402_v46 = vpop.f32.mrf.mxu0  ;;  %v1515_v39 = vpop.f32.mrf.mxu1  ;;  %5496 = vmatmul.mubr.msk.bf16.gmra.mxu0 %vm527_vm3, %v5487_v57  ;;  %5505 = vmatmul.mubr.msk.bf16.gmra.mxu1 %vm527_vm3, %v5487_v57 }
 0x19d   : > { %8900 = vst [vmem:[#allocation38_spill] sm:$0xff] %v7204_v4  ;;  %8902 = vst [vmem:[#allocation6_spill] sm:$0xff] %v7207_v58  ;;  %v7212_v20 = vadd.f32 %v1402_v46, %v8903_v50  ;;  %v7215_v8 = vadd.f32 %v1515_v39, %v8905_v15  ;;  %3196 = vmatprep.mubr.bf16.mxu0 %v8801_v12  ;;  %3309 = vmatprep.mubr.bf16.mxu1 %v8801_v12  ;;  %v8909_v4 = vld [vmem:[#allocation3_spill] sm:$0xff]  ;;  %v5888_v15 = vld [vmem:[%s6065_s11 + $0x18] sm:$0xff]  }
 0x19e   : > { %v1404_v52 = vpop.f32.mrf.mxu0  ;;  %v1517_v59 = vpop.f32.mrf.mxu1  ;;  %v7226_v57 = vrot.slane %v5632_v42, %v8909_v4  ;;  %v7229_v46 = vrot.slane %v4171_v47, %v8909_v4  ;;  %v3745_v42 = vsel %vm552_vm0, %v6940_v51, 0  ;;  %v8911_v4 = vld [vmem:[#allocation26_spill] sm:$0xff] }
 0x19f   : > { %8904 = vst [vmem:[#allocation7_spill] sm:$0xff] %v7212_v20  ;;  %8906 = vst [vmem:[#allocation8_spill] sm:$0xff] %v7215_v8  ;;  %v7220_v5 = vadd.f32 %v1404_v52, %v8907_v27  ;;  %v7223_v58 = vadd.f32 %v1517_v59, %v6934_v14  ;;  %v3739_v14 = vsel %vm552_vm0, %v6937_v10, 0  ;;  %v8910_v59 = vld [vmem:[#allocation25_spill] sm:$0xff] }
 0x1a0   : > { %v1406_v39 = vpop.f32.mrf.mxu0  ;;  %v1519_v50 = vpop.f32.mrf.mxu1 }
 0x1a1   : > { %8908 = vst [vmem:[#allocation9_spill] sm:$0xff] %v7223_v58  ;;  %v7233_v8 = vadd.f32 %v1406_v39, %v6943_v19  ;;  %v7236_v20 = vadd.f32 %v1519_v50, %v6946_v17  ;;  %v4186_v19 = vcombine.high %v7226_v57, %v7226_v57  ;;  %v4187_v17 = vcombine.high %v7229_v46, %v7229_v46 }
 0x1a2   : > { %v1408_v52 = vpop.f32.mrf.mxu0  ;;  %v1521_v27 = vpop.f32.mrf.mxu1 }
 0x1a3   : > { %v7243_v47 = vadd.f32 %v1408_v52, %v8910_v59  ;;  %v7246_v58 = vadd.f32 %v1521_v27, %v8911_v4 }
 0x1a4   : > { %v1735_v39 = vpop.f32.mrf.mxu0  ;;  %v1848_v50 = vpop.f32.mrf.mxu1  ;;  %5532 = vmatmul.mubr.msk.bf16.vlgmr.msra.gmra.mxu0 %vm527_vm3, %v5888_v15  ;;  %5541 = vmatmul.mubr.msk.bf16.vlgmr.msra.gmra.mxu1 %vm527_vm3, %v5888_v15  ;;  %v5890_v15 = vld [vmem:[%s6065_s11 + $0x24] sm:$0xff]  }
 0x1a5   : > { %v7255_v10 = vadd.f32 %v1735_v39, %v6968_v37  ;;  %v7258_v51 = vadd.f32 %v1848_v50, %v6971_v25  ;;  %3765 = vmatpush1.bf16.msra.mxu0 %v3739_v14  ;;  %3878 = vmatpush1.bf16.msra.mxu1 %v3745_v42 }
 0x1a6   : > { %v1737_v52 = vpop.f32.mrf.mxu0  ;;  %v1850_v27 = vpop.f32.mrf.mxu1  ;;  %3206 = vmatprep.mubr.bf16.mxu0 %v8801_v12  ;;  %3319 = vmatprep.mubr.bf16.mxu1 %v8801_v12 }
 0x1a7   : > { %v7263_v59 = vadd.f32 %v1737_v52, %v6980_v55  ;;  %v7266_v4 = vadd.f32 %v1850_v27, %v6983_v62  ;;  %5641 = vmatprep.subr.msk.bf16.mxu0 %vm552_vm0, %v4186_v19  ;;  %5650 = vmatprep.subr.msk.bf16.mxu1 %vm552_vm0, %v4187_v17 }
 0x1a8   : > { %v1739_v37 = vpop.f32.mrf.mxu0  ;;  %v1852_v25 = vpop.f32.mrf.mxu1 }
 0x1a9   : > { %v7272_v14 = vadd.f32 %v1739_v37, %v6988_v18  ;;  %v7275_v42 = vadd.f32 %v1852_v25, %v6991_v6  ;;  %v8912_v6 = vld [vmem:[#allocation27_spill] sm:$0xff] }
 0x1aa   : > { %v1741_v39 = vpop.f32.mrf.mxu0  ;;  %v1854_v50 = vpop.f32.mrf.mxu1 }
 0x1ab   : > { %v7278_v55 = vadd.f32 %v1741_v39, %v6995_v56  ;;  %v7281_v62 = vadd.f32 %v1854_v50, %v6998_v28  ;;  %v5891_v39 = vld [vmem:[%s6065_s11 + $0x30] sm:$0xff]  }
 0x1ac   : > { %v1745_v19 = vpop.f32.mrf.mxu0  ;;  %v1858_v17 = vpop.f32.mrf.mxu1  ;;  %5533 = vmatmul.mubr.msk.bf16.gmra.mxu0 %vm527_vm3, %v5890_v15  ;;  %5542 = vmatmul.mubr.msk.bf16.gmra.mxu1 %vm527_vm3, %v5890_v15 }
 0x1ad   : > { %v7286_v18 = vadd.f32 %v1745_v19, %v7005_v53  ;;  %v7289_v52 = vadd.f32 %v1858_v17, %v8912_v6  ;;  %3216 = vmatprep.mubr.bf16.mxu0 %v8801_v12  ;;  %3329 = vmatprep.mubr.bf16.mxu1 %v8801_v12 }
 0x1ae   : > { %v1747_v56 = vpop.f32.mrf.mxu0  ;;  %v1860_v27 = vpop.f32.mrf.mxu1 }
 0x1af   : > { %v7294_v28 = vadd.f32 %v1747_v56, %v7017_v32  ;;  %v7297_v37 = vadd.f32 %v1860_v27, %v7020_v11 }
 0x1b0   : > { %v1749_v25 = vpop.f32.mrf.mxu0  ;;  %v1862_v15 = vpop.f32.mrf.mxu1 }
 0x1b1   : > { %v7301_v53 = vadd.f32 %v1749_v25, %v7023_v35  ;;  %v7304_v50 = vadd.f32 %v1862_v15, %v7026_v49 }
 0x1b2   : > { %v1751_v19 = vpop.f32.mrf.mxu0  ;;  %v1864_v17 = vpop.f32.mrf.mxu1 }
 0x1b3   : > { %v7307_v6 = vadd.f32 %v1751_v19, %v7030_v60  ;;  %v7310_v32 = vadd.f32 %v1864_v17, %v7033_v31  ;;  %v5892_v19 = vld [vmem:[%s6065_s11 + $0x3c] sm:$0xff]  }
 0x1b4   : > { %v1755_v11 = vpop.f32.mrf.mxu0  ;;  %v1868_v56 = vpop.f32.mrf.mxu1  ;;  %5534 = vmatmul.mubr.msk.bf16.gmra.mxu0 %vm527_vm3, %v5891_v39  ;;  %5543 = vmatmul.mubr.msk.bf16.gmra.mxu1 %vm527_vm3, %v5891_v39 }
 0x1b5   : > { %v7315_v35 = vadd.f32 %v1755_v11, %v7040_v33  ;;  %v7318_v49 = vadd.f32 %v1868_v56, %v7043_v13  ;;  %3226 = vmatprep.mubr.bf16.mxu0 %v8801_v12  ;;  %3339 = vmatprep.mubr.bf16.mxu1 %v8801_v12 }
 0x1b6   : > { %v1757_v60 = vpop.f32.mrf.mxu0  ;;  %v1870_v27 = vpop.f32.mrf.mxu1 }
 0x1b7   : > { %v7323_v31 = vadd.f32 %v1757_v60, %v7052_v3  ;;  %v7326_v25 = vadd.f32 %v1870_v27, %v7055_v40 }
 0x1b8   : > { %v1759_v15 = vpop.f32.mrf.mxu0  ;;  %v1872_v39 = vpop.f32.mrf.mxu1 }
 0x1b9   : > { %v7330_v33 = vadd.f32 %v1759_v15, %v7058_v48  ;;  %v7333_v13 = vadd.f32 %v1872_v39, %v7061_v0 }
 0x1ba   : > { %v1761_v17 = vpop.f32.mrf.mxu0  ;;  %v1874_v11 = vpop.f32.mrf.mxu1 }
 0x1bb   : > { %v7336_v56 = vadd.f32 %v1761_v17, %v7065_v29  ;;  %v7339_v3 = vadd.f32 %v1874_v11, %v7068_v34  ;;  %v5893_v17 = vld [vmem:[%s6065_s11 + $0x48] sm:$0xff]  }
 0x1bc   : > { %v1765_v40 = vpop.f32.mrf.mxu0  ;;  %v1878_v60 = vpop.f32.mrf.mxu1  ;;  %5535 = vmatmul.mubr.msk.bf16.gmra.mxu0 %vm527_vm3, %v5892_v19  ;;  %5544 = vmatmul.mubr.msk.bf16.gmra.mxu1 %vm527_vm3, %v5892_v19 }
 0x1bd   : > { %v7344_v48 = vadd.f32 %v1765_v40, %v7075_v21  ;;  %v7347_v0 = vadd.f32 %v1878_v60, %v7078_v41  ;;  %3236 = vmatprep.mubr.bf16.mxu0 %v8801_v12  ;;  %3349 = vmatprep.mubr.bf16.mxu1 %v8801_v12 }
 0x1be   : > { %v1767_v29 = vpop.f32.mrf.mxu0  ;;  %v1880_v27 = vpop.f32.mrf.mxu1 }
 0x1bf   : > { %8913 = vst [vmem:[#allocation10_spill] sm:$0xff] %v7347_v0  ;;  %v7352_v34 = vadd.f32 %v1767_v29, %v7087_v61  ;;  %v7355_v15 = vadd.f32 %v1880_v27, %v7090_v44  ;;  %v8919_v61 = vld [vmem:[#allocation28_spill] sm:$0xff] }
 0x1c0   : > { %v1769_v39 = vpop.f32.mrf.mxu0  ;;  %v1882_v19 = vpop.f32.mrf.mxu1 }
 0x1c1   : > { %8914 = vst [vmem:[#allocation11_spill] sm:$0xff] %v7352_v34  ;;  %8915 = vst [vmem:[#allocation12_spill] sm:$0xff] %v7355_v15  ;;  %v7359_v21 = vadd.f32 %v1769_v39, %v7093_v9  ;;  %v7362_v41 = vadd.f32 %v1882_v19, %v7096_v24  ;;  %v8921_v9 = vld [vmem:[#allocation29_spill] sm:$0xff]  ;;  %v8923_v24 = vld [vmem:[#allocation30_spill] sm:$0xff] }
 0x1c2   : > { %v1771_v11 = vpop.f32.mrf.mxu0  ;;  %v1884_v40 = vpop.f32.mrf.mxu1 }
 0x1c3   : > { %8916 = vst [vmem:[#allocation13_spill] sm:$0xff] %v7359_v21  ;;  %8917 = vst [vmem:[#allocation14_spill] sm:$0xff] %v7362_v41  ;;  %v7365_v60 = vadd.f32 %v1771_v11, %v7100_v63  ;;  %v7368_v29 = vadd.f32 %v1884_v40, %v8919_v61  ;;  %v5549_v40 = vld [vmem:[%s6065_s11 + $0x18] sm:$0xf] }
 0x1c4   : > { %v1775_v44 = vpop.f32.mrf.mxu0  ;;  %v1888_v27 = vpop.f32.mrf.mxu1  ;;  %5536 = vmatmul.mubr.msk.bf16.gmra.mxu0 %vm527_vm3, %v5893_v17  ;;  %5545 = vmatmul.mubr.msk.bf16.gmra.mxu1 %vm527_vm3, %v5893_v17  ;;  %v5550_v17 = vld [vmem:[%s6065_s11 + $0x1c] sm:$0xf]  ;;  %v3482_v41 = vshll.u32 %v5549_v40, 16 }
 0x1c5   : > { %8918 = vst [vmem:[#allocation15_spill] sm:$0xff] %v7365_v60  ;;  %8920 = vst [vmem:[#allocation16_spill] sm:$0xff] %v7368_v29  ;;  %v7373_v39 = vadd.f32 %v1775_v44, %v8921_v9  ;;  %v7376_v19 = vadd.f32 %v1888_v27, %v8923_v24  ;;  %3246 = vmatprep.mubr.bf16.mxu0 %v8801_v12  ;;  %3359 = vmatprep.mubr.bf16.mxu1 %v8801_v12  ;;  %v5894_v9 = vld [vmem:[%s6065_s11 + $0x54] sm:$0xff]   ;;  %v8928_v24 = vld [vmem:[#allocation31_spill] sm:$0xff]  ;;  %v3488_v34 = vshll.u32 %v5550_v17, 16 }
 0x1c6   : > { %v1777_v63 = vpop.f32.mrf.mxu0  ;;  %v1890_v11 = vpop.f32.mrf.mxu1 }
 0x1c7   : > { %8922 = vst [vmem:[#allocation17_spill] sm:$0xff] %v7373_v39  ;;  %8924 = vst [vmem:[#allocation18_spill] sm:$0xff] %v7376_v19  ;;  %v7382_v61 = vadd.f32 %v1777_v63, %v7122_v1  ;;  %v7385_v29 = vadd.f32 %v1890_v11, %v7125_v7  ;;  %v3479_v39 = vshrl.u32 %v5549_v40, 16  ;;  %v3492_v1 = vshrl.u32 %v5550_v17, 16  ;;  %v8930_v63 = vld [vmem:[#allocation32_spill] sm:$0xff]  ;;  %v8932_v7 = vld [vmem:[#allocation33_spill] sm:$0xff] }
 0x1c8   : > { %v1779_v60 = vpop.f32.mrf.mxu0  ;;  %v1892_v44 = vpop.f32.mrf.mxu1  ;;  %v8936_v40 = vld [vmem:[#allocation35_spill] sm:$0xff] }
 0x1c9   : > { %8925 = vst [vmem:[#allocation19_spill] sm:$0xff] %v7382_v61  ;;  %8926 = vst [vmem:[#allocation20_spill] sm:$0xff] %v7385_v29  ;;  %v7390_v27 = vadd.f32 %v1779_v60, %v7128_v36  ;;  %v7393_v19 = vadd.f32 %v1892_v44, %v8928_v24  ;;  %v8934_v36 = vld [vmem:[#allocation34_spill] sm:$0xff] }
 0x1ca   : > { %v1781_v21 = vpop.f32.mrf.mxu0  ;;  %v1894_v15 = vpop.f32.mrf.mxu1 }
 0x1cb   : > { %8927 = vst [vmem:[#allocation21_spill] sm:$0xff] %v7390_v27  ;;  %8929 = vst [vmem:[#allocation22_spill] sm:$0xff] %v7393_v19  ;;  %v7396_v61 = vadd.f32 %v1781_v21, %v8930_v63  ;;  %v7399_v11 = vadd.f32 %v1894_v15, %v8932_v7  ;;  %v3481_v15 = vrot.slane %v3479_v39, 4  ;;  %v3484_v21 = vrot.slane %v3482_v41, 5 }
 0x1cc   : > { %v1785_v29 = vpop.f32.mrf.mxu0  ;;  %v1898_v0 = vpop.f32.mrf.mxu1  ;;  %5537 = vmatmul.mubr.msk.bf16.gmra.mxu0 %vm527_vm3, %v5894_v9  ;;  %5546 = vmatmul.mubr.msk.bf16.gmra.mxu1 %vm527_vm3, %v5894_v9  ;;  %v7411_v63 = vrot.slane %v3488_v34, 5  ;;  %v3494_v7 = vrot.slane %v3492_v1, 4 }
 0x1cd   : > { %8931 = vst [vmem:[#allocation23_spill] sm:$0xff] %v7396_v61  ;;  %8933 = vst [vmem:[#allocation24_spill] sm:$0xff] %v7399_v11  ;;  %v7404_v60 = vadd.f32 %v1785_v29, %v8934_v36  ;;  %v7407_v17 = vadd.f32 %v1898_v0, %v8936_v40  ;;  %3256 = vmatprep.mubr.bf16.mxu0 %v8801_v12  ;;  %3369 = vmatprep.mubr.bf16.mxu1 %v8801_v12  ;;  %v8939_v29 = vld [vmem:[#allocation36_spill] sm:$0xff]  ;;  %v5551_v0 = vld [vmem:[%s6065_s11 + $0x20] sm:$0x1] }
 0x1ce   : > { %v1787_v44 = vpop.f32.mrf.mxu0  ;;  %v1900_v24 = vpop.f32.mrf.mxu1  ;;  %v5552_v40 = vld [vmem:[%s6065_s11 + $0x24] sm:$0xf]  ;;  %v5553_v61 = vld [vmem:[%s6065_s11 + $0x28] sm:$0xf]  ;;  %v3485_v34 = vor.u32 %v3484_v21, %v3481_v15 }
 0x1cf   : > { %8935 = vst [vmem:[#allocation3_spill] sm:$0xff] %v7404_v60  ;;  %8937 = vst [vmem:[#allocation25_spill] sm:$0xff] %v7407_v17  ;;  %v7414_v9 = vadd.f32 %v1787_v44, %v7157_v22  ;;  %v7417_v36 = vadd.f32 %v1900_v24, %v8939_v29  ;;  %v5895_v11 = vld [vmem:[%s6065_s11 + $0x60] sm:$0xff]   ;;  %v3495_v22 = vor.u32 %v3494_v7, %v7411_v63  ;;  %v3498_v44 = vshll.u32 %v5551_v0, 16 }
 0x1d0   : > { %v1789_v17 = vpop.f32.mrf.mxu0  ;;  %v1902_v60 = vpop.f32.mrf.mxu1  ;;  %v3503_v24 = vshrl.u32 %v5552_v40, 16  ;;  %v3506_v29 = vshll.u32 %v5552_v40, 16  ;;  %v3512_v27 = vshll.u32 %v5553_v61, 16 }
 0x1d1   : > { %8938 = vst [vmem:[#allocation26_spill] sm:$0xff] %v7414_v9  ;;  %8940 = vst [vmem:[#allocation27_spill] sm:$0xff] %v7417_v36  ;;  %v7424_v39 = vadd.f32 %v1789_v17, %v7163_v2  ;;  %v7427_v41 = vadd.f32 %v1902_v60, %v7166_v54  ;;  %v3516_v2 = vshrl.u32 %v5553_v61, 16  ;;  %v3496_v61 = vrot.slane %v3495_v22, 4 }
 0x1d2   : > { %v1791_v1 = vpop.f32.mrf.mxu0  ;;  %v1904_v19 = vpop.f32.mrf.mxu1  ;;  %v3500_v15 = vrot.slane %v3498_v44, 5  ;;  %v3508_v21 = vrot.slane %v3506_v29, 5  ;;  %v7452_v0 = vrot.slane %v3512_v27, 5  ;;  %v5555_v44 = vld [vmem:[%s6065_s11 + $0x30] sm:$0xf] }
 0x1d3   : > { %8941 = vst [vmem:[#allocation28_spill] sm:$0xff] %v7424_v39  ;;  %v7431_v36 = vadd.f32 %v1791_v1, %v7169_v38  ;;  %v7434_v9 = vadd.f32 %v1904_v19, %v7172_v26  ;;  %v3486_v38 = vrot.slane %v3485_v34, 4  ;;  %v3518_v40 = vrot.slane %v3516_v2, 4  ;;  %v5896_v34 = vld [vmem:[%s6065_s11 + $0x6c] sm:$0xff]  }
 0x1d4   : > { %v1795_v17 = vpop.f32.mrf.mxu0  ;;  %v1908_v39 = vpop.f32.mrf.mxu1  ;;  %5538 = vmatmul.mubr.msk.bf16.gmra.mxu0 %vm527_vm3, %v5895_v11  ;;  %5547 = vmatmul.mubr.msk.bf16.gmra.mxu1 %vm527_vm3, %v5895_v11  ;;  %v3505_v11 = vrot.slane %v3503_v24, 4  ;;  %v5556_v24 = vld [vmem:[%s6065_s11 + $0x34] sm:$0xf]  ;;  %v3501_v2 = vsel %vm6110_vm4, %v3496_v61, %v3500_v15  ;;  %v8953_v15 = vld [vmem:[#allocation7_spill] sm:$0xff] }
 0x1d5   : > { %v7439_v54 = vadd.f32 %v1795_v17, %v7179_v16  ;;  %v7442_v60 = vadd.f32 %v1908_v39, %v7182_v43  ;;  %3266 = vmatprep.mubr.bf16.mxu0 %v8801_v12  ;;  %3379 = vmatprep.mubr.bf16.mxu1 %v8801_v12  ;;  %v8944_v43 = vld [vmem:[#allocation37_spill] sm:$0xff]  ;;  %v5554_v17 = vld [vmem:[%s6065_s11 + $0x2c] sm:$0x1]  ;;  %v3491_v27 = vsel %vm6110_vm4, %v3486_v38, %v7411_v63  ;;  %v3527_v63 = vshrl.u32 %v5555_v44, 16 }
 0x1d6   : > { %v1797_v26 = vpop.f32.mrf.mxu0  ;;  %v1910_v19 = vpop.f32.mrf.mxu1  ;;  %v3530_v38 = vshll.u32 %v5555_v44, 16  ;;  %v3540_v61 = vshrl.u32 %v5556_v24, 16 }
 0x1d7   : > { %8942 = vst [vmem:[#allocation29_spill] sm:$0xff] %v7442_v60  ;;  %v7447_v16 = vadd.f32 %v1797_v26, %v7189_v45  ;;  %v7450_v7 = vadd.f32 %v1910_v19, %v8944_v43  ;;  %v3509_v19 = vor.u32 %v3508_v21, %v3505_v11  ;;  %v8949_v43 = vld [vmem:[#allocation38_spill] sm:$0xff]  ;;  %v8955_v21 = vld [vmem:[#allocation8_spill] sm:$0xff] }
 0x1d8   : > { %v1799_v39 = vpop.f32.mrf.mxu0  ;;  %v1912_v1 = vpop.f32.mrf.mxu1 }
 0x1d9   : > { %8943 = vst [vmem:[#allocation30_spill] sm:$0xff] %v7447_v16  ;;  %8945 = vst [vmem:[#allocation31_spill] sm:$0xff] %v7450_v7  ;;  %v7457_v60 = vadd.f32 %v1799_v39, %v7198_v30  ;;  %v7460_v22 = vadd.f32 %v1912_v1, %v7201_v23  ;;  %v8951_v30 = vld [vmem:[#allocation6_spill] sm:$0xff]  ;;  %v3519_v23 = vor.u32 %v3518_v40, %v7452_v0  ;;  %v3522_v1 = vshll.u32 %v5554_v17, 16 }
 0x1da   : > { %v1801_v45 = vpop.f32.mrf.mxu0  ;;  %v1914_v29 = vpop.f32.mrf.mxu1  ;;  %v3536_v16 = vshll.u32 %v5556_v24, 16 }
 0x1db   : > { %8946 = vst [vmem:[#allocation32_spill] sm:$0xff] %v7457_v60  ;;  %8947 = vst [vmem:[#allocation33_spill] sm:$0xff] %v7460_v22  ;;  %v7470_v7 = vadd.f32 %v1801_v45, %v8949_v43  ;;  %v7473_v39 = vadd.f32 %v1914_v29, %v8951_v30  ;;  %v5574_v29 = vcombine.low %v3491_v27, %v3501_v2  ;;  %v8957_v43 = vld [vmem:[#allocation9_spill] sm:$0xff]  ;;  %v3524_v30 = vrot.slane %v3522_v1, 5 }
 0x1dc   : > { %v1805_v22 = vpop.f32.mrf.mxu0  ;;  %v1918_v60 = vpop.f32.mrf.mxu1  ;;  %5539 = vmatmul.mubr.msk.bf16.gmra.mxu0 %vm527_vm3, %v5896_v34  ;;  %5548 = vmatmul.mubr.msk.bf16.gmra.mxu1 %vm527_vm3, %v5896_v34  ;;  %v3510_v34 = vrot.slane %v3509_v19, 4  ;;  %v5558_v2 = vld [vmem:[%s6065_s11 + $0x3c] sm:$0xf]  ;;  %v4219_v1 = vsel %vm552_vm0, %v7229_v46, 0 }
 0x1dd   : > { %8950 = vst [vmem:[#allocation34_spill] sm:$0xff] %v7470_v7  ;;  %8952 = vst [vmem:[#allocation35_spill] sm:$0xff] %v7473_v39  ;;  %v7479_v11 = vadd.f32 %v1805_v22, %v8953_v15  ;;  %v7482_v45 = vadd.f32 %v1918_v60, %v8955_v21  ;;  %3782 = vmatprep.mubr.bf16.mxu0 %v8801_v12  ;;  %3895 = vmatprep.mubr.bf16.mxu1 %v8801_v12  ;;  %v3520_v22 = vrot.slane %v3519_v23, 4  ;;  %v5557_v21 = vld [vmem:[%s6065_s11 + $0x38] sm:$0x1] }
 0x1de   : > { %v1807_v40 = vpop.f32.mrf.mxu0  ;;  %v1920_v17 = vpop.f32.mrf.mxu1  ;;  %v7493_v39 = vrot.slane %v3536_v16, 5  ;;  %v3542_v7 = vrot.slane %v3540_v61, 4  ;;  %v4213_v23 = vsel %vm552_vm0, %v7226_v57, 0  ;;  %v3515_v16 = vsel %vm6110_vm4, %v3510_v34, %v7452_v0 }
 0x1df   : > { %8954 = vst [vmem:[#allocation36_spill] sm:$0xff] %v7479_v11  ;;  %8956 = vst [vmem:[#allocation37_spill] sm:$0xff] %v7482_v45  ;;  %v7487_v44 = vadd.f32 %v1807_v40, %v7220_v5  ;;  %v7490_v24 = vadd.f32 %v1920_v17, %v8957_v43  ;;  %v3529_v45 = vrot.slane %v3527_v63, 4  ;;  %v3532_v11 = vrot.slane %v3530_v38, 5  ;;  %v5559_v63 = vld [vmem:[%s6065_s11 + $0x40] sm:$0xf] }
 0x1e0   : > { %v1809_v60 = vpop.f32.mrf.mxu0  ;;  %v1922_v15 = vpop.f32.mrf.mxu1  ;;  %v3525_v38 = vsel %vm6110_vm4, %v3520_v22, %v3524_v30  ;;  %v3546_v61 = vshll.u32 %v5557_v21, 16  ;;  %v3543_v0 = vor.u32 %v3542_v7, %v7493_v39  ;;  %v3551_v34 = vshrl.u32 %v5558_v2, 16 }
 0x1e1   : > { %v7496_v27 = vadd.f32 %v1809_v60, %v7233_v8  ;;  %v7499_v5 = vadd.f32 %v1922_v15, %v7236_v20  ;;  %v3533_v46 = vor.u32 %v3532_v11, %v3529_v45  ;;  %v3560_v22 = vshll.u32 %v5559_v63, 16  ;;  %v5561_v45 = vld [vmem:[%s6065_s11 + $0x48] sm:$0xf] }
 0x1e2   : > { %v1811_v19 = vpop.f32.mrf.mxu0  ;;  %v1924_v40 = vpop.f32.mrf.mxu1  ;;  %v3564_v30 = vshrl.u32 %v5559_v63, 16  ;;  %v5575_v11 = vcombine.low %v3515_v16, %v3525_v38  ;;  %v8999_v26 = vld [vmem:[#allocation33_spill] sm:$0xff] }
 0x1e3   : > { %v7511_v8 = vadd.f32 %v1811_v19, %v7243_v47  ;;  %v7514_v20 = vadd.f32 %v1924_v40, %v7246_v58  ;;  %v3554_v47 = vshll.u32 %v5558_v2, 16  ;;  %v3534_v19 = vrot.slane %v3533_v46, 4 }
 0x1e4   : > { %v2321_v17 = vpop.f32.mrf.mxu0  ;;  %v2434_v57 = vpop.f32.mrf.mxu1  ;;  %5583 = vmatmul.mubr.msk.bf16.vlgmr.msra.gmra.mxu0 %vm527_vm3, %v5574_v29  ;;  %5592 = vmatmul.mubr.msk.bf16.vlgmr.msra.gmra.mxu1 %vm527_vm3, %v5574_v29  ;;  %v5562_v29 = vld [vmem:[%s6065_s11 + $0x4c] sm:$0xf]  ;;  %v3544_v40 = vrot.slane %v3543_v0, 4 }
 0x1e5   : > { %v7522_v58 = vadd.f32 %v2321_v17, %v7255_v10  ;;  %v7525_v43 = vadd.f32 %v2434_v57, %v7258_v51  ;;  %4239 = vmatpush1.bf16.msra.mxu0 %v4213_v23  ;;  %4352 = vmatpush1.bf16.msra.mxu1 %v4219_v1  ;;  %v3548_v51 = vrot.slane %v3546_v61, 5  ;;  %v3553_v23 = vrot.slane %v3551_v34, 4 }
 0x1e6   : > { %v2323_v60 = vpop.f32.mrf.mxu0  ;;  %v2436_v15 = vpop.f32.mrf.mxu1  ;;  %3792 = vmatprep.mubr.bf16.mxu0 %v8801_v12  ;;  %3905 = vmatprep.mubr.bf16.mxu1 %v8801_v12  ;;  %v3556_v1 = vrot.slane %v3554_v47, 5  ;;  %v7544_v57 = vrot.slane %v3560_v22, 5  ;;  %v3575_v61 = vshrl.u32 %v5561_v45, 16  ;;  %v3539_v34 = vsel %vm6110_vm4, %v3534_v19, %v7493_v39 }
 0x1e7   : > { %v7530_v7 = vadd.f32 %v2323_v60, %v7263_v59  ;;  %v7533_v10 = vadd.f32 %v2436_v15, %v7266_v4  ;;  %v5560_v59 = vld [vmem:[%s6065_s11 + $0x44] sm:$0x1]  ;;  %v3566_v4 = vrot.slane %v3564_v30, 4  ;;  %v3578_v60 = vshll.u32 %v5561_v45, 16 }
 0x1e8   : > { %v2325_v21 = vpop.f32.mrf.mxu0  ;;  %v2438_v2 = vpop.f32.mrf.mxu1  ;;  %v3584_v15 = vshll.u32 %v5562_v29, 16  ;;  %v3549_v47 = vsel %vm6110_vm4, %v3544_v40, %v3548_v51  ;;  %v3557_v22 = vor.u32 %v3556_v1, %v3553_v23  ;;  %v3577_v51 = vrot.slane %v3575_v61, 4  ;;  %v5564_v40 = vld [vmem:[%s6065_s11 + $0x54] sm:$0xf] }
 0x1e9   : > { %8958 = vst [vmem:[#allocation4_spill] sm:$0xff] %v7533_v10  ;;  %v7538_v63 = vadd.f32 %v2325_v21, %v7272_v14  ;;  %v7541_v17 = vadd.f32 %v2438_v2, %v7275_v42  ;;  %v3588_v10 = vshrl.u32 %v5562_v29, 16  ;;  %v5563_v29 = vld [vmem:[%s6065_s11 + $0x50] sm:$0x1]  ;;  %v3580_v21 = vrot.slane %v3578_v60, 5 }
 0x1ea   : > { %v2327_v16 = vpop.f32.mrf.mxu0  ;;  %v2440_v38 = vpop.f32.mrf.mxu1  ;;  %v7569_v2 = vrot.slane %v3584_v15, 5  ;;  %v3594_v60 = vshll.u32 %v5563_v29, 16 }
 0x1eb   : > { %v7547_v46 = vadd.f32 %v2327_v16, %v7278_v55  ;;  %v7550_v0 = vadd.f32 %v2440_v38, %v7281_v62  ;;  %v3570_v55 = vshll.u32 %v5560_v59, 16  ;;  %v3590_v19 = vrot.slane %v3588_v10, 4  ;;  %v5565_v38 = vld [vmem:[%s6065_s11 + $0x58] sm:$0xf] }
 0x1ec   : > { %v2331_v14 = vpop.f32.mrf.mxu0  ;;  %v2444_v42 = vpop.f32.mrf.mxu1  ;;  %5584 = vmatmul.mubr.msk.bf16.gmra.mxu0 %vm527_vm3, %v5575_v11  ;;  %5593 = vmatmul.mubr.msk.bf16.gmra.mxu1 %vm527_vm3, %v5575_v11  ;;  %v3567_v11 = vor.u32 %v3566_v4, %v7544_v57  ;;  %v5576_v59 = vcombine.low %v3539_v34, %v3549_v47  ;;  %v3558_v4 = vrot.slane %v3557_v22, 4  ;;  %v3612_v22 = vshrl.u32 %v5565_v38, 16 }
 0x1ed   : > { %v7560_v62 = vadd.f32 %v2331_v14, %v7286_v18  ;;  %v7563_v30 = vadd.f32 %v2444_v42, %v7289_v52  ;;  %3802 = vmatprep.mubr.bf16.mxu0 %v8801_v12  ;;  %3915 = vmatprep.mubr.bf16.mxu1 %v8801_v12  ;;  %v3572_v16 = vrot.slane %v3570_v55, 5  ;;  %v3581_v42 = vor.u32 %v3580_v21, %v3577_v51 }
 0x1ee   : > { %v2333_v39 = vpop.f32.mrf.mxu0  ;;  %v2446_v45 = vpop.f32.mrf.mxu1  ;;  %v3568_v10 = vrot.slane %v3567_v11, 4  ;;  %v3563_v11 = vsel %vm6110_vm4, %v3558_v4, %v7544_v57  ;;  %v3596_v51 = vrot.slane %v3594_v60, 5  ;;  %v3614_v4 = vrot.slane %v3612_v22, 4  ;;  %v5566_v60 = vld [vmem:[%s6065_s11 + $0x5c] sm:$0x1] }
 0x1ef   : > { %v7572_v18 = vadd.f32 %v2333_v39, %v7294_v28  ;;  %v7575_v52 = vadd.f32 %v2446_v45, %v7297_v37  ;;  %v3591_v37 = vor.u32 %v3590_v19, %v7569_v2  ;;  %v3599_v39 = vshrl.u32 %v5564_v40, 16 }
 0x1f0   : > { %v2335_v23 = vpop.f32.mrf.mxu0  ;;  %v2448_v1 = vpop.f32.mrf.mxu1  ;;  %v3602_v45 = vshll.u32 %v5564_v40, 16  ;;  %v3582_v57 = vrot.slane %v3581_v42, 4  ;;  %v5567_v42 = vld [vmem:[%s6065_s11 + $0x60] sm:$0xf] }
 0x1f1   : > { %v7580_v14 = vadd.f32 %v2335_v23, %v7301_v53  ;;  %v7583_v61 = vadd.f32 %v2448_v1, %v7304_v50  ;;  %v3608_v53 = vshll.u32 %v5565_v38, 16  ;;  %v3592_v40 = vrot.slane %v3591_v37, 4  ;;  %v5568_v37 = vld [vmem:[%s6065_s11 + $0x64] sm:$0xf] }
 0x1f2   : > { %v2337_v28 = vpop.f32.mrf.mxu0  ;;  %v2450_v15 = vpop.f32.mrf.mxu1  ;;  %v3604_v23 = vrot.slane %v3602_v45, 5 }
 0x1f3   : > { %v7587_v34 = vadd.f32 %v2337_v28, %v7307_v6  ;;  %v7590_v47 = vadd.f32 %v2450_v15, %v7310_v32  ;;  %v3573_v32 = vsel %vm6110_vm4, %v3568_v10, %v3572_v16  ;;  %v3597_v45 = vsel %vm6110_vm4, %v3592_v40, %v3596_v51 }
 0x1f4   : > { %v2341_v55 = vpop.f32.mrf.mxu0  ;;  %v2454_v50 = vpop.f32.mrf.mxu1  ;;  %5585 = vmatmul.mubr.msk.bf16.gmra.mxu0 %vm527_vm3, %v5576_v59  ;;  %5594 = vmatmul.mubr.msk.bf16.gmra.mxu1 %vm527_vm3, %v5576_v59  ;;  %v7613_v59 = vrot.slane %v3608_v53, 5  ;;  %v5577_v10 = vcombine.low %v3563_v11, %v3573_v32  ;;  %v3626_v32 = vshll.u32 %v5567_v42, 16  ;;  %v3636_v51 = vshrl.u32 %v5568_v37, 16 }
 0x1f5   : > { %v7598_v29 = vadd.f32 %v2341_v55, %v7315_v35  ;;  %v7601_v6 = vadd.f32 %v2454_v50, %v7318_v49  ;;  %3812 = vmatprep.mubr.bf16.mxu0 %v8801_v12  ;;  %3925 = vmatprep.mubr.bf16.mxu1 %v8801_v12  ;;  %v3601_v35 = vrot.slane %v3599_v39, 4  ;;  %v3618_v55 = vshll.u32 %v5566_v60, 16 }
 0x1f6   : > { %v2343_v21 = vpop.f32.mrf.mxu0  ;;  %v2456_v19 = vpop.f32.mrf.mxu1 }
 0x1f7   : > { %v7608_v49 = vadd.f32 %v2343_v21, %v7323_v31  ;;  %v7611_v1 = vadd.f32 %v2456_v19, %v7326_v25  ;;  %v3587_v25 = vsel %vm6110_vm4, %v3582_v57, %v7569_v2  ;;  %v3605_v53 = vor.u32 %v3604_v23, %v3601_v35  ;;  %v8960_v19 = vld [vmem:[#allocation10_spill] sm:$0xff] }
 0x1f8   : > { %v2345_v38 = vpop.f32.mrf.mxu0  ;;  %v2458_v16 = vpop.f32.mrf.mxu1  ;;  %v3623_v2 = vshrl.u32 %v5567_v42, 16  ;;  %v3632_v21 = vshll.u32 %v5568_v37, 16  ;;  %v5578_v35 = vcombine.low %v3587_v25, %v3597_v45  ;;  %v3620_v60 = vrot.slane %v3618_v55, 5  ;;  %v8968_v45 = vld [vmem:[#allocation14_spill] sm:$0xff]  ;;  %v5571_v55 = vld [vmem:[%s6065_s11 + $0x70] sm:$0xf] }
 0x1f9   : > { %v7617_v28 = vadd.f32 %v2345_v38, %v7330_v33  ;;  %v7620_v15 = vadd.f32 %v2458_v16, %v7333_v13  ;;  %v3615_v13 = vor.u32 %v3614_v4, %v7613_v59  ;;  %v3606_v23 = vrot.slane %v3605_v53, 4  ;;  %v8962_v4 = vld [vmem:[#allocation11_spill] sm:$0xff]  ;;  %v8964_v16 = vld [vmem:[#allocation12_spill] sm:$0xff] }
 0x1fa   : > { %v2347_v31 = vpop.f32.mrf.mxu0  ;;  %v2460_v39 = vpop.f32.mrf.mxu1 }
 0x1fb   : > { %v7630_v22 = vadd.f32 %v2347_v31, %v7336_v56  ;;  %v7633_v33 = vadd.f32 %v2460_v39, %v7339_v3  ;;  %v5569_v31 = vld [vmem:[%s6065_s11 + $0x68] sm:$0x1]  ;;  %v3625_v39 = vrot.slane %v3623_v2, 4 }
 0x1fc   : > { %v2351_v50 = vpop.f32.mrf.mxu0  ;;  %v2464_v11 = vpop.f32.mrf.mxu1  ;;  %5586 = vmatmul.mubr.msk.bf16.gmra.mxu0 %vm527_vm3, %v5577_v10  ;;  %5595 = vmatmul.mubr.msk.bf16.gmra.mxu1 %vm527_vm3, %v5577_v10 }
 0x1fd   : > { %v7639_v56 = vadd.f32 %v2351_v50, %v7344_v48  ;;  %v7642_v3 = vadd.f32 %v2464_v11, %v8960_v19  ;;  %3822 = vmatprep.mubr.bf16.mxu0 %v8801_v12  ;;  %3935 = vmatprep.mubr.bf16.mxu1 %v8801_v12  ;;  %v3616_v48 = vrot.slane %v3615_v13, 4  ;;  %v3628_v50 = vrot.slane %v3626_v32, 5  ;;  %v8972_v32 = vld [vmem:[#allocation16_spill] sm:$0xff] }
 0x1fe   : > { %v2353_v57 = vpop.f32.mrf.mxu0  ;;  %v2466_v40 = vpop.f32.mrf.mxu1  ;;  %v7653_v11 = vrot.slane %v3632_v21, 5  ;;  %v3638_v19 = vrot.slane %v3636_v51, 4  ;;  %v3611_v13 = vsel %vm6110_vm4, %v3606_v23, %v7613_v59 }
 0x1ff   : > { %8959 = vst [vmem:[#allocation38_spill] sm:$0xff] %v7639_v56  ;;  %8961 = vst [vmem:[#allocation6_spill] sm:$0xff] %v7642_v3  ;;  %v7647_v38 = vadd.f32 %v2353_v57, %v8962_v4  ;;  %v7650_v10 = vadd.f32 %v2466_v40, %v8964_v16  ;;  %v8966_v3 = vld [vmem:[#allocation13_spill] sm:$0xff]  ;;  %v5570_v57 = vld [vmem:[%s6065_s11 + $0x6c] sm:$0xf]  ;;  %v3621_v51 = vsel %vm6110_vm4, %v3616_v48, %v3620_v60  ;;  %v3656_v48 = vshll.u32 %v5571_v55, 16 }
 0x200   : > { %v2355_v42 = vpop.f32.mrf.mxu0  ;;  %v2468_v37 = vpop.f32.mrf.mxu1  ;;  %v8970_v16 = vld [vmem:[#allocation15_spill] sm:$0xff]  ;;  %v3639_v59 = vor.u32 %v3638_v19, %v7653_v11  ;;  %v3647_v23 = vshrl.u32 %v5570_v57, 16  ;;  %v3660_v60 = vshrl.u32 %v5571_v55, 16  ;;  %v8982_v55 = vld [vmem:[#allocation22_spill] sm:$0xff] }
 0x201   : > { %8963 = vst [vmem:[#allocation7_spill] sm:$0xff] %v7647_v38  ;;  %8965 = vst [vmem:[#allocation8_spill] sm:$0xff] %v7650_v10  ;;  %v7656_v25 = vadd.f32 %v2355_v42, %v8966_v3  ;;  %v7659_v53 = vadd.f32 %v2468_v37, %v8968_v45  ;;  %v3642_v3 = vshll.u32 %v5569_v31, 16  ;;  %v3629_v45 = vor.u32 %v3628_v50, %v3625_v39  ;;  %v8980_v50 = vld [vmem:[#allocation20_spill] sm:$0xff] }
 0x202   : > { %v2357_v40 = vpop.f32.mrf.mxu0  ;;  %v2470_v4 = vpop.f32.mrf.mxu1 }
 0x203   : > { %8967 = vst [vmem:[#allocation9_spill] sm:$0xff] %v7656_v25  ;;  %8969 = vst [vmem:[#allocation10_spill] sm:$0xff] %v7659_v53  ;;  %v7667_v2 = vadd.f32 %v2357_v40, %v8970_v16  ;;  %v7670_v21 = vadd.f32 %v2470_v4, %v8972_v32  ;;  %v3650_v53 = vshll.u32 %v5570_v57, 16  ;;  %v8974_v40 = vld [vmem:[#allocation17_spill] sm:$0xff]  ;;  %v8976_v4 = vld [vmem:[#allocation18_spill] sm:$0xff]  ;;  %v5579_v57 = vcombine.low %v3611_v13, %v3621_v51 }
 0x204   : > { %v2361_v42 = vpop.f32.mrf.mxu0  ;;  %v2474_v37 = vpop.f32.mrf.mxu1  ;;  %5587 = vmatmul.mubr.msk.bf16.gmra.mxu0 %vm527_vm3, %v5578_v35  ;;  %5596 = vmatmul.mubr.msk.bf16.gmra.mxu1 %vm527_vm3, %v5578_v35  ;;  %v8978_v35 = vld [vmem:[#allocation19_spill] sm:$0xff]  ;;  %v8981_v25 = vld [vmem:[#allocation21_spill] sm:$0xff]  ;;  %v8985_v51 = vld [vmem:[#allocation24_spill] sm:$0xff] }
 0x205   : > { %8971 = vst [vmem:[#allocation11_spill] sm:$0xff] %v7667_v2  ;;  %8973 = vst [vmem:[#allocation12_spill] sm:$0xff] %v7670_v21  ;;  %v7678_v16 = vadd.f32 %v2361_v42, %v8974_v40  ;;  %v7681_v32 = vadd.f32 %v2474_v37, %v8976_v4  ;;  %3832 = vmatprep.mubr.bf16.mxu0 %v8801_v12  ;;  %3945 = vmatprep.mubr.bf16.mxu1 %v8801_v12  ;;  %v3644_v42 = vrot.slane %v3642_v3, 5 }
 0x206   : > { %v2363_v31 = vpop.f32.mrf.mxu0  ;;  %v2476_v21 = vpop.f32.mrf.mxu1  ;;  %v3630_v4 = vrot.slane %v3629_v45, 4  ;;  %v3652_v2 = vrot.slane %v3650_v53, 5 }
 0x207   : > { %8975 = vst [vmem:[#allocation13_spill] sm:$0xff] %v7678_v16  ;;  %8977 = vst [vmem:[#allocation14_spill] sm:$0xff] %v7681_v32  ;;  %v7686_v39 = vadd.f32 %v2363_v31, %v8978_v35  ;;  %v7689_v19 = vadd.f32 %v2476_v21, %v8980_v50  ;;  %v3640_v32 = vrot.slane %v3639_v59, 4  ;;  %v3649_v16 = vrot.slane %v3647_v23, 4  ;;  %v5572_v21 = vld [vmem:[%s6065_s11 + $0x74] sm:$0x1] }
 0x208   : > { %v2365_v40 = vpop.f32.mrf.mxu0  ;;  %v2478_v37 = vpop.f32.mrf.mxu1  ;;  %v3658_v31 = vrot.slane %v3656_v48, 5  ;;  %v3662_v35 = vrot.slane %v3660_v60, 4  ;;  %v8983_v50 = vld [vmem:[#allocation23_spill] sm:$0xff] }
 0x209   : > { %8979 = vst [vmem:[#allocation15_spill] sm:$0xff] %v7686_v39  ;;  %v7692_v10 = vadd.f32 %v2365_v40, %v8981_v25  ;;  %v7695_v38 = vadd.f32 %v2478_v37, %v8982_v55  ;;  %v3635_v25 = vsel %vm6110_vm4, %v3630_v4, %v7653_v11  ;;  %v3645_v53 = vsel %vm6110_vm4, %v3640_v32, %v3644_v42  ;;  %v8987_v48 = vld [vmem:[#allocation3_spill] sm:$0xff]  ;;  %v8989_v11 = vld [vmem:[#allocation26_spill] sm:$0xff] }
 0x20a   : > { %v2367_v39 = vpop.f32.mrf.mxu0  ;;  %v2480_v56 = vpop.f32.mrf.mxu1  ;;  %v3653_v23 = vor.u32 %v3652_v2, %v3649_v16  ;;  %v3663_v40 = vor.u32 %v3662_v35, %v3658_v31  ;;  %v8990_v32 = vld [vmem:[#allocation27_spill] sm:$0xff] }
 0x20b   : > { %v7699_v13 = vadd.f32 %v2367_v39, %v8983_v50  ;;  %v7702_v3 = vadd.f32 %v2480_v56, %v8985_v51  ;;  %v8988_v39 = vld [vmem:[#allocation25_spill] sm:$0xff]  ;;  %v5580_v50 = vcombine.low %v3635_v25, %v3645_v53 }
 0x20c   : > { %v2371_v45 = vpop.f32.mrf.mxu0  ;;  %v2484_v59 = vpop.f32.mrf.mxu1  ;;  %5588 = vmatmul.mubr.msk.bf16.gmra.mxu0 %vm527_vm3, %v5579_v57  ;;  %5597 = vmatmul.mubr.msk.bf16.gmra.mxu1 %vm527_vm3, %v5579_v57  ;;  %v3666_v57 = vshll.u32 %v5572_v21, 16  ;;  %v3654_v51 = vrot.slane %v3653_v23, 4  ;;  %v3664_v35 = vrot.slane %v3663_v40, 4  ;;  %v8994_v40 = vld [vmem:[#allocation29_spill] sm:$0xff] }
 0x20d   : > { %8984 = vst [vmem:[#allocation16_spill] sm:$0xff] %v7699_v13  ;;  %8986 = vst [vmem:[#allocation17_spill] sm:$0xff] %v7702_v3  ;;  %v7712_v60 = vadd.f32 %v2371_v45, %v8987_v48  ;;  %v7715_v56 = vadd.f32 %v2484_v59, %v8988_v39  ;;  %3842 = vmatprep.mubr.bf16.mxu0 %v8801_v12  ;;  %3955 = vmatprep.mubr.bf16.mxu1 %v8801_v12  ;;  %v8991_v45 = vld [vmem:[#allocation28_spill] sm:$0xff] }
 0x20e   : > { %v2373_v37 = vpop.f32.mrf.mxu0  ;;  %v2486_v55 = vpop.f32.mrf.mxu1  ;;  %v3668_v21 = vrot.slane %v3666_v57, 5 }
 0x20f   : > { %v7720_v4 = vadd.f32 %v2373_v37, %v8989_v11  ;;  %v7723_v2 = vadd.f32 %v2486_v55, %v8990_v32  ;;  %v5601_v37 = vld [vmem:[%s6065_s11 + $0x1c] sm:$0xf] }
 0x210   : > { %v2375_v16 = vpop.f32.mrf.mxu0  ;;  %v2488_v42 = vpop.f32.mrf.mxu1 }
 0x211   : > { %v7726_v59 = vadd.f32 %v2375_v16, %v8991_v45  ;;  %v7729_v48 = vadd.f32 %v2488_v42, %v7427_v41  ;;  %v3659_v41 = vsel %vm6110_vm4, %v3654_v51, %v3658_v31  ;;  %v5602_v42 = vld [vmem:[%s6065_s11 + $0x20] sm:$0x1] }
 0x212   : > { %v2377_v39 = vpop.f32.mrf.mxu0  ;;  %v2490_v3 = vpop.f32.mrf.mxu1  ;;  %v8995_v31 = vld [vmem:[#allocation30_spill] sm:$0xff] }
 0x213   : > { %v7733_v11 = vadd.f32 %v2377_v39, %v7431_v36  ;;  %v7736_v55 = vadd.f32 %v2490_v3, %v7434_v9  ;;  %v3669_v9 = vsel %vm6110_vm4, %v3664_v35, %v3668_v21  ;;  %v5600_v36 = vld [vmem:[%s6065_s11 + $0x18] sm:$0xe]  ;;  %v4090_v3 = vrot.slane %v5601_v37, 5 }
 0x214   : > { %v2381_v25 = vpop.f32.mrf.mxu0  ;;  %v2494_v53 = vpop.f32.mrf.mxu1  ;;  %5589 = vmatmul.mubr.msk.bf16.gmra.mxu0 %vm527_vm3, %v5580_v50  ;;  %5598 = vmatmul.mubr.msk.bf16.gmra.mxu1 %vm527_vm3, %v5580_v50  ;;  %v4093_v37 = vrot.slane %v5602_v42, 5 }
 0x215   : > { %8992 = vst [vmem:[#allocation18_spill] sm:$0xff] %v7733_v11  ;;  %8993 = vst [vmem:[#allocation19_spill] sm:$0xff] %v7736_v55  ;;  %v7743_v23 = vadd.f32 %v2381_v25, %v7439_v54  ;;  %v7746_v57 = vadd.f32 %v2494_v53, %v8994_v40  ;;  %3852 = vmatprep.mubr.bf16.mxu0 %v8801_v12  ;;  %3965 = vmatprep.mubr.bf16.mxu1 %v8801_v12  ;;  %v8997_v54 = vld [vmem:[#allocation31_spill] sm:$0xff]  ;;  %v5624_v53 = vrot.slane %v5600_v36, 9  ;;  %v8998_v40 = vld [vmem:[#allocation32_spill] sm:$0xff] }
 0x216   : > { %v2383_v32 = vpop.f32.mrf.mxu0  ;;  %v2496_v16 = vpop.f32.mrf.mxu1  ;;  %v5581_v25 = vcombine.low %v3659_v41, %v3669_v9  ;;  %v4092_v21 = vrot.slane %v4090_v3, 4 }
 0x217   : > { %v7755_v50 = vadd.f32 %v2383_v32, %v8995_v31  ;;  %v7758_v51 = vadd.f32 %v2496_v16, %v8997_v54  ;;  %v5604_v32 = vld [vmem:[%s6065_s11 + $0x28] sm:$0xf]  ;;  %v9000_v31 = vld [vmem:[#allocation34_spill] sm:$0xff]  ;;  %v4091_v42 = vsel %vm6310_vm7, %v5624_v53, %v4090_v3 }
 0x218   : > { %v2385_v45 = vpop.f32.mrf.mxu0  ;;  %v2498_v39 = vpop.f32.mrf.mxu1  ;;  %v9002_v16 = vld [vmem:[#allocation35_spill] sm:$0xff] }
 0x219   : > { %8996 = vst [vmem:[#allocation20_spill] sm:$0xff] %v7755_v50  ;;  %v7761_v55 = vadd.f32 %v2385_v45, %v8998_v40  ;;  %v7764_v35 = vadd.f32 %v2498_v39, %v8999_v26  ;;  %v9005_v45 = vld [vmem:[#allocation36_spill] sm:$0xff]  ;;  %v9007_v40 = vld [vmem:[#allocation37_spill] sm:$0xff] }
 0x21a   : > { %v2387_v11 = vpop.f32.mrf.mxu0  ;;  %v2500_v13 = vpop.f32.mrf.mxu1 }
 0x21b   : > { %v7768_v50 = vadd.f32 %v2387_v11, %v9000_v31  ;;  %v7771_v54 = vadd.f32 %v2500_v13, %v9002_v16  ;;  %v4094_v13 = vsel %vm6310_vm7, %v4092_v21, %v4093_v37  ;;  %v5603_v11 = vld [vmem:[%s6065_s11 + $0x24] sm:$0xe]  ;;  %v4097_v31 = vrot.slane %v5604_v32, 5 }
 0x21c   : > { %v2391_v41 = vpop.f32.mrf.mxu0  ;;  %v2504_v9 = vpop.f32.mrf.mxu1  ;;  %5590 = vmatmul.mubr.msk.bf16.gmra.mxu0 %vm527_vm3, %v5581_v25  ;;  %5599 = vmatmul.mubr.msk.bf16.gmra.mxu1 %vm527_vm3, %v5581_v25 }
 0x21d   : > { %9001 = vst [vmem:[#allocation21_spill] sm:$0xff] %v7768_v50  ;;  %9003 = vst [vmem:[#allocation22_spill] sm:$0xff] %v7771_v54  ;;  %v7778_v39 = vadd.f32 %v2391_v41, %v9005_v45  ;;  %v7781_v26 = vadd.f32 %v2504_v9, %v9007_v40  ;;  %4256 = vmatprep.mubr.bf16.mxu0 %v8801_v12  ;;  %4369 = vmatprep.mubr.bf16.mxu1 %v8801_v12  ;;  %v5605_v54 = vld [vmem:[%s6065_s11 + $0x2c] sm:$0x1]  ;;  %v5625_v40 = vrot.slane %v5603_v11, 9 }
 0x21e   : > { %v2393_v25 = vpop.f32.mrf.mxu0  ;;  %v2506_v16 = vpop.f32.mrf.mxu1  ;;  %v5633_v45 = vcombine.low %v4091_v42, %v4094_v13  ;;  %v4099_v37 = vrot.slane %v4097_v31, 4  ;;  %v4100_v32 = vrot.slane %v5605_v54, 5 }
 0x21f   : > { %9006 = vst [vmem:[#allocation23_spill] sm:$0xff] %v7778_v39  ;;  %9008 = vst [vmem:[#allocation24_spill] sm:$0xff] %v7781_v26  ;;  %v7790_v3 = vadd.f32 %v2393_v25, %v7487_v44  ;;  %v7793_v53 = vadd.f32 %v2506_v16, %v7490_v24  ;;  %v5607_v44 = vld [vmem:[%s6065_s11 + $0x34] sm:$0xf]  ;;  %v5608_v16 = vld [vmem:[%s6065_s11 + $0x38] sm:$0x1] }
 0x220   : > { %v2395_v41 = vpop.f32.mrf.mxu0  ;;  %v2508_v9 = vpop.f32.mrf.mxu1 }
 0x221   : > { %v7796_v50 = vadd.f32 %v2395_v41, %v7496_v27  ;;  %v7799_v21 = vadd.f32 %v2508_v9, %v7499_v5  ;;  %v4098_v27 = vsel %vm6310_vm7, %v5625_v40, %v4097_v31 }
 0x222   : > { %v2397_v26 = vpop.f32.mrf.mxu0  ;;  %v2510_v39 = vpop.f32.mrf.mxu1 }
 0x223   : > { %v7803_v25 = vadd.f32 %v2397_v26, %v7511_v8  ;;  %v7806_v24 = vadd.f32 %v2510_v39, %v7514_v20  ;;  %v4101_v8 = vsel %vm6310_vm7, %v4099_v37, %v4100_v32  ;;  %v5606_v20 = vld [vmem:[%s6065_s11 + $0x30] sm:$0xe]  ;;  %v4104_v39 = vrot.slane %v5607_v44, 5 }
 0x224   : > { %v2795_v42 = vpop.f32.mrf.mxu0  ;;  %v2908_v13 = vpop.f32.mrf.mxu1  ;;  %5642 = vmatmul.mubr.msk.bf16.vlgmr.msra.gmra.mxu0 %vm527_vm3, %v5633_v45  ;;  %5651 = vmatmul.mubr.msk.bf16.vlgmr.msra.gmra.mxu1 %vm527_vm3, %v5633_v45  ;;  %v5634_v45 = vcombine.low %v4098_v27, %v4101_v8  ;;  %v5626_v40 = vrot.slane %v5606_v20, 9  ;;  %v4107_v44 = vrot.slane %v5608_v16, 5 }
 0x225   : > { %9009 = vst [vmem:[#allocation3_spill] sm:$0xff] %v7803_v25  ;;  %9010 = vst [vmem:[#allocation25_spill] sm:$0xff] %v7806_v24  ;;  %v7813_v5 = vadd.f32 %v2795_v42, %v7522_v58  ;;  %v7816_v54 = vadd.f32 %v2908_v13, %v7525_v43  ;;  %4266 = vmatprep.mubr.bf16.mxu0 %v8801_v12  ;;  %4379 = vmatprep.mubr.bf16.mxu1 %v8801_v12  ;;  %v9011_v58 = vld [vmem:[#allocation4_spill] sm:$0xff]  ;;  %v4106_v32 = vrot.slane %v4104_v39, 4 }
 0x226   : > { %v2797_v26 = vpop.f32.mrf.mxu0  ;;  %v2910_v11 = vpop.f32.mrf.mxu1  ;;  %v9027_v25 = vld [vmem:[#allocation12_spill] sm:$0xff] }
 0x227   : > { %v7825_v31 = vadd.f32 %v2797_v26, %v7530_v7  ;;  %v7828_v41 = vadd.f32 %v2910_v11, %v9011_v58  ;;  %v5610_v7 = vld [vmem:[%s6065_s11 + $0x40] sm:$0xf] }
 0x228   : > { %v2799_v43 = vpop.f32.mrf.mxu0  ;;  %v2912_v9 = vpop.f32.mrf.mxu1 }
 0x229   : > { %v7831_v42 = vadd.f32 %v2799_v43, %v7538_v63  ;;  %v7834_v37 = vadd.f32 %v2912_v9, %v7541_v17  ;;  %v4105_v63 = vsel %vm6310_vm7, %v5626_v40, %v4104_v39  ;;  %v5611_v43 = vld [vmem:[%s6065_s11 + $0x44] sm:$0x1] }
 0x22a   : > { %v2801_v13 = vpop.f32.mrf.mxu0  ;;  %v2914_v24 = vpop.f32.mrf.mxu1 }
 0x22b   : > { %v7838_v26 = vadd.f32 %v2801_v13, %v7547_v46  ;;  %v7841_v11 = vadd.f32 %v2914_v24, %v7550_v0  ;;  %v4108_v46 = vsel %vm6310_vm7, %v4106_v32, %v4107_v44  ;;  %v5609_v0 = vld [vmem:[%s6065_s11 + $0x3c] sm:$0xe]  ;;  %v4111_v24 = vrot.slane %v5610_v7, 5 }
 0x22c   : > { %v2805_v27 = vpop.f32.mrf.mxu0  ;;  %v2918_v8 = vpop.f32.mrf.mxu1  ;;  %5643 = vmatmul.mubr.msk.bf16.gmra.mxu0 %vm527_vm3, %v5634_v45  ;;  %5652 = vmatmul.mubr.msk.bf16.gmra.mxu1 %vm527_vm3, %v5634_v45  ;;  %v5635_v45 = vcombine.low %v4105_v63, %v4108_v46  ;;  %v5627_v40 = vrot.slane %v5609_v0, 9  ;;  %v4114_v7 = vrot.slane %v5611_v43, 5 }
 0x22d   : > { %9012 = vst [vmem:[#allocation26_spill] sm:$0xff] %v7838_v26  ;;  %9013 = vst [vmem:[#allocation27_spill] sm:$0xff] %v7841_v11  ;;  %v7848_v17 = vadd.f32 %v2805_v27, %v7560_v62  ;;  %v7851_v20 = vadd.f32 %v2918_v8, %v7563_v30  ;;  %4276 = vmatprep.mubr.bf16.mxu0 %v8801_v12  ;;  %4389 = vmatprep.mubr.bf16.mxu1 %v8801_v12  ;;  %v4113_v44 = vrot.slane %v4111_v24, 4 }
 0x22e   : > { %v2807_v16 = vpop.f32.mrf.mxu0  ;;  %v2920_v58 = vpop.f32.mrf.mxu1  ;;  %v4112_v46 = vsel %vm6310_vm7, %v5627_v40, %v4111_v24 }
 0x22f   : > { %v7860_v39 = vadd.f32 %v2807_v16, %v7572_v18  ;;  %v7863_v62 = vadd.f32 %v2920_v58, %v7575_v52  ;;  %v5613_v18 = vld [vmem:[%s6065_s11 + $0x4c] sm:$0xf]  ;;  %v4115_v0 = vsel %vm6310_vm7, %v4113_v44, %v4114_v7  ;;  %v5612_v58 = vld [vmem:[%s6065_s11 + $0x48] sm:$0xe]  ;;  %v5901_v44 = vld [vmem:[%s8761_s3 + $0xb8] sm:$0xff]  }
 0x230   : > { %v2809_v30 = vpop.f32.mrf.mxu0  ;;  %v2922_v9 = vpop.f32.mrf.mxu1  ;;  %v4118_v43 = vrot.slane %v5613_v18, 5  ;;  %v5628_v18 = vrot.slane %v5612_v58, 9  ;;  %v9018_v58 = vld [vmem:[#allocation38_spill] sm:$0xff] }
 0x231   : > { %v7866_v13 = vadd.f32 %v2809_v30, %v7580_v14  ;;  %v7869_v32 = vadd.f32 %v2922_v9, %v7583_v61  ;;  %v5898_v14 = vld [vmem:[%s8761_s3 + $0x78] sm:$0xff]   ;;  %v5614_v9 = vld [vmem:[%s6065_s11 + $0x50] sm:$0x1] }
 0x232   : > { %v2811_v27 = vpop.f32.mrf.mxu0  ;;  %v2924_v8 = vpop.f32.mrf.mxu1  ;;  %v5899_v30 = vld [vmem:[%s8761_s3 + $0x38] sm:$0xff]   ;;  %5694 = vmatprep.subr.bf16.mxu0 %v5898_v14  ;;  %v4120_v14 = vrot.slane %v4118_v43, 4 }
 0x233   : > { %v7873_v16 = vadd.f32 %v2811_v27, %v7587_v34  ;;  %v7876_v52 = vadd.f32 %v2924_v8, %v7590_v47  ;;  %5695 = vmatpush3.bf16.msra.mxu0 %v5899_v30  ;;  %v5636_v8 = vcombine.low %v4112_v46, %v4115_v0  ;;  %v4119_v0 = vsel %vm6310_vm7, %v5628_v18, %v4118_v43  ;;  %v5904_v43 = vld [vmem:[%s8761_s3 + $0xf0] sm:$0xff]  }
 0x234   : > { %v2815_v63 = vpop.f32.mrf.mxu0  ;;  %v2928_v61 = vpop.f32.mrf.mxu1  ;;  %5644 = vmatmul.mubr.msk.bf16.gmra.mxu0 %vm527_vm3, %v5635_v45  ;;  %5653 = vmatmul.mubr.msk.bf16.gmra.mxu1 %vm527_vm3, %v5635_v45 }
 0x235   : > { %9014 = vst [vmem:[#allocation28_spill] sm:$0xff] %v7873_v16  ;;  %9015 = vst [vmem:[#allocation29_spill] sm:$0xff] %v7876_v52  ;;  %v7886_v34 = vadd.f32 %v2815_v63, %v7598_v29  ;;  %v7889_v47 = vadd.f32 %v2928_v61, %v7601_v6  ;;  %4286 = vmatprep.mubr.bf16.mxu0 %v8801_v12  ;;  %4399 = vmatprep.mubr.bf16.mxu1 %v8801_v12  ;;  %v5900_v29 = vld [vmem:[%s8761_s3 + $0xf8] sm:$0xff]   ;;  %v4121_v61 = vrot.slane %v5614_v9, 5  ;;  %v9019_v9 = vld [vmem:[#allocation6_spill] sm:$0xff] }
 0x236   : > { %v2817_v24 = vpop.f32.mrf.mxu0  ;;  %v2930_v6 = vpop.f32.mrf.mxu1  ;;  %5758 = vmatprep.subr.bf16.mxu1 %v5900_v29  ;;  %v5616_v29 = vld [vmem:[%s6065_s11 + $0x58] sm:$0xf] }
 0x237   : > { %v7904_v45 = vadd.f32 %v2817_v24, %v7608_v49  ;;  %v7907_v40 = vadd.f32 %v2930_v6, %v7611_v1  ;;  %5759 = vmatpush3.bf16.msra.mxu1 %v5901_v44  ;;  %v4122_v44 = vsel %vm6310_vm7, %v4120_v14, %v4121_v61  ;;  %v5905_v61 = vld [vmem:[%s8761_s3 + $0xb0] sm:$0xff]   ;;  %v9023_v52 = vld [vmem:[#allocation9_spill] sm:$0xff] }
 0x238   : > { %v2819_v7 = vpop.f32.mrf.mxu0  ;;  %v2932_v27 = vpop.f32.mrf.mxu1  ;;  %5760 = vmatprep.subr.bf16.mxu1 %v5904_v43  ;;  %v5619_v43 = vld [vmem:[%s6065_s11 + $0x64] sm:$0xf] }
 0x239   : > { %v7913_v63 = vadd.f32 %v2819_v7, %v7617_v28  ;;  %v7916_v49 = vadd.f32 %v2932_v27, %v7620_v15  ;;  %v5902_v28 = vld [vmem:[%s8761_s3 + $0x70] sm:$0xff]   ;;  %v4125_v27 = vrot.slane %v5616_v29, 5 }
 0x23a   : > { %v2821_v1 = vpop.f32.mrf.mxu0  ;;  %v2934_v30 = vpop.f32.mrf.mxu1  ;;  %v5615_v7 = vld [vmem:[%s6065_s11 + $0x54] sm:$0xe]  ;;  %5696 = vmatprep.subr.bf16.mxu0 %v5902_v28  ;;  %v9024_v28 = vld [vmem:[#allocation10_spill] sm:$0xff] }
 0x23b   : > { %v7920_v24 = vadd.f32 %v2821_v1, %v7630_v22  ;;  %v7923_v6 = vadd.f32 %v2934_v30, %v7633_v33  ;;  %v5617_v30 = vld [vmem:[%s6065_s11 + $0x5c] sm:$0x1]  ;;  %5761 = vmatpush3.bf16.msra.mxu1 %v5905_v61 }
 0x23c   : > { %v2825_v46 = vpop.f32.mrf.mxu0  ;;  %v2938_v15 = vpop.f32.mrf.mxu1  ;;  %5645 = vmatmul.mubr.msk.bf16.gmra.mxu0 %vm527_vm3, %v5636_v8  ;;  %5654 = vmatmul.mubr.msk.bf16.gmra.mxu1 %vm527_vm3, %v5636_v8  ;;  %v5903_v8 = vld [vmem:[%s8761_s3 + $0x30] sm:$0xff]   ;;  %v4128_v11 = vrot.slane %v5617_v30, 5  ;;  %v9029_v30 = vld [vmem:[#allocation13_spill] sm:$0xff] }
 0x23d   : > { %9016 = vst [vmem:[#allocation30_spill] sm:$0xff] %v7920_v24  ;;  %9017 = vst [vmem:[#allocation31_spill] sm:$0xff] %v7923_v6  ;;  %v7933_v22 = vadd.f32 %v2825_v46, %v9018_v58  ;;  %v7936_v33 = vadd.f32 %v2938_v15, %v9019_v9  ;;  %4296 = vmatprep.mubr.bf16.mxu0 %v8801_v12  ;;  %4409 = vmatprep.mubr.bf16.mxu1 %v8801_v12  ;;  %v9020_v46 = vld [vmem:[#allocation7_spill] sm:$0xff]  ;;  %v9021_v58 = vld [vmem:[#allocation8_spill] sm:$0xff]  ;;  %v5629_v24 = vrot.slane %v5615_v7, 9 }
 0x23e   : > { %v2827_v18 = vpop.f32.mrf.mxu0  ;;  %v2940_v1 = vpop.f32.mrf.mxu1  ;;  %5697 = vmatpush3.bf16.msra.mxu0 %v5903_v8  ;;  %v5637_v6 = vcombine.low %v4119_v0, %v4122_v44 }
 0x23f   : > { %v7951_v15 = vadd.f32 %v2827_v18, %v9020_v46  ;;  %v7954_v14 = vadd.f32 %v2940_v1, %v9021_v58  ;;  %v4127_v46 = vrot.slane %v4125_v27, 4  ;;  %v9025_v58 = vld [vmem:[#allocation11_spill] sm:$0xff]  ;;  %v4126_v7 = vsel %vm6310_vm7, %v5629_v24, %v4125_v27 }
 0x240   : > { %v2829_v29 = vpop.f32.mrf.mxu0  ;;  %v2942_v9 = vpop.f32.mrf.mxu1  ;;  %v5908_v24 = vld [vmem:[%s8761_s3 + $0xe8] sm:$0xff]  }
 0x241   : > { %9022 = vst [vmem:[#allocation32_spill] sm:$0xff] %v7954_v14  ;;  %v7960_v16 = vadd.f32 %v2829_v29, %v9023_v52  ;;  %v7963_v18 = vadd.f32 %v2942_v9, %v9024_v28  ;;  %v5906_v52 = vld [vmem:[%s8761_s3 + $0x68] sm:$0xff]   ;;  %v9030_v29 = vld [vmem:[#allocation14_spill] sm:$0xff]  ;;  %v4129_v9 = vsel %vm6310_vm7, %v4127_v46, %v4128_v11  ;;  %5762 = vmatprep.subr.bf16.mxu1 %v5908_v24  ;;  %v5622_v24 = vld [vmem:[%s6065_s11 + $0x70] sm:$0xf] }
 0x242   : > { %v2831_v1 = vpop.f32.mrf.mxu0  ;;  %v2944_v8 = vpop.f32.mrf.mxu1  ;;  %v5618_v28 = vld [vmem:[%s6065_s11 + $0x60] sm:$0xe]  ;;  %5698 = vmatprep.subr.bf16.mxu0 %v5906_v52  ;;  %v5909_v46 = vld [vmem:[%s8761_s3 + $0xa8] sm:$0xff]  }
 0x243   : > { %v7967_v26 = vadd.f32 %v2831_v1, %v9025_v58  ;;  %v7970_v14 = vadd.f32 %v2944_v8, %v9027_v25  ;;  %v4132_v1 = vrot.slane %v5619_v43, 5  ;;  %v5620_v58 = vld [vmem:[%s6065_s11 + $0x68] sm:$0x1]  ;;  %5763 = vmatpush3.bf16.msra.mxu1 %v5909_v46  ;;  %v5621_v46 = vld [vmem:[%s6065_s11 + $0x6c] sm:$0xe] }
 0x244   : > { %v2835_v0 = vpop.f32.mrf.mxu0  ;;  %v2948_v44 = vpop.f32.mrf.mxu1  ;;  %5646 = vmatmul.mubr.msk.bf16.gmra.mxu0 %vm527_vm3, %v5637_v6  ;;  %5655 = vmatmul.mubr.msk.bf16.gmra.mxu1 %vm527_vm3, %v5637_v6  ;;  %v5907_v6 = vld [vmem:[%s8761_s3 + $0x28] sm:$0xff]  }
 0x245   : > { %9026 = vst [vmem:[#allocation33_spill] sm:$0xff] %v7967_v26  ;;  %9028 = vst [vmem:[#allocation34_spill] sm:$0xff] %v7970_v14  ;;  %v7980_v61 = vadd.f32 %v2835_v0, %v9029_v30  ;;  %v7983_v25 = vadd.f32 %v2948_v44, %v9030_v29  ;;  %4306 = vmatprep.mubr.bf16.mxu0 %v8801_v12  ;;  %4419 = vmatprep.mubr.bf16.mxu1 %v8801_v12  ;;  %v9031_v0 = vld [vmem:[#allocation15_spill] sm:$0xff]  ;;  %v5630_v14 = vrot.slane %v5618_v28, 9 }
 0x246   : > { %v2837_v27 = vpop.f32.mrf.mxu0  ;;  %v2950_v8 = vpop.f32.mrf.mxu1  ;;  %5699 = vmatpush3.bf16.msra.mxu0 %v5907_v6  ;;  %v5638_v29 = vcombine.low %v4126_v7, %v4129_v9  ;;  %v5910_v7 = vld [vmem:[%s8761_s3 + $0x60] sm:$0xff]  }
 0x247   : > { %v7998_v44 = vadd.f32 %v2837_v27, %v9031_v0  ;;  %v8001_v11 = vadd.f32 %v2950_v8, %v7689_v19  ;;  %v4134_v27 = vrot.slane %v4132_v1, 4  ;;  %v4135_v0 = vrot.slane %v5620_v58, 5  ;;  %5700 = vmatprep.subr.bf16.mxu0 %v5910_v7 }
 0x248   : > { %v2839_v43 = vpop.f32.mrf.mxu0  ;;  %v2952_v30 = vpop.f32.mrf.mxu1 }
 0x249   : > { %v8007_v26 = vadd.f32 %v2839_v43, %v7692_v10  ;;  %v8010_v52 = vadd.f32 %v2952_v30, %v7695_v38  ;;  %v4133_v38 = vsel %vm6310_vm7, %v5630_v14, %v4132_v1  ;;  %v4136_v58 = vsel %vm6310_vm7, %v4134_v27, %v4135_v0  ;;  %v5911_v30 = vld [vmem:[%s8761_s3 + $0x20] sm:$0xff]   ;;  %v5623_v1 = vld [vmem:[%s6065_s11 + $0x74] sm:$0x1]  ;;  %s258_s11 = sadd.s32 %s5263_s28, %s9166_s27 }
 0x24a   : > { %v8012_v19 = vpop.f32.mrf.mxu0  ;;  %v8014_v6 = vpop.f32.mrf.mxu1  ;;  %v4139_v43 = vrot.slane %v5622_v24, 5  ;;  %5701 = vmatpush3.bf16.msra.mxu0 %v5911_v30  ;;  %v5913_v27 = vld [vmem:[%s8761_s3 + $0xa0] sm:$0xff]   ;;  %s5264_s6 = sshll.u32 %s258_s11, 3 }
 0x24b   : > { %s8710_s19 = scalar_lea.vmem %s8763_s5, %s5264_s6 }
 0x24c   : > { %v2845_v9 = vpop.f32.mrf.mxu0  ;;  %v2958_v10 = vpop.f32.mrf.mxu1  ;;  %5647 = vmatmul.mubr.msk.bf16.gmra.mxu0 %vm527_vm3, %v5638_v29  ;;  %5656 = vmatmul.mubr.msk.bf16.gmra.mxu1 %vm527_vm3, %v5638_v29 }
 0x24d   : > { %v8025_v28 = vadd.f32 %v2845_v9, %v7712_v60  ;;  %v8028_v8 = vadd.f32 %v2958_v10, %v7715_v56  ;;  %4316 = vmatprep.mubr.bf16.mxu0 %v8801_v12  ;;  %4429 = vmatprep.mubr.bf16.mxu1 %v8801_v12  ;;  %v5912_v60 = vld [vmem:[%s8761_s3 + $0xe0] sm:$0xff]   ;;  %v5639_v10 = vcombine.low %v4133_v38, %v4136_v58 }
 0x24e   : > { %v2847_v14 = vpop.f32.mrf.mxu0  ;;  %v2960_v56 = vpop.f32.mrf.mxu1  ;;  %5764 = vmatprep.subr.bf16.mxu1 %v5912_v60  ;;  %v5914_v60 = vld [vmem:[%s8761_s3 + $0x58] sm:$0xff]  }
 0x24f   : > { %9032 = vst [vmem:[#allocation35_spill] sm:$0xff] %v8025_v28  ;;  %9033 = vst [vmem:[#allocation5_spill] sm:$0xff] %v8028_v8  ;;  %v8043_v29 = vadd.f32 %v2847_v14, %v7720_v4  ;;  %v8046_v9 = vadd.f32 %v2960_v56, %v7723_v2  ;;  %v5631_v8 = vrot.slane %v5621_v46, 9  ;;  %v4141_v4 = vrot.slane %v4139_v43, 4  ;;  %5765 = vmatpush3.bf16.msra.mxu1 %v5913_v27 }
 0x250   : > { %v2849_v0 = vpop.f32.mrf.mxu0  ;;  %v2962_v24 = vpop.f32.mrf.mxu1  ;;  %v4142_v14 = vrot.slane %v5623_v1, 5  ;;  %v5915_v1 = vld [vmem:[%s8761_s3 + $0x18] sm:$0xff]   ;;  %5702 = vmatprep.subr.bf16.mxu0 %v5914_v60 }
 0x251   : > { %v8052_v28 = vadd.f32 %v2849_v0, %v7726_v59  ;;  %v8055_v7 = vadd.f32 %v2962_v24, %v7729_v48  ;;  %v4140_v59 = vsel %vm6310_vm7, %v5631_v8, %v4139_v43  ;;  %v5916_v8 = vld [vmem:[%s8761_s3 + $0xd8] sm:$0xff]   ;;  %5703 = vmatpush3.bf16.msra.mxu0 %v5915_v1 }
 0x252   : > { %v8057_v2 = vpop.f32.mrf.mxu0  ;;  %v8059_v30 = vpop.f32.mrf.mxu1  ;;  %v4143_v46 = vsel %vm6310_vm7, %v4141_v4, %v4142_v14  ;;  %5766 = vmatprep.subr.bf16.mxu1 %v5916_v8  ;;  %v5919_v8 = vld [vmem:[%s8761_s3 + $0x10] sm:$0xff]  }
 0x254   : > { %v2855_v56 = vpop.f32.mrf.mxu0  ;;  %v2968_v38 = vpop.f32.mrf.mxu1  ;;  %5648 = vmatmul.mubr.msk.bf16.gmra.mxu0 %vm527_vm3, %v5639_v10  ;;  %5657 = vmatmul.mubr.msk.bf16.gmra.mxu1 %vm527_vm3, %v5639_v10  ;;  %v5640_v10 = vcombine.low %v4140_v59, %v4143_v46 }
 0x255   : > { %v8069_v48 = vadd.f32 %v2855_v56, %v7743_v23  ;;  %v8072_v58 = vadd.f32 %v2968_v38, %v7746_v57  ;;  %4326 = vmatprep.mubr.bf16.mxu0 %v8801_v12  ;;  %4439 = vmatprep.mubr.bf16.mxu1 %v8801_v12  ;;  %v9034_v57 = vld [vmem:[#allocation20_spill] sm:$0xff]  ;;  %v5917_v12 = vld [vmem:[%s8761_s3 + $0x98] sm:$0xff]  }
 0x256   : > { %v2857_v23 = vpop.f32.mrf.mxu0  ;;  %v2970_v43 = vpop.f32.mrf.mxu1  ;;  %5767 = vmatpush3.bf16.msra.mxu1 %v5917_v12  ;;  %v5918_v56 = vld [vmem:[%s8761_s3 + $0x50] sm:$0xff]  }
 0x257   : > { %v8085_v27 = vadd.f32 %v2857_v23, %v9034_v57  ;;  %v8088_v0 = vadd.f32 %v2970_v43, %v7758_v51  ;;  %5704 = vmatprep.subr.bf16.mxu0 %v5918_v56  ;;  %v5920_v23 = vld [vmem:[%s8761_s3 + $0xd0] sm:$0xff]  }
 0x258   : > { %v2859_v36 = vpop.f32.mrf.mxu0  ;;  %v2972_v24 = vpop.f32.mrf.mxu1  ;;  %5705 = vmatpush3.bf16.msra.mxu0 %v5919_v8  ;;  %5768 = vmatprep.subr.bf16.mxu1 %v5920_v23 }
 0x259   : > { %v8094_v4 = vadd.f32 %v2859_v36, %v7761_v55  ;;  %v8097_v14 = vadd.f32 %v2972_v24, %v7764_v35  ;;  %v9035_v55 = vld [vmem:[#allocation23_spill] sm:$0xff]  ;;  %v9036_v35 = vld [vmem:[#allocation24_spill] sm:$0xff] }
 0x25a   : > { %v8099_v60 = vpop.f32.mrf.mxu0  ;;  %v8101_v51 = vpop.f32.mrf.mxu1  ;;  %v5921_v24 = vld [vmem:[%s8761_s3 + $0x90] sm:$0xff]  }
 0x25b   : > { %5769 = vmatpush3.bf16.msra.mxu1 %v5921_v24 }
 0x25c   : > { %v2865_v38 = vpop.f32.mrf.mxu0  ;;  %v2978_v1 = vpop.f32.mrf.mxu1  ;;  %5649 = vmatmul.mubr.msk.bf16.gmra.mxu0 %vm527_vm3, %v5640_v10  ;;  %5658 = vmatmul.mubr.msk.bf16.gmra.mxu1 %vm527_vm3, %v5640_v10 }
 0x25d   : > { %v8109_v59 = vadd.f32 %v2865_v38, %v9035_v55  ;;  %v8112_v46 = vadd.f32 %v2978_v1, %v9036_v35 }
 0x25e   : > { %v2867_v43 = vpop.f32.mrf.mxu0  ;;  %v2980_v57 = vpop.f32.mrf.mxu1 }
 0x25f   : > { %v8121_v12 = vadd.f32 %v2867_v43, %v7790_v3  ;;  %v8124_v36 = vadd.f32 %v2980_v57, %v7793_v53  ;;  %v5922_v53 = vld [vmem:[%s8761_s3 + $0x48] sm:$0xff]  }
 0x260   : > { %v2869_v10 = vpop.f32.mrf.mxu0  ;;  %v2982_v56 = vpop.f32.mrf.mxu1  ;;  %5706 = vmatprep.subr.bf16.mxu0 %v5922_v53 }
 0x261   : > { %v8130_v38 = vadd.f32 %v2869_v10, %v7796_v50  ;;  %v8133_v1 = vadd.f32 %v2982_v56, %v7799_v21 }
 0x262   : > { %v8135_v3 = vpop.f32.mrf.mxu0  ;;  %v8137_v55 = vpop.f32.mrf.mxu1 }
 0x263   : > { %9037 = vst [vmem:[#allocation36_spill] sm:$0xff] %v8133_v1 }
 0x264   : > { %v3198_v35 = vpop.f32.mrf.mxu0  ;;  %v3311_v8 = vpop.f32.mrf.mxu1 }
 0x265   : > { %v8143_v23 = vadd.f32 %v3198_v35, %v7813_v5  ;;  %v8146_v50 = vadd.f32 %v3311_v8, %v7816_v54  ;;  %v5923_v54 = vld [vmem:[%s8761_s3 + $0x8] sm:$0xff]  }
 0x266   : > { %v3200_v21 = vpop.f32.mrf.mxu0  ;;  %v3313_v43 = vpop.f32.mrf.mxu1  ;;  %5707 = vmatpush3.bf16.msra.mxu0 %v5923_v54 }
 0x267   : > { %v8149_v57 = vadd.f32 %v3200_v21, %v7825_v31  ;;  %v8152_v24 = vadd.f32 %v3313_v43, %v7828_v41  ;;  %v5924_v31 = vld [vmem:[%s8761_s3 + $0xc8] sm:$0xff]  }
 0x268   : > { %v3202_v10 = vpop.f32.mrf.mxu0  ;;  %v3315_v56 = vpop.f32.mrf.mxu1  ;;  %5770 = vmatprep.subr.bf16.mxu1 %v5924_v31  ;;  %v5926_v31 = vld [vmem:[%s8761_s3 + $0x40] sm:$0xff]  }
 0x269   : > { %v8155_v1 = vadd.f32 %v3202_v10, %v7831_v42  ;;  %v8158_v5 = vadd.f32 %v3315_v56, %v7834_v37  ;;  %v5925_v42 = vld [vmem:[%s8761_s3 + $0x88] sm:$0xff]   ;;  %5708 = vmatprep.subr.bf16.mxu0 %v5926_v31 }
 0x26a   : > { %v8166_v53 = vpop.f32.mrf.mxu0  ;;  %v8168_v41 = vpop.f32.mrf.mxu1  ;;  %5771 = vmatpush3.bf16.msra.mxu1 %v5925_v42  ;;  %v5927_v42 = vld [vmem:[%s8761_s3] sm:$0xff]  }
 0x26b   : > { %9038 = vst [vmem:[#allocation37_spill] sm:$0xff] %v8166_v53  ;;  %9039 = vst [vmem:[#allocation4_spill] sm:$0xff] %v8168_v41  ;;  %5709 = vmatpush3.bf16.msra.mxu0 %v5927_v42 }
 0x26c   : > { %v3208_v37 = vpop.f32.mrf.mxu0  ;;  %v3321_v35 = vpop.f32.mrf.mxu1 }
 0x26d   : > { %v8174_v8 = vadd.f32 %v3208_v37, %v7848_v17  ;;  %v8177_v21 = vadd.f32 %v3321_v35, %v7851_v20  ;;  %v5928_v17 = vld [vmem:[%s8761_s3 + $0xc0] sm:$0xff]  }
 0x26e   : > { %v3210_v43 = vpop.f32.mrf.mxu0  ;;  %v3323_v10 = vpop.f32.mrf.mxu1  ;;  %5772 = vmatprep.subr.bf16.mxu1 %v5928_v17 }
 0x26f   : > { %v8180_v56 = vadd.f32 %v3210_v43, %v7860_v39  ;;  %v8183_v54 = vadd.f32 %v3323_v10, %v7863_v62  ;;  %v5929_v39 = vld [vmem:[%s8761_s3 + $0x80] sm:$0xff]  }
 0x270   : > { %v3212_v37 = vpop.f32.mrf.mxu0  ;;  %v3325_v20 = vpop.f32.mrf.mxu1  ;;  %5773 = vmatpush3.bf16.msra.mxu1 %v5929_v39 }
 0x271   : > { %9040 = vst [vmem:[#allocation38_spill] sm:$0xff] %v8180_v56  ;;  %9041 = vst [vmem:[#allocation6_spill] sm:$0xff] %v8183_v54  ;;  %v8198_v62 = vadd.f32 %v3212_v37, %v7866_v13  ;;  %v8201_v35 = vadd.f32 %v3325_v20, %v7869_v32 }
 0x272   : > { %v8203_v43 = vpop.f32.mrf.mxu0  ;;  %v8205_v10 = vpop.f32.mrf.mxu1 }
 0x273   : > { %9042 = vst [vmem:[#allocation7_spill] sm:$0xff] %v8203_v43  ;;  %9043 = vst [vmem:[#allocation8_spill] sm:$0xff] %v8205_v10  ;;  %v9053_v43 = vld [vmem:[#allocation17_spill] sm:$0xff] }
 0x274   : > { %v3218_v41 = vpop.f32.mrf.mxu0  ;;  %v3331_v53 = vpop.f32.mrf.mxu1 }
 0x275   : > { %v8208_v54 = vadd.f32 %v3218_v41, %v7886_v34  ;;  %v8211_v56 = vadd.f32 %v3331_v53, %v7889_v47 }
 0x276   : > { %v3220_v13 = vpop.f32.mrf.mxu0  ;;  %v3333_v37 = vpop.f32.mrf.mxu1 }
 0x277   : > { %v8214_v32 = vadd.f32 %v3220_v13, %v7904_v45  ;;  %v8217_v31 = vadd.f32 %v3333_v37, %v7907_v40 }
 0x278   : > { %v3222_v17 = vpop.f32.mrf.mxu0  ;;  %v3335_v20 = vpop.f32.mrf.mxu1 }
 0x279   : > { %v8220_v42 = vadd.f32 %v3222_v17, %v7913_v63  ;;  %v8223_v39 = vadd.f32 %v3335_v20, %v7916_v49  ;;  %v9046_v17 = vld [vmem:[#allocation32_spill] sm:$0xff] }
 0x27a   : > { %v8225_v34 = vpop.f32.mrf.mxu0  ;;  %v8227_v47 = vpop.f32.mrf.mxu1 }
 0x27b   : > { %9044 = vst [vmem:[#allocation9_spill] sm:$0xff] %v8225_v34  ;;  %9045 = vst [vmem:[#allocation10_spill] sm:$0xff] %v8227_v47 }
 0x27c   : > { %v3228_v53 = vpop.f32.mrf.mxu0  ;;  %v3341_v41 = vpop.f32.mrf.mxu1 }
 0x27d   : > { %v8230_v45 = vadd.f32 %v3228_v53, %v7933_v22  ;;  %v8233_v40 = vadd.f32 %v3341_v41, %v7936_v33 }
 0x27e   : > { %v3230_v13 = vpop.f32.mrf.mxu0  ;;  %v3343_v37 = vpop.f32.mrf.mxu1 }
 0x27f   : > { %v8236_v63 = vadd.f32 %v3230_v13, %v7951_v15  ;;  %v8239_v49 = vadd.f32 %v3343_v37, %v9046_v17 }
 0x280   : > { %v3232_v20 = vpop.f32.mrf.mxu0  ;;  %v3345_v34 = vpop.f32.mrf.mxu1 }
 0x281   : > { %v8242_v47 = vadd.f32 %v3232_v20, %v7960_v16  ;;  %v8245_v10 = vadd.f32 %v3345_v34, %v7963_v18 }
 0x282   : > { %v8247_v22 = vpop.f32.mrf.mxu0  ;;  %v8249_v33 = vpop.f32.mrf.mxu1 }
 0x283   : > { %9047 = vst [vmem:[#allocation11_spill] sm:$0xff] %v8247_v22  ;;  %9048 = vst [vmem:[#allocation12_spill] sm:$0xff] %v8249_v33  ;;  %v9052_v22 = vld [vmem:[#allocation16_spill] sm:$0xff] }
 0x284   : > { %v3238_v53 = vpop.f32.mrf.mxu0  ;;  %v3351_v41 = vpop.f32.mrf.mxu1  ;;  %v3024_v33 = vadd.f32 %v8012_v19, %v9052_v22  ;;  %v9057_v19 = vld [vmem:[#allocation5_spill] sm:$0xff] }
 0x285   : > { %v8252_v15 = vadd.f32 %v3238_v53, %v7980_v61  ;;  %v8255_v13 = vadd.f32 %v3351_v41, %v7983_v25  ;;  %v3026_v61 = vadd.f32 %v8014_v6, %v9053_v43 }
 0x286   : > { %v3240_v37 = vpop.f32.mrf.mxu0  ;;  %v3353_v17 = vpop.f32.mrf.mxu1 }
 0x287   : > { %9049 = vst [vmem:[#allocation13_spill] sm:$0xff] %v8255_v13  ;;  %v8258_v16 = vadd.f32 %v3240_v37, %v7998_v44  ;;  %v8261_v18 = vadd.f32 %v3353_v17, %v8001_v11 }
 0x288   : > { %v3242_v34 = vpop.f32.mrf.mxu0  ;;  %v3355_v20 = vpop.f32.mrf.mxu1 }
 0x289   : > { %9050 = vst [vmem:[#allocation14_spill] sm:$0xff] %v8258_v16  ;;  %9051 = vst [vmem:[#allocation15_spill] sm:$0xff] %v8261_v18  ;;  %v8268_v53 = vadd.f32 %v3242_v34, %v8007_v26  ;;  %v8271_v25 = vadd.f32 %v3355_v20, %v8010_v52  ;;  %v9056_v16 = vld [vmem:[#allocation35_spill] sm:$0xff]  ;;  %v9058_v20 = vld [vmem:[#allocation18_spill] sm:$0xff] }
 0x28a   : > { %v3244_v41 = vpop.f32.mrf.mxu0  ;;  %v3357_v44 = vpop.f32.mrf.mxu1 }
 0x28b   : > { %v8273_v37 = vadd.f32 %v3244_v41, %v3024_v33  ;;  %v8275_v11 = vadd.f32 %v3357_v44, %v3026_v61  ;;  %v3032_v61 = vadd.f32 %v8057_v2, %v9058_v20  ;;  %v9059_v41 = vld [vmem:[#allocation19_spill] sm:$0xff] }
 0x28c   : > { %v3248_v17 = vpop.f32.mrf.mxu0  ;;  %v3361_v18 = vpop.f32.mrf.mxu1 }
 0x28d   : > { %9054 = vst [vmem:[#allocation20_spill] sm:$0xff] %v8273_v37  ;;  %9055 = vst [vmem:[#allocation23_spill] sm:$0xff] %v8275_v11  ;;  %v8278_v13 = vadd.f32 %v3248_v17, %v9056_v16  ;;  %v8281_v22 = vadd.f32 %v3361_v18, %v9057_v19  ;;  %v3034_v16 = vadd.f32 %v8059_v30, %v9059_v41 }
 0x28e   : > { %v3250_v6 = vpop.f32.mrf.mxu0  ;;  %v3363_v26 = vpop.f32.mrf.mxu1 }
 0x28f   : > { %v8284_v43 = vadd.f32 %v3250_v6, %v8043_v29  ;;  %v8287_v52 = vadd.f32 %v3363_v26, %v8046_v9 }
 0x290   : > { %v3252_v33 = vpop.f32.mrf.mxu0  ;;  %v3365_v34 = vpop.f32.mrf.mxu1 }
 0x291   : > { %v8294_v44 = vadd.f32 %v3252_v33, %v8052_v28  ;;  %v8297_v18 = vadd.f32 %v3365_v34, %v8055_v7 }
 0x292   : > { %v3254_v17 = vpop.f32.mrf.mxu0  ;;  %v3367_v29 = vpop.f32.mrf.mxu1 }
 0x293   : > { %v8299_v19 = vadd.f32 %v3254_v17, %v3032_v61  ;;  %v8301_v9 = vadd.f32 %v3367_v29, %v3034_v16  ;;  %v9062_v61 = vld [vmem:[#allocation21_spill] sm:$0xff]  ;;  %v9063_v16 = vld [vmem:[#allocation22_spill] sm:$0xff] }
 0x294   : > { %v3258_v6 = vpop.f32.mrf.mxu0  ;;  %v3371_v26 = vpop.f32.mrf.mxu1  ;;  %v3040_v41 = vadd.f32 %v8099_v60, %v9062_v61 }
 0x295   : > { %9060 = vst [vmem:[#allocation24_spill] sm:$0xff] %v8299_v19  ;;  %9061 = vst [vmem:[#allocation32_spill] sm:$0xff] %v8301_v9  ;;  %v8304_v11 = vadd.f32 %v3258_v6, %v8069_v48  ;;  %v8307_v2 = vadd.f32 %v3371_v26, %v8072_v58  ;;  %v3042_v48 = vadd.f32 %v8101_v51, %v9063_v16 }
 0x296   : > { %v3260_v30 = vpop.f32.mrf.mxu0  ;;  %v3373_v28 = vpop.f32.mrf.mxu1 }
 0x297   : > { %v8310_v33 = vadd.f32 %v3260_v30, %v8085_v27  ;;  %v8313_v7 = vadd.f32 %v3373_v28, %v8088_v0 }
 0x298   : > { %v3262_v34 = vpop.f32.mrf.mxu0  ;;  %v3375_v20 = vpop.f32.mrf.mxu1 }
 0x299   : > { %v8320_v17 = vadd.f32 %v3262_v34, %v8094_v4  ;;  %v8323_v58 = vadd.f32 %v3375_v20, %v8097_v14 }
 0x29a   : > { %v3264_v29 = vpop.f32.mrf.mxu0  ;;  %v3377_v27 = vpop.f32.mrf.mxu1 }
 0x29b   : > { %v8325_v6 = vadd.f32 %v3264_v29, %v3040_v41  ;;  %v8327_v0 = vadd.f32 %v3377_v27, %v3042_v48  ;;  %v9066_v41 = vld [vmem:[#allocation3_spill] sm:$0xff]  ;;  %v9067_v48 = vld [vmem:[#allocation25_spill] sm:$0xff] }
 0x29c   : > { %v3268_v26 = vpop.f32.mrf.mxu0  ;;  %v3381_v30 = vpop.f32.mrf.mxu1  ;;  %v3048_v16 = vadd.f32 %v8135_v3, %v9066_v41 }
 0x29d   : > { %9064 = vst [vmem:[#allocation16_spill] sm:$0xff] %v8325_v6  ;;  %9065 = vst [vmem:[#allocation17_spill] sm:$0xff] %v8327_v0  ;;  %v8330_v28 = vadd.f32 %v3268_v26, %v8109_v59  ;;  %v8333_v60 = vadd.f32 %v3381_v30, %v8112_v46  ;;  %v3050_v59 = vadd.f32 %v8137_v55, %v9067_v48  ;;  %v9068_v46 = vld [vmem:[#allocation36_spill] sm:$0xff] }
 0x29e   : > { %v3270_v51 = vpop.f32.mrf.mxu0  ;;  %v3383_v4 = vpop.f32.mrf.mxu1 }
 0x29f   : > { %v8336_v34 = vadd.f32 %v3270_v51, %v8121_v12  ;;  %v8339_v14 = vadd.f32 %v3383_v4, %v8124_v36 }
 0x2a0   : > { %v3272_v20 = vpop.f32.mrf.mxu0  ;;  %v3385_v61 = vpop.f32.mrf.mxu1 }
 0x2a1   : > { %v8346_v29 = vadd.f32 %v3272_v20, %v8130_v38  ;;  %v8349_v27 = vadd.f32 %v3385_v61, %v9068_v46 }
 0x2a2   : > { %v3274_v26 = vpop.f32.mrf.mxu0  ;;  %v3387_v12 = vpop.f32.mrf.mxu1 }
 0x2a3   : > { %v8351_v30 = vadd.f32 %v3274_v26, %v3048_v16  ;;  %v8353_v36 = vadd.f32 %v3387_v12, %v3050_v59 }
 0x2a4   : > { %v3784_v51 = vpop.f32.mrf.mxu0  ;;  %v3897_v4 = vpop.f32.mrf.mxu1 }
 0x2a5   : > { %9069 = vst [vmem:[#allocation35_spill] sm:$0xff] %v8351_v30  ;;  %9070 = vst [vmem:[#allocation5_spill] sm:$0xff] %v8353_v36  ;;  %v8356_v0 = vadd.f32 %v3784_v51, %v8143_v23  ;;  %v8359_v3 = vadd.f32 %v3897_v4, %v8146_v50  ;;  %v9071_v4 = vld [vmem:[#allocation38_spill] sm:$0xff] }
 0x2a6   : > { %v3786_v55 = vpop.f32.mrf.mxu0  ;;  %v3899_v38 = vpop.f32.mrf.mxu1 }
 0x2a7   : > { %v8362_v20 = vadd.f32 %v3786_v55, %v8149_v57  ;;  %v8365_v61 = vadd.f32 %v3899_v38, %v8152_v24  ;;  %v9072_v55 = vld [vmem:[#allocation6_spill] sm:$0xff] }
 0x2a8   : > { %v3788_v41 = vpop.f32.mrf.mxu0  ;;  %v3901_v16 = vpop.f32.mrf.mxu1 }
 0x2a9   : > { %v8368_v48 = vadd.f32 %v3788_v41, %v8155_v1  ;;  %v8371_v59 = vadd.f32 %v3901_v16, %v8158_v5 }
 0x2aa   : > { %v8373_v23 = vpop.f32.mrf.mxu0  ;;  %v8375_v50 = vpop.f32.mrf.mxu1 }
 0x2ac   : > { %v3794_v46 = vpop.f32.mrf.mxu0  ;;  %v3907_v26 = vpop.f32.mrf.mxu1 }
 0x2ad   : > { %v8378_v57 = vadd.f32 %v3794_v46, %v8174_v8  ;;  %v8381_v24 = vadd.f32 %v3907_v26, %v8177_v21 }
 0x2ae   : > { %v3796_v12 = vpop.f32.mrf.mxu0  ;;  %v3909_v51 = vpop.f32.mrf.mxu1 }
 0x2af   : > { %v8384_v1 = vadd.f32 %v3796_v12, %v9071_v4  ;;  %v8387_v5 = vadd.f32 %v3909_v51, %v9072_v55 }
 0x2b0   : > { %v3798_v38 = vpop.f32.mrf.mxu0  ;;  %v3911_v41 = vpop.f32.mrf.mxu1 }
 0x2b1   : > { %v8390_v16 = vadd.f32 %v3798_v38, %v8198_v62  ;;  %v8393_v36 = vadd.f32 %v3911_v41, %v8201_v35 }
 0x2b2   : > { %v8395_v8 = vpop.f32.mrf.mxu0  ;;  %v8397_v21 = vpop.f32.mrf.mxu1 }
 0x2b4   : > { %v3804_v46 = vpop.f32.mrf.mxu0  ;;  %v3917_v26 = vpop.f32.mrf.mxu1 }
 0x2b5   : > { %v8400_v12 = vadd.f32 %v3804_v46, %v8208_v54  ;;  %v8403_v51 = vadd.f32 %v3917_v26, %v8211_v56 }
 0x2b6   : > { %v3806_v4 = vpop.f32.mrf.mxu0  ;;  %v3919_v55 = vpop.f32.mrf.mxu1 }
 0x2b7   : > { %v8406_v62 = vadd.f32 %v3806_v4, %v8214_v32  ;;  %v8409_v35 = vadd.f32 %v3919_v55, %v8217_v31 }
 0x2b8   : > { %v3808_v38 = vpop.f32.mrf.mxu0  ;;  %v3921_v41 = vpop.f32.mrf.mxu1 }
 0x2b9   : > { %v8412_v30 = vadd.f32 %v3808_v38, %v8220_v42  ;;  %v8415_v6 = vadd.f32 %v3921_v41, %v8223_v39 }
 0x2ba   : > { %v8417_v54 = vpop.f32.mrf.mxu0  ;;  %v8419_v56 = vpop.f32.mrf.mxu1 }
 0x2bc   : > { %v3814_v46 = vpop.f32.mrf.mxu0  ;;  %v3927_v26 = vpop.f32.mrf.mxu1 }
 0x2bd   : > { %v8422_v32 = vadd.f32 %v3814_v46, %v8230_v45  ;;  %v8425_v31 = vadd.f32 %v3927_v26, %v8233_v40 }
 0x2be   : > { %v3816_v4 = vpop.f32.mrf.mxu0  ;;  %v3929_v55 = vpop.f32.mrf.mxu1 }
 0x2bf   : > { %v8428_v42 = vadd.f32 %v3816_v4, %v8236_v63  ;;  %v8431_v39 = vadd.f32 %v3929_v55, %v8239_v49  ;;  %v9077_v4 = vld [vmem:[#allocation13_spill] sm:$0xff] }
 0x2c0   : > { %v3818_v38 = vpop.f32.mrf.mxu0  ;;  %v3931_v41 = vpop.f32.mrf.mxu1 }
 0x2c1   : > { %9073 = vst [vmem:[#allocation18_spill] sm:$0xff] %v8428_v42  ;;  %9074 = vst [vmem:[#allocation19_spill] sm:$0xff] %v8431_v39  ;;  %v8434_v9 = vadd.f32 %v3818_v38, %v8242_v47  ;;  %v8437_v19 = vadd.f32 %v3931_v41, %v8245_v10  ;;  %v9078_v39 = vld [vmem:[#allocation14_spill] sm:$0xff]  ;;  %v9079_v38 = vld [vmem:[#allocation15_spill] sm:$0xff] }
 0x2c2   : > { %v8439_v45 = vpop.f32.mrf.mxu0  ;;  %v8441_v40 = vpop.f32.mrf.mxu1 }
 0x2c3   : > { %9075 = vst [vmem:[#allocation21_spill] sm:$0xff] %v8434_v9  ;;  %9076 = vst [vmem:[#allocation22_spill] sm:$0xff] %v8437_v19 }
 0x2c4   : > { %v3824_v46 = vpop.f32.mrf.mxu0  ;;  %v3937_v26 = vpop.f32.mrf.mxu1 }
 0x2c5   : > { %v8444_v63 = vadd.f32 %v3824_v46, %v8252_v15  ;;  %v8447_v49 = vadd.f32 %v3937_v26, %v9077_v4 }
 0x2c6   : > { %v3826_v55 = vpop.f32.mrf.mxu0  ;;  %v3939_v37 = vpop.f32.mrf.mxu1 }
 0x2c7   : > { %v8450_v47 = vadd.f32 %v3826_v55, %v9078_v39  ;;  %v8453_v10 = vadd.f32 %v3939_v37, %v9079_v38 }
 0x2c8   : > { %v3828_v41 = vpop.f32.mrf.mxu0  ;;  %v3941_v19 = vpop.f32.mrf.mxu1 }
 0x2c9   : > { %v8456_v9 = vadd.f32 %v3828_v41, %v8268_v53  ;;  %v8459_v42 = vadd.f32 %v3941_v19, %v8271_v25 }
 0x2ca   : > { %v8461_v15 = vpop.f32.mrf.mxu0  ;;  %v8463_v46 = vpop.f32.mrf.mxu1 }
 0x2cb   : > { %9080 = vst [vmem:[#allocation3_spill] sm:$0xff] %v8456_v9  ;;  %9081 = vst [vmem:[#allocation25_spill] sm:$0xff] %v8459_v42 }
 0x2cc   : > { %v3834_v26 = vpop.f32.mrf.mxu0  ;;  %v3947_v4 = vpop.f32.mrf.mxu1 }
 0x2cd   : > { %v8466_v39 = vadd.f32 %v3834_v26, %v8278_v13  ;;  %v8469_v37 = vadd.f32 %v3947_v4, %v8281_v22 }
 0x2ce   : > { %v3836_v55 = vpop.f32.mrf.mxu0  ;;  %v3949_v38 = vpop.f32.mrf.mxu1 }
 0x2cf   : > { %v8472_v53 = vadd.f32 %v3836_v55, %v8284_v43  ;;  %v8475_v25 = vadd.f32 %v3949_v38, %v8287_v52 }
 0x2d0   : > { %v3838_v19 = vpop.f32.mrf.mxu0  ;;  %v3951_v41 = vpop.f32.mrf.mxu1 }
 0x2d1   : > { %9082 = vst [vmem:[#allocation36_spill] sm:$0xff] %v8475_v25  ;;  %v8478_v42 = vadd.f32 %v3838_v19, %v8294_v44  ;;  %v8481_v9 = vadd.f32 %v3951_v41, %v8297_v18  ;;  %v9113_v25 = vld [vmem:[#allocation10_spill] sm:$0xff] }
 0x2d2   : > { %v8483_v13 = vpop.f32.mrf.mxu0  ;;  %v8485_v22 = vpop.f32.mrf.mxu1 }
 0x2d3   : > { %9083 = vst [vmem:[#allocation38_spill] sm:$0xff] %v8478_v42  ;;  %9084 = vst [vmem:[#allocation6_spill] sm:$0xff] %v8481_v9 }
 0x2d4   : > { %v3844_v26 = vpop.f32.mrf.mxu0  ;;  %v3957_v4 = vpop.f32.mrf.mxu1 }
 0x2d5   : > { %v8488_v43 = vadd.f32 %v3844_v26, %v8304_v11  ;;  %v8491_v52 = vadd.f32 %v3957_v4, %v8307_v2 }
 0x2d6   : > { %v3846_v55 = vpop.f32.mrf.mxu0  ;;  %v3959_v38 = vpop.f32.mrf.mxu1 }
 0x2d7   : > { %9085 = vst [vmem:[#allocation13_spill] sm:$0xff] %v8488_v43  ;;  %9086 = vst [vmem:[#allocation14_spill] sm:$0xff] %v8491_v52  ;;  %v8494_v44 = vadd.f32 %v3846_v55, %v8310_v33  ;;  %v8497_v18 = vadd.f32 %v3959_v38, %v8313_v7  ;;  %v9107_v43 = vld [vmem:[#allocation7_spill] sm:$0xff] }
 0x2d8   : > { %v3848_v19 = vpop.f32.mrf.mxu0  ;;  %v3961_v41 = vpop.f32.mrf.mxu1 }
 0x2d9   : > { %9087 = vst [vmem:[#allocation15_spill] sm:$0xff] %v8494_v44  ;;  %9088 = vst [vmem:[#allocation39_spill] sm:$0xff] %v8497_v18  ;;  %v8500_v9 = vadd.f32 %v3848_v19, %v8320_v17  ;;  %v8503_v42 = vadd.f32 %v3961_v41, %v8323_v58  ;;  %v9105_v44 = vld [vmem:[#allocation4_spill] sm:$0xff] }
 0x2da   : > { %v8505_v11 = vpop.f32.mrf.mxu0  ;;  %v8507_v2 = vpop.f32.mrf.mxu1 }
 0x2db   : > { %9089 = vst [vmem:[#allocation40_spill] sm:$0xff] %v8500_v9  ;;  %9090 = vst [vmem:[#allocation41_spill] sm:$0xff] %v8503_v42  ;;  %v9097_v42 = vld [vmem:[#allocation2_spill] sm:$0xff] }
 0x2dc   : > { %9091 = vst [vmem:[#allocation42_spill] sm:$0xff] %v8505_v11  ;;  %9092 = vst [vmem:[#allocation43_spill] sm:$0xff] %v8507_v2  ;;  %v3854_v26 = vpop.f32.mrf.mxu0  ;;  %v3967_v4 = vpop.f32.mrf.mxu1  ;;  %v4518_v9 = vsub.s32 0, %v9097_v42  ;;  %v4526_v18 = vsub.s32 2, %v9097_v42  ;;  %v9109_v2 = vld [vmem:[#allocation8_spill] sm:$0xff] }
 0x2dd   : > { %v8510_v33 = vadd.f32 %v3854_v26, %v8330_v28  ;;  %v8513_v7 = vadd.f32 %v3967_v4, %v8333_v60  ;;  %v4522_v4 = vsub.s32 1, %v9097_v42 }
 0x2de   : > { %v3856_v55 = vpop.f32.mrf.mxu0  ;;  %v3969_v38 = vpop.f32.mrf.mxu1 }
 0x2df   : > { %9093 = vst [vmem:[#allocation44_spill] sm:$0xff] %v8510_v33  ;;  %9094 = vst [vmem:[#allocation45_spill] sm:$0xff] %v8513_v7  ;;  %v8516_v17 = vadd.f32 %v3856_v55, %v8336_v34  ;;  %v8519_v58 = vadd.f32 %v3969_v38, %v8339_v14  ;;  %v4514_v34 = vld [vmem:[%s8760_s2] sm:$0xf]  ;;  %v4530_v55 = vsub.s32 3, %v9097_v42  ;;  %v9104_v42 = vld [vmem:[#allocation27_spill] sm:$0xff] }
 0x2e0   : > { %v3858_v19 = vpop.f32.mrf.mxu0  ;;  %v3971_v41 = vpop.f32.mrf.mxu1  ;;  %v9102_v33 = vld [vmem:[#allocation26_spill] sm:$0xff] }
 0x2e1   : > { %9095 = vst [vmem:[#allocation46_spill] sm:$0xff] %v8516_v17  ;;  %9096 = vst [vmem:[#allocation47_spill] sm:$0xff] %v8519_v58  ;;  %v8524_v28 = vadd.f32 %v3858_v19, %v8346_v29  ;;  %v8527_v60 = vadd.f32 %v3971_v41, %v8349_v27  ;;  %v8538_v58 = vrot.slane %v4514_v34, %v4518_v9 }
 0x2e2   : > { %v8532_v26 = vpop.f32.mrf.mxu0  ;;  %v8534_v14 = vpop.f32.mrf.mxu1  ;;  %v8540_v19 = vrot.slane %v4514_v34, %v4526_v18  ;;  %v8546_v7 = vrot.slane %v4514_v34, %v4530_v55  ;;  %v3397_v9 = vadd.f32 %v9105_v44, %v9104_v42  ;;  %v9108_v55 = vld [vmem:[#allocation29_spill] sm:$0xff] }
 0x2e3   : > { %9098 = vst [vmem:[#allocation2_spill] sm:$0xff] %v8524_v28  ;;  %9099 = vst [vmem:[#allocation48_spill] sm:$0xff] %v8527_v60  ;;  %v8544_v28 = vrot.slane %v4514_v34, %v4522_v4  ;;  %v3405_v11 = vadd.f32 %v9109_v2, %v9108_v55  ;;  %v9111_v42 = vld [vmem:[#allocation9_spill] sm:$0xff] }
 0x2e4   : > { %9100 = vst [vmem:[#allocation49_spill] sm:$0xff] %v8532_v26  ;;  %9101 = vst [vmem:[#allocation50_spill] sm:$0xff] %v8534_v14  ;;  %v4258_v38 = vpop.f32.mrf.mxu0  ;;  %v4371_v29 = vpop.f32.mrf.mxu1  ;;  %v9103_v14 = vld [vmem:[#allocation37_spill] sm:$0xff]  ;;  %v3983_v44 = vadd.f32 %v8375_v50, %v3397_v9 }
 0x2e5   : > { %v4450_v27 = vadd.f32 %v4258_v38, %v8356_v0  ;;  %v4452_v41 = vadd.f32 %v4371_v29, %v8359_v3  ;;  %v3395_v26 = vadd.f32 %v9103_v14, %v9102_v33  ;;  %v9106_v29 = vld [vmem:[#allocation28_spill] sm:$0xff] }
 0x2e6   : > { %v4260_v60 = vpop.f32.mrf.mxu0  ;;  %v4373_v17 = vpop.f32.mrf.mxu1  ;;  %v3403_v34 = vadd.f32 %v9107_v43, %v9106_v29  ;;  %v9112_v29 = vld [vmem:[#allocation31_spill] sm:$0xff] }
 0x2e7   : > { %v4451_v52 = vadd.f32 %v4260_v60, %v8362_v20  ;;  %v4453_v18 = vadd.f32 %v4373_v17, %v8365_v61  ;;  %v4536_v0 = vadd.f32 %v8538_v58, %v4450_v27  ;;  %v4538_v3 = vadd.f32 %v8540_v19, %v4452_v41  ;;  %v9110_v41 = vld [vmem:[#allocation30_spill] sm:$0xff] }
 0x2e8   : > { %v4262_v38 = vpop.f32.mrf.mxu0  ;;  %v4375_v4 = vpop.f32.mrf.mxu1  ;;  %v3981_v33 = vadd.f32 %v8373_v23, %v3395_v26  ;;  %v3411_v43 = vadd.f32 %v9111_v42, %v9110_v41  ;;  %v3413_v2 = vadd.f32 %v9113_v25, %v9112_v29 }
 0x2e9   : > { %v4537_v20 = vadd.f32 %v8544_v28, %v4451_v52  ;;  %v4539_v61 = vadd.f32 %v8546_v7, %v4453_v18  ;;  %v4454_v17 = vadd.f32 %v4262_v38, %v8368_v48  ;;  %v4456_v60 = vadd.f32 %v4375_v4, %v8371_v59 }
 0x2ea   : > { %v4264_v14 = vpop.f32.mrf.mxu0  ;;  %v4377_v27 = vpop.f32.mrf.mxu1  ;;  %v4600_v26 = vmax.f32 %v4536_v0, 0.0  ;;  %v4602_v50 = vmax.f32 %v4538_v3, 0.0 }
 0x2eb   : > { %v4455_v55 = vadd.f32 %v4264_v14, %v3981_v33  ;;  %v4457_v23 = vadd.f32 %v4377_v27, %v3983_v44  ;;  %v4540_v52 = vadd.f32 %v8538_v58, %v4454_v17  ;;  %v4542_v9 = vadd.f32 %v8540_v19, %v4456_v60 }
 0x2ec   : > { %v4268_v18 = vpop.f32.mrf.mxu0  ;;  %v4381_v48 = vpop.f32.mrf.mxu1  ;;  %v4601_v42 = vmax.f32 %v4537_v20, 0.0  ;;  %v4603_v25 = vmax.f32 %v4539_v61, 0.0  ;;  %v3989_v20 = vadd.f32 %v8395_v8, %v3403_v34  ;;  %v3991_v61 = vadd.f32 %v8397_v21, %v3405_v11 }
 0x2ed   : > { %v4541_v59 = vadd.f32 %v8544_v28, %v4455_v55  ;;  %v4543_v38 = vadd.f32 %v8546_v7, %v4457_v23  ;;  %v4458_v4 = vadd.f32 %v4268_v18, %v8378_v57  ;;  %v4460_v41 = vadd.f32 %v4381_v48, %v8381_v24 }
 0x2ee   : > { %v4604_v33 = vmax.f32 %v4540_v52, 0.0  ;;  %v4606_v44 = vmax.f32 %v4542_v9, 0.0  ;;  %v4270_v0 = vpop.f32.mrf.mxu0  ;;  %v4383_v3 = vpop.f32.mrf.mxu1  ;;  %v3997_v21 = vadd.f32 %v8417_v54, %v3411_v43 }
 0x2ef   : > { %v4605_v14 = vmax.f32 %v4541_v59, 0.0  ;;  %v4607_v17 = vmax.f32 %v4543_v38, 0.0  ;;  %v4544_v60 = vadd.f32 %v8538_v58, %v4458_v4  ;;  %v4546_v27 = vadd.f32 %v8540_v19, %v4460_v41 }
 0x2f0   : > { %v4664_v29 = vpack.c.bf16 %v4604_v33, %v4600_v26  ;;  %v4666_v55 = vpack.c.bf16 %v4606_v44, %v4602_v50  ;;  %v4459_v23 = vadd.f32 %v4270_v0, %v8384_v1  ;;  %v4461_v57 = vadd.f32 %v4383_v3, %v8387_v5  ;;  %v4272_v18 = vpop.f32.mrf.mxu0  ;;  %v4385_v24 = vpop.f32.mrf.mxu1 }
 0x2f1   : > { %v4462_v52 = vadd.f32 %v4272_v18, %v8390_v16  ;;  %v4464_v9 = vadd.f32 %v4385_v24, %v8393_v36  ;;  %v4665_v38 = vpack.c.bf16 %v4605_v14, %v4601_v42  ;;  %v4667_v1 = vpack.c.bf16 %v4607_v17, %v4603_v25 }
 0x2f2   : > { %v4545_v48 = vadd.f32 %v8544_v28, %v4459_v23  ;;  %v4547_v59 = vadd.f32 %v8546_v7, %v4461_v57  ;;  %v4274_v26 = vpop.f32.mrf.mxu0  ;;  %v4387_v50 = vpop.f32.mrf.mxu1  ;;  %v3999_v16 = vadd.f32 %v8419_v56, %v3413_v2  ;;  %v4608_v11 = vmax.f32 %v4544_v60, 0.0 }
 0x2f3   : > { %v4548_v5 = vadd.f32 %v8538_v58, %v4462_v52  ;;  %v4550_v4 = vadd.f32 %v8540_v19, %v4464_v9  ;;  %v4463_v41 = vadd.f32 %v4274_v26, %v3989_v20  ;;  %v4465_v8 = vadd.f32 %v4387_v50, %v3991_v61  ;;  %4991 = vmatprep.mubr.bf16.mxu0 %v4665_v38  ;;  %v9114_v9 = vld [vmem:[#allocation33_spill] sm:$0xff]  ;;  %v9116_v26 = vld [vmem:[#allocation34_spill] sm:$0xff]  ;;  %v9117_v50 = vld [vmem:[#allocation12_spill] sm:$0xff] }
 0x2f4   : > { %v4610_v36 = vmax.f32 %v4546_v27, 0.0  ;;  %5088 = vmatprep.mubr.bf16.mxu1 %v4667_v1  ;;  %v4278_v34 = vpop.f32.mrf.mxu0  ;;  %v4391_v33 = vpop.f32.mrf.mxu1  ;;  %4992 = vmatmul.mubr.bf16.vlgmr.msra.gmra.mxu0 %v4664_v29  ;;  %v4609_v3 = vmax.f32 %v4545_v48, 0.0  ;;  %v4611_v14 = vmax.f32 %v4547_v59, 0.0  ;;  %v9115_v48 = vld [vmem:[#allocation11_spill] sm:$0xff]  ;;  %v3421_v38 = vadd.f32 %v9117_v50, %v9116_v26 }
 0x2f5   : > { %v4612_v44 = vmax.f32 %v4548_v5, 0.0  ;;  %v4614_v0 = vmax.f32 %v4550_v4, 0.0  ;;  %v4549_v42 = vadd.f32 %v8544_v28, %v4463_v41  ;;  %v4551_v25 = vadd.f32 %v8546_v7, %v4465_v8  ;;  %5089 = vmatmul.mubr.bf16.vlgmr.msra.gmra.mxu1 %v4666_v55 }
 0x2f6   : > { %v4466_v54 = vadd.f32 %v4278_v34, %v8400_v12  ;;  %v4468_v56 = vadd.f32 %v4391_v33, %v8403_v51  ;;  %v4280_v43 = vpop.f32.mrf.mxu0  ;;  %v4393_v2 = vpop.f32.mrf.mxu1  ;;  %v3419_v59 = vadd.f32 %v9115_v48, %v9114_v9 }
 0x2f7   : > { %v4668_v17 = vpack.c.bf16 %v4612_v44, %v4608_v11  ;;  %v4670_v60 = vpack.c.bf16 %v4614_v0, %v4610_v36  ;;  %v4613_v27 = vmax.f32 %v4549_v42, 0.0  ;;  %v4615_v23 = vmax.f32 %v4551_v25, 0.0 }
 0x2f8   : > { %v4552_v57 = vadd.f32 %v8538_v58, %v4466_v54  ;;  %v4554_v18 = vadd.f32 %v8540_v19, %v4468_v56  ;;  %v4467_v24 = vadd.f32 %v4280_v43, %v8406_v62  ;;  %v4469_v29 = vadd.f32 %v4393_v2, %v8409_v35  ;;  %v4282_v55 = vpop.f32.mrf.mxu0  ;;  %v4395_v20 = vpop.f32.mrf.mxu1 }
 0x2f9   : > { %v4470_v12 = vadd.f32 %v4282_v55, %v8412_v30  ;;  %v4472_v51 = vadd.f32 %v4395_v20, %v8415_v6  ;;  %v4669_v61 = vpack.c.bf16 %v4613_v27, %v4609_v3  ;;  %v4671_v52 = vpack.c.bf16 %v4615_v23, %v4611_v14  ;;  %v9120_v20 = vld [vmem:[#allocation21_spill] sm:$0xff] }
 0x2fa   : > { %v4553_v1 = vadd.f32 %v8544_v28, %v4467_v24  ;;  %v4555_v62 = vadd.f32 %v8546_v7, %v4469_v29  ;;  %v4284_v5 = vpop.f32.mrf.mxu0  ;;  %v4397_v35 = vpop.f32.mrf.mxu1  ;;  %v4005_v8 = vadd.f32 %v8439_v45, %v3419_v59  ;;  %v4007_v11 = vadd.f32 %v8441_v40, %v3421_v38 }
 0x2fb   : > { %v4556_v4 = vadd.f32 %v8538_v58, %v4470_v12  ;;  %v4558_v30 = vadd.f32 %v8540_v19, %v4472_v51  ;;  %v4471_v41 = vadd.f32 %v4284_v5, %v3997_v21  ;;  %v4473_v6 = vadd.f32 %v4397_v35, %v3999_v16  ;;  %4999 = vmatprep.mubr.bf16.mxu0 %v4669_v61  ;;  %v9121_v12 = vld [vmem:[#allocation22_spill] sm:$0xff]  ;;  %v9123_v35 = vld [vmem:[#allocation23_spill] sm:$0xff] }
 0x2fc   : > { %v4616_v36 = vmax.f32 %v4552_v57, 0.0  ;;  %v4618_v34 = vmax.f32 %v4554_v18, 0.0  ;;  %5096 = vmatprep.mubr.bf16.mxu1 %v4671_v52  ;;  %v4288_v33 = vpop.f32.mrf.mxu0  ;;  %v4401_v44 = vpop.f32.mrf.mxu1  ;;  %5000 = vmatmul.mubr.bf16.gmra.mxu0 %v4668_v17  ;;  %v4617_v21 = vmax.f32 %v4553_v1, 0.0  ;;  %v4619_v16 = vmax.f32 %v4555_v62, 0.0  ;;  %v9118_v18 = vld [vmem:[#allocation18_spill] sm:$0xff]  ;;  %v9119_v17 = vld [vmem:[#allocation19_spill] sm:$0xff] }
 0x2fd   : > { %v4620_v0 = vmax.f32 %v4556_v4, 0.0  ;;  %v4622_v42 = vmax.f32 %v4558_v30, 0.0  ;;  %v4557_v25 = vadd.f32 %v8544_v28, %v4471_v41  ;;  %v4559_v3 = vadd.f32 %v8546_v7, %v4473_v6  ;;  %5097 = vmatmul.mubr.bf16.gmra.mxu1 %v4670_v60  ;;  %v9122_v62 = vld [vmem:[#allocation20_spill] sm:$0xff] }
 0x2fe   : > { %v4474_v14 = vadd.f32 %v4288_v33, %v8422_v32  ;;  %v4476_v45 = vadd.f32 %v4401_v44, %v8425_v31  ;;  %v4290_v40 = vpop.f32.mrf.mxu0  ;;  %v4403_v54 = vpop.f32.mrf.mxu1  ;;  %v4013_v5 = vadd.f32 %v8461_v15, %v9122_v62  ;;  %v4015_v4 = vadd.f32 %v8463_v46, %v9123_v35 }
 0x2ff   : > { %v4672_v56 = vpack.c.bf16 %v4620_v0, %v4616_v36  ;;  %v4674_v43 = vpack.c.bf16 %v4622_v42, %v4618_v34  ;;  %v4621_v2 = vmax.f32 %v4557_v25, 0.0  ;;  %v4623_v27 = vmax.f32 %v4559_v3, 0.0 }
 0x300   : > { %v4560_v23 = vadd.f32 %v8538_v58, %v4474_v14  ;;  %v4562_v57 = vadd.f32 %v8540_v19, %v4476_v45  ;;  %v4475_v24 = vadd.f32 %v4290_v40, %v9118_v18  ;;  %v4477_v60 = vadd.f32 %v4403_v54, %v9119_v17  ;;  %v4292_v29 = vpop.f32.mrf.mxu0  ;;  %v4405_v55 = vpop.f32.mrf.mxu1 }
 0x301   : > { %v4478_v32 = vadd.f32 %v4292_v29, %v9120_v20  ;;  %v4480_v31 = vadd.f32 %v4405_v55, %v9121_v12  ;;  %v4673_v51 = vpack.c.bf16 %v4621_v2, %v4617_v21  ;;  %v4675_v61 = vpack.c.bf16 %v4623_v27, %v4619_v16  ;;  %v9124_v27 = vld [vmem:[#allocation3_spill] sm:$0xff] }
 0x302   : > { %v4561_v52 = vadd.f32 %v8544_v28, %v4475_v24  ;;  %v4563_v9 = vadd.f32 %v8546_v7, %v4477_v60  ;;  %v4294_v48 = vpop.f32.mrf.mxu0  ;;  %v4407_v59 = vpop.f32.mrf.mxu1  ;;  %v4624_v30 = vmax.f32 %v4560_v23, 0.0  ;;  %v4626_v41 = vmax.f32 %v4562_v57, 0.0  ;;  %v9125_v23 = vld [vmem:[#allocation25_spill] sm:$0xff] }
 0x303   : > { %v4564_v26 = vadd.f32 %v8538_v58, %v4478_v32  ;;  %v4566_v50 = vadd.f32 %v8540_v19, %v4480_v31  ;;  %v4479_v38 = vadd.f32 %v4294_v48, %v4005_v8  ;;  %v4481_v1 = vadd.f32 %v4407_v59, %v4007_v11  ;;  %5007 = vmatprep.mubr.bf16.mxu0 %v4673_v51  ;;  %v9126_v32 = vld [vmem:[#allocation24_spill] sm:$0xff] }
 0x304   : > { %5104 = vmatprep.mubr.bf16.mxu1 %v4675_v61  ;;  %v4298_v6 = vpop.f32.mrf.mxu0  ;;  %v4411_v36 = vpop.f32.mrf.mxu1  ;;  %5008 = vmatmul.mubr.bf16.gmra.mxu0 %v4672_v56  ;;  %v4625_v8 = vmax.f32 %v4561_v52, 0.0  ;;  %v4627_v11 = vmax.f32 %v4563_v9, 0.0  ;;  %v4021_v12 = vadd.f32 %v8483_v13, %v9126_v32  ;;  %v9127_v31 = vld [vmem:[#allocation32_spill] sm:$0xff] }
 0x305   : > { %v4628_v34 = vmax.f32 %v4564_v26, 0.0  ;;  %v4630_v33 = vmax.f32 %v4566_v50, 0.0  ;;  %v4565_v44 = vadd.f32 %v8544_v28, %v4479_v38  ;;  %v4567_v0 = vadd.f32 %v8546_v7, %v4481_v1  ;;  %5105 = vmatmul.mubr.bf16.gmra.mxu1 %v4674_v43 }
 0x306   : > { %v4482_v15 = vadd.f32 %v4298_v6, %v8444_v63  ;;  %v4484_v42 = vadd.f32 %v4411_v36, %v8447_v49  ;;  %v4300_v46 = vpop.f32.mrf.mxu0  ;;  %v4413_v25 = vpop.f32.mrf.mxu1  ;;  %v4023_v51 = vadd.f32 %v8485_v22, %v9127_v31 }
 0x307   : > { %v4676_v3 = vpack.c.bf16 %v4628_v34, %v4624_v30  ;;  %v4678_v21 = vpack.c.bf16 %v4630_v33, %v4626_v41  ;;  %v4629_v16 = vmax.f32 %v4565_v44, 0.0  ;;  %v4631_v14 = vmax.f32 %v4567_v0, 0.0  ;;  %v9128_v44 = vld [vmem:[#allocation36_spill] sm:$0xff] }
 0x308   : > { %v4568_v45 = vadd.f32 %v8538_v58, %v4482_v15  ;;  %v4570_v40 = vadd.f32 %v8540_v19, %v4484_v42  ;;  %v4483_v54 = vadd.f32 %v4300_v46, %v8450_v47  ;;  %v4485_v56 = vadd.f32 %v4413_v25, %v8453_v10  ;;  %v4302_v43 = vpop.f32.mrf.mxu0  ;;  %v4415_v2 = vpop.f32.mrf.mxu1  ;;  %v9129_v15 = vld [vmem:[#allocation38_spill] sm:$0xff] }
 0x309   : > { %v4486_v63 = vadd.f32 %v4302_v43, %v9124_v27  ;;  %v4488_v49 = vadd.f32 %v4415_v2, %v9125_v23  ;;  %v4677_v57 = vpack.c.bf16 %v4629_v16, %v4625_v8  ;;  %v4679_v18 = vpack.c.bf16 %v4631_v14, %v4627_v11  ;;  %v9130_v42 = vld [vmem:[#allocation6_spill] sm:$0xff]  ;;  %v9133_v27 = vld [vmem:[#allocation17_spill] sm:$0xff] }
 0x30a   : > { %v4569_v24 = vadd.f32 %v8544_v28, %v4483_v54  ;;  %v4571_v17 = vadd.f32 %v8546_v7, %v4485_v56  ;;  %v4304_v60 = vpop.f32.mrf.mxu0  ;;  %v4417_v29 = vpop.f32.mrf.mxu1  ;;  %v4632_v61 = vmax.f32 %v4568_v45, 0.0  ;;  %v4634_v52 = vmax.f32 %v4570_v40, 0.0  ;;  %v9131_v56 = vld [vmem:[#allocation16_spill] sm:$0xff]  ;;  %v9132_v43 = vld [vmem:[#allocation42_spill] sm:$0xff] }
 0x30b   : > { %v4572_v55 = vadd.f32 %v8538_v58, %v4486_v63  ;;  %v4574_v47 = vadd.f32 %v8540_v19, %v4488_v49  ;;  %v4487_v20 = vadd.f32 %v4304_v60, %v4013_v5  ;;  %v4489_v10 = vadd.f32 %v4417_v29, %v4015_v4  ;;  %5015 = vmatprep.mubr.bf16.mxu0 %v4677_v57  ;;  %v9134_v63 = vld [vmem:[#allocation43_spill] sm:$0xff] }
 0x30c   : > { %5112 = vmatprep.mubr.bf16.mxu1 %v4679_v18  ;;  %v4308_v9 = vpop.f32.mrf.mxu0  ;;  %v4421_v48 = vpop.f32.mrf.mxu1  ;;  %5016 = vmatmul.mubr.bf16.gmra.mxu0 %v4676_v3  ;;  %v4633_v1 = vmax.f32 %v4569_v24, 0.0  ;;  %v4635_v62 = vmax.f32 %v4571_v17, 0.0  ;;  %v4029_v2 = vadd.f32 %v9132_v43, %v9131_v56  ;;  %v4031_v23 = vadd.f32 %v9134_v63, %v9133_v27  ;;  %v9145_v63 = vld [vmem:[#allocation44_spill] sm:$0xff] }
 0x30d   : > { %v4636_v59 = vmax.f32 %v4572_v55, 0.0  ;;  %v4638_v26 = vmax.f32 %v4574_v47, 0.0  ;;  %v4573_v50 = vadd.f32 %v8544_v28, %v4487_v20  ;;  %v4575_v38 = vadd.f32 %v8546_v7, %v4489_v10  ;;  %5113 = vmatmul.mubr.bf16.gmra.mxu1 %v4678_v21  ;;  %v9135_v10 = vld [vmem:[#allocation13_spill] sm:$0xff] }
 0x30e   : > { %v4490_v13 = vadd.f32 %v4308_v9, %v8466_v39  ;;  %v4492_v5 = vadd.f32 %v4421_v48, %v8469_v37  ;;  %v4310_v22 = vpop.f32.mrf.mxu0  ;;  %v4423_v35 = vpop.f32.mrf.mxu1 }
 0x30f   : > { %v4680_v4 = vpack.c.bf16 %v4636_v59, %v4632_v61  ;;  %v4682_v30 = vpack.c.bf16 %v4638_v26, %v4634_v52  ;;  %v4637_v41 = vmax.f32 %v4573_v50, 0.0  ;;  %v4639_v6 = vmax.f32 %v4575_v38, 0.0  ;;  %v9137_v38 = vld [vmem:[#allocation15_spill] sm:$0xff] }
 0x310   : > { %v4576_v36 = vadd.f32 %v8538_v58, %v4490_v13  ;;  %v4578_v34 = vadd.f32 %v8540_v19, %v4492_v5  ;;  %v4491_v33 = vadd.f32 %v4310_v22, %v8472_v53  ;;  %v4493_v0 = vadd.f32 %v4423_v35, %v9128_v44  ;;  %v4312_v8 = vpop.f32.mrf.mxu0  ;;  %v4425_v11 = vpop.f32.mrf.mxu1  ;;  %v9139_v35 = vld [vmem:[#allocation40_spill] sm:$0xff] }
 0x311   : > { %v4494_v39 = vadd.f32 %v4312_v8, %v9129_v15  ;;  %v4496_v37 = vadd.f32 %v4425_v11, %v9130_v42  ;;  %v4681_v46 = vpack.c.bf16 %v4637_v41, %v4633_v1  ;;  %v4683_v25 = vpack.c.bf16 %v4639_v6, %v4635_v62  ;;  %v9138_v62 = vld [vmem:[#allocation39_spill] sm:$0xff] }
 0x312   : > { %v4577_v3 = vadd.f32 %v8544_v28, %v4491_v33  ;;  %v4579_v21 = vadd.f32 %v8546_v7, %v4493_v0  ;;  %v4314_v16 = vpop.f32.mrf.mxu0  ;;  %v4427_v14 = vpop.f32.mrf.mxu1  ;;  %v4640_v49 = vmax.f32 %v4576_v36, 0.0  ;;  %v4642_v57 = vmax.f32 %v4578_v34, 0.0  ;;  %v9141_v42 = vld [vmem:[#allocation35_spill] sm:$0xff] }
 0x313   : > { %v4580_v45 = vadd.f32 %v8538_v58, %v4494_v39  ;;  %v4582_v53 = vadd.f32 %v8540_v19, %v4496_v37  ;;  %v4495_v40 = vadd.f32 %v4314_v16, %v4021_v12  ;;  %v4497_v54 = vadd.f32 %v4427_v14, %v4023_v51  ;;  %5023 = vmatprep.mubr.bf16.mxu0 %v4681_v46  ;;  %v9136_v12 = vld [vmem:[#allocation14_spill] sm:$0xff]  ;;  %v9142_v37 = vld [vmem:[#allocation49_spill] sm:$0xff] }
 0x314   : > { %5120 = vmatprep.mubr.bf16.mxu1 %v4683_v25  ;;  %v4318_v18 = vpop.f32.mrf.mxu0  ;;  %v4431_v24 = vpop.f32.mrf.mxu1  ;;  %5024 = vmatmul.mubr.bf16.gmra.mxu0 %v4680_v4  ;;  %v4641_v47 = vmax.f32 %v4577_v3, 0.0  ;;  %v4643_v20 = vmax.f32 %v4579_v21, 0.0  ;;  %v4037_v46 = vadd.f32 %v9142_v37, %v9141_v42  ;;  %v9143_v25 = vld [vmem:[#allocation5_spill] sm:$0xff]  ;;  %v9144_v3 = vld [vmem:[#allocation50_spill] sm:$0xff] }
 0x315   : > { %v4644_v17 = vmax.f32 %v4580_v45, 0.0  ;;  %v4646_v60 = vmax.f32 %v4582_v53, 0.0  ;;  %v4581_v29 = vadd.f32 %v8544_v28, %v4495_v40  ;;  %v4583_v55 = vadd.f32 %v8546_v7, %v4497_v54  ;;  %5121 = vmatmul.mubr.bf16.gmra.mxu1 %v4682_v30  ;;  %v9140_v30 = vld [vmem:[#allocation41_spill] sm:$0xff]  ;;  %v8704_v42 = vld [vmem:[%s8762_s4] ss:$0 sm:$0xff] }
 0x316   : > { %v4498_v32 = vadd.f32 %v4318_v18, %v9135_v10  ;;  %v4500_v31 = vadd.f32 %v4431_v24, %v9136_v12  ;;  %v4320_v51 = vpop.f32.mrf.mxu0  ;;  %v4433_v61 = vpop.f32.mrf.mxu1  ;;  %v4039_v21 = vadd.f32 %v9144_v3, %v9143_v25  ;;  %v9147_v10 = vld [vmem:[#allocation46_spill] sm:$0xff]  ;;  %v9148_v12 = vld [vmem:[#allocation47_spill] sm:$0xff] }
 0x317   : > { %v4684_v52 = vpack.c.bf16 %v4644_v17, %v4640_v49  ;;  %v4686_v9 = vpack.c.bf16 %v4646_v60, %v4642_v57  ;;  %v4645_v48 = vmax.f32 %v4581_v29, 0.0  ;;  %v4647_v59 = vmax.f32 %v4583_v55, 0.0  ;;  %v9146_v49 = vld [vmem:[#allocation45_spill] sm:$0xff] }
 0x318   : > { %v4584_v26 = vadd.f32 %v8538_v58, %v4498_v32  ;;  %v4586_v50 = vadd.f32 %v8540_v19, %v4500_v31  ;;  %v4499_v1 = vadd.f32 %v4320_v51, %v9137_v38  ;;  %v4501_v13 = vadd.f32 %v4433_v61, %v9138_v62  ;;  %v4322_v5 = vpop.f32.mrf.mxu0  ;;  %v4435_v22 = vpop.f32.mrf.mxu1 }
 0x319   : > { %v4502_v4 = vadd.f32 %v4322_v5, %v9139_v35  ;;  %v4504_v41 = vadd.f32 %v4435_v22, %v9140_v30  ;;  %v4685_v6 = vpack.c.bf16 %v4645_v48, %v4641_v47  ;;  %v4687_v36 = vpack.c.bf16 %v4647_v59, %v4643_v20  ;;  %v9150_v48 = vld [vmem:[#allocation48_spill] sm:$0xff] }
 0x31a   : > { %v4585_v34 = vadd.f32 %v8544_v28, %v4499_v1  ;;  %v4587_v33 = vadd.f32 %v8546_v7, %v4501_v13  ;;  %v4324_v44 = vpop.f32.mrf.mxu0  ;;  %v4437_v0 = vpop.f32.mrf.mxu1  ;;  %v4648_v16 = vmax.f32 %v4584_v26, 0.0  ;;  %v4650_v14 = vmax.f32 %v4586_v50, 0.0 }
 0x31b   : > { %v4588_v8 = vadd.f32 %v8538_v58, %v4502_v4  ;;  %v4590_v11 = vadd.f32 %v8540_v19, %v4504_v41  ;;  %v4503_v15 = vadd.f32 %v4324_v44, %v4029_v2  ;;  %v4505_v39 = vadd.f32 %v4437_v0, %v4031_v23  ;;  %5031 = vmatprep.mubr.bf16.mxu0 %v4685_v6 }
 0x31c   : > { %5128 = vmatprep.mubr.bf16.mxu1 %v4687_v36  ;;  %v4328_v45 = vpop.f32.mrf.mxu0  ;;  %v4441_v53 = vpop.f32.mrf.mxu1  ;;  %5032 = vmatmul.mubr.bf16.gmra.mxu0 %v4684_v52  ;;  %v4649_v2 = vmax.f32 %v4585_v34, 0.0  ;;  %v4651_v27 = vmax.f32 %v4587_v33, 0.0  ;;  %v9149_v52 = vld [vmem:[#allocation2_spill] sm:$0xff] }
 0x31d   : > { %v4652_v40 = vmax.f32 %v4588_v8, 0.0  ;;  %v4654_v54 = vmax.f32 %v4590_v11, 0.0  ;;  %v4589_v56 = vadd.f32 %v8544_v28, %v4503_v15  ;;  %v4591_v43 = vadd.f32 %v8546_v7, %v4505_v39  ;;  %5129 = vmatmul.mubr.bf16.gmra.mxu1 %v4686_v9 }
 0x31e   : > { %v4506_v23 = vadd.f32 %v4328_v45, %v9145_v63  ;;  %v4508_v57 = vadd.f32 %v4441_v53, %v9146_v49  ;;  %v4330_v18 = vpop.f32.mrf.mxu0  ;;  %v4443_v24 = vpop.f32.mrf.mxu1 }
 0x31f   : > { %v4688_v17 = vpack.c.bf16 %v4652_v40, %v4648_v16  ;;  %v4690_v60 = vpack.c.bf16 %v4654_v54, %v4650_v14  ;;  %v4653_v29 = vmax.f32 %v4589_v56, 0.0  ;;  %v4655_v55 = vmax.f32 %v4591_v43, 0.0 }
 0x320   : > { %v4592_v47 = vadd.f32 %v8538_v58, %v4506_v23  ;;  %v4594_v20 = vadd.f32 %v8540_v19, %v4508_v57  ;;  %v4507_v32 = vadd.f32 %v4330_v18, %v9147_v10  ;;  %v4509_v31 = vadd.f32 %v4443_v24, %v9148_v12  ;;  %v4332_v51 = vpop.f32.mrf.mxu0  ;;  %v4445_v61 = vpop.f32.mrf.mxu1 }
 0x321   : > { %v4510_v9 = vadd.f32 %v4332_v51, %v9149_v52  ;;  %v4512_v59 = vadd.f32 %v4445_v61, %v9150_v48  ;;  %v4689_v26 = vpack.c.bf16 %v4653_v29, %v4649_v2  ;;  %v4691_v50 = vpack.c.bf16 %v4655_v55, %v4651_v27 }
 0x322   : > { %v4593_v38 = vadd.f32 %v8544_v28, %v4507_v32  ;;  %v4595_v1 = vadd.f32 %v8546_v7, %v4509_v31  ;;  %v4334_v62 = vpop.f32.mrf.mxu0  ;;  %v4447_v13 = vpop.f32.mrf.mxu1  ;;  %v4656_v30 = vmax.f32 %v4592_v47, 0.0  ;;  %v4658_v41 = vmax.f32 %v4594_v20, 0.0 }
 0x323   : > { %v4596_v5 = vadd.f32 %v8538_v58, %v4510_v9  ;;  %v4598_v22 = vadd.f32 %v8540_v19, %v4512_v59  ;;  %v4511_v35 = vadd.f32 %v4334_v62, %v4037_v46  ;;  %v4513_v4 = vadd.f32 %v4447_v13, %v4039_v21  ;;  %5039 = vmatprep.mubr.bf16.mxu0 %v4689_v26 }
 0x324   : > { %5136 = vmatprep.mubr.bf16.mxu1 %v4691_v50  ;;  %5040 = vmatmul.mubr.bf16.gmra.mxu0 %v4688_v17  ;;  %v4657_v58 = vmax.f32 %v4593_v38, 0.0  ;;  %v4659_v44 = vmax.f32 %v4595_v1, 0.0 }
 0x325   : > { %v4660_v6 = vmax.f32 %v4596_v5, 0.0  ;;  %v4662_v36 = vmax.f32 %v4598_v22, 0.0  ;;  %v4597_v34 = vadd.f32 %v8544_v28, %v4511_v35  ;;  %v4599_v33 = vadd.f32 %v8546_v7, %v4513_v4  ;;  %5137 = vmatmul.mubr.bf16.gmra.mxu1 %v4690_v60 }
 0x327   : > { %v4692_v19 = vpack.c.bf16 %v4660_v6, %v4656_v30  ;;  %v4694_v0 = vpack.c.bf16 %v4662_v36, %v4658_v41  ;;  %v4661_v8 = vmax.f32 %v4597_v34, 0.0  ;;  %v4663_v11 = vmax.f32 %v4599_v33, 0.0 }
 0x329   : > { %v4693_v15 = vpack.c.bf16 %v4661_v8, %v4657_v58  ;;  %v4695_v39 = vpack.c.bf16 %v4663_v11, %v4659_v44 }
 0x32b   : > { %5047 = vmatprep.mubr.bf16.mxu0 %v4693_v15  ;;  %5144 = vmatprep.mubr.bf16.mxu1 %v4695_v39 }
 0x32c   : > { %5048 = vmatmul.mubr.bf16.gmra.mxu0 %v4692_v19 }
 0x32d   : > { %5145 = vmatmul.mubr.bf16.gmra.mxu1 %v4694_v0 }
 0x3b4   : > { %v5710_v7 = vpop.f32.mrf.mxu0 }
 0x3b5   : > { %v5774_v28 = vpop.f32.mrf.mxu1 }
 0x3b6   : > { %v5711_v37 = vpop.f32.mrf.mxu0 }
 0x3b7   : > { %v5775_v46 = vpop.f32.mrf.mxu1  ;;  %v5712_v25 = vadd.f32 %v5711_v37, %v5710_v7 }
 0x3b8   : > { %v5713_v3 = vpop.f32.mrf.mxu0  ;;  %v5776_v14 = vadd.f32 %v5775_v46, %v5774_v28 }
 0x3b9   : > { %v5777_v21 = vpop.f32.mrf.mxu1  ;;  %v4994_v16 = vadd.f32 %v5712_v25, %v8704_v42 }
 0x3ba   : > { %v5714_v45 = vpop.f32.mrf.mxu0 }
 0x3bb   : > { %v5778_v53 = vpop.f32.mrf.mxu1  ;;  %v5091_v40 = vadd.f32 %v5776_v14, %v4994_v16  ;;  %v5715_v54 = vadd.f32 %v5714_v45, %v5713_v3 }
 0x3bc   : > { %v5716_v56 = vpop.f32.mrf.mxu0  ;;  %v5779_v27 = vadd.f32 %v5778_v53, %v5777_v21 }
 0x3bd   : > { %v5780_v43 = vpop.f32.mrf.mxu1  ;;  %5153 = vst [vmem:[%s8710_s19] sm:$0xff] %v5091_v40  ;;  %v4997_v2 = vadd.f32 %v5715_v54, %v8704_v42 }
 0x3be   : > { %v5717_v63 = vpop.f32.mrf.mxu0 }
 0x3bf   : > { %v5781_v23 = vpop.f32.mrf.mxu1  ;;  %v5094_v49 = vadd.f32 %v5779_v27, %v4997_v2  ;;  %v5718_v57 = vadd.f32 %v5717_v63, %v5716_v56 }
 0x3c0   : > { %v5719_v18 = vpop.f32.mrf.mxu0  ;;  %v5782_v60 = vadd.f32 %v5781_v23, %v5780_v43 }
 0x3c1   : > { %v5783_v24 = vpop.f32.mrf.mxu1  ;;  %5154 = vst [vmem:[%s8710_s19 + $0x8] sm:$0xff] %v5094_v49  ;;  %v5002_v17 = vadd.f32 %v5718_v57, %v8704_v42 }
 0x3c2   : > { %v5720_v29 = vpop.f32.mrf.mxu0 }
 0x3c3   : > { %v5784_v55 = vpop.f32.mrf.mxu1  ;;  %v5099_v47 = vadd.f32 %v5782_v60, %v5002_v17  ;;  %v5721_v20 = vadd.f32 %v5720_v29, %v5719_v18 }
 0x3c4   : > { %v5722_v10 = vpop.f32.mrf.mxu0  ;;  %v5785_v31 = vadd.f32 %v5784_v55, %v5783_v24 }
 0x3c5   : > { %v5786_v32 = vpop.f32.mrf.mxu1  ;;  %5155 = vst [vmem:[%s8710_s19 + $0x10] sm:$0xff] %v5099_v47  ;;  %v5005_v12 = vadd.f32 %v5721_v20, %v8704_v42 }
 0x3c6   : > { %v5723_v51 = vpop.f32.mrf.mxu0 }
 0x3c7   : > { %v5787_v61 = vpop.f32.mrf.mxu1  ;;  %v5102_v52 = vadd.f32 %v5785_v31, %v5005_v12  ;;  %v5724_v9 = vadd.f32 %v5723_v51, %v5722_v10 }
 0x3c8   : > { %v5725_v48 = vpop.f32.mrf.mxu0  ;;  %v5788_v50 = vadd.f32 %v5787_v61, %v5786_v32 }
 0x3c9   : > { %v5789_v59 = vpop.f32.mrf.mxu1  ;;  %5156 = vst [vmem:[%s8710_s19 + $0x18] sm:$0xff] %v5102_v52  ;;  %v5010_v26 = vadd.f32 %v5724_v9, %v8704_v42 }
 0x3ca   : > { %v5726_v38 = vpop.f32.mrf.mxu0 }
 0x3cb   : > { %v5790_v1 = vpop.f32.mrf.mxu1  ;;  %v5107_v62 = vadd.f32 %v5788_v50, %v5010_v26  ;;  %v5727_v13 = vadd.f32 %v5726_v38, %v5725_v48 }
 0x3cc   : > { %v5728_v5 = vpop.f32.mrf.mxu0  ;;  %v5791_v4 = vadd.f32 %v5790_v1, %v5789_v59 }
 0x3cd   : > { %v5792_v22 = vpop.f32.mrf.mxu1  ;;  %5157 = vst [vmem:[%s8710_s19 + $0x20] sm:$0xff] %v5107_v62  ;;  %v5013_v35 = vadd.f32 %v5727_v13, %v8704_v42 }
 0x3ce   : > { %v5729_v30 = vpop.f32.mrf.mxu0 }
 0x3cf   : > { %v5793_v41 = vpop.f32.mrf.mxu1  ;;  %v5110_v6 = vadd.f32 %v5791_v4, %v5013_v35  ;;  %v5730_v36 = vadd.f32 %v5729_v30, %v5728_v5 }
 0x3d0   : > { %v5731_v34 = vpop.f32.mrf.mxu0  ;;  %v5794_v44 = vadd.f32 %v5793_v41, %v5792_v22 }
 0x3d1   : > { %v5795_v33 = vpop.f32.mrf.mxu1  ;;  %5158 = vst [vmem:[%s8710_s19 + $0x28] sm:$0xff] %v5110_v6  ;;  %v5018_v58 = vadd.f32 %v5730_v36, %v8704_v42 }
 0x3d2   : > { %v5732_v19 = vpop.f32.mrf.mxu0 }
 0x3d3   : > { %v5796_v0 = vpop.f32.mrf.mxu1  ;;  %v5115_v8 = vadd.f32 %v5794_v44, %v5018_v58  ;;  %v5733_v11 = vadd.f32 %v5732_v19, %v5731_v34 }
 0x3d4   : > { %v5734_v15 = vpop.f32.mrf.mxu0  ;;  %v5797_v28 = vadd.f32 %v5796_v0, %v5795_v33 }
 0x3d5   : > { %v5798_v39 = vpop.f32.mrf.mxu1  ;;  %5159 = vst [vmem:[%s8710_s19 + $0x30] sm:$0xff] %v5115_v8  ;;  %v5021_v7 = vadd.f32 %v5733_v11, %v8704_v42 }
 0x3d6   : > { %v5735_v37 = vpop.f32.mrf.mxu0 }
 0x3d7   : > { %v5799_v46 = vpop.f32.mrf.mxu1  ;;  %v5118_v25 = vadd.f32 %v5797_v28, %v5021_v7  ;;  %v5736_v3 = vadd.f32 %v5735_v37, %v5734_v15 }
 0x3d8   : > { %v5737_v21 = vpop.f32.mrf.mxu0  ;;  %v5800_v45 = vadd.f32 %v5799_v46, %v5798_v39 }
 0x3d9   : > { %v5801_v16 = vpop.f32.mrf.mxu1  ;;  %5160 = vst [vmem:[%s8710_s19 + $0x38] sm:$0xff] %v5118_v25  ;;  %v5026_v14 = vadd.f32 %v5736_v3, %v8704_v42 }
 0x3da   : > { %v5738_v53 = vpop.f32.mrf.mxu0 }
 0x3db   : > { %v5802_v40 = vpop.f32.mrf.mxu1  ;;  %v5123_v54 = vadd.f32 %v5800_v45, %v5026_v14  ;;  %v5739_v56 = vadd.f32 %v5738_v53, %v5737_v21 }
 0x3dc   : > { %v5740_v43 = vpop.f32.mrf.mxu0  ;;  %v5803_v63 = vadd.f32 %v5802_v40, %v5801_v16 }
 0x3dd   : > { %v5804_v2 = vpop.f32.mrf.mxu1  ;;  %5161 = vst [vmem:[%s8710_s19 + $0x40] sm:$0xff] %v5123_v54  ;;  %v5029_v27 = vadd.f32 %v5739_v56, %v8704_v42 }
 0x3de   : > { %v5741_v23 = vpop.f32.mrf.mxu0 }
 0x3df   : > { %v5805_v49 = vpop.f32.mrf.mxu1  ;;  %v5126_v57 = vadd.f32 %v5803_v63, %v5029_v27  ;;  %v5742_v18 = vadd.f32 %v5741_v23, %v5740_v43 }
 0x3e0   : > { %v5743_v24 = vpop.f32.mrf.mxu0  ;;  %v5806_v29 = vadd.f32 %v5805_v49, %v5804_v2 }
 0x3e1   : > { %v5807_v17 = vpop.f32.mrf.mxu1  ;;  %5162 = vst [vmem:[%s8710_s19 + $0x48] sm:$0xff] %v5126_v57  ;;  %v5034_v60 = vadd.f32 %v5742_v18, %v8704_v42 }
 0x3e2   : > { %v5744_v55 = vpop.f32.mrf.mxu0 }
 0x3e3   : > { %v5808_v47 = vpop.f32.mrf.mxu1  ;;  %v5131_v20 = vadd.f32 %v5806_v29, %v5034_v60  ;;  %v5745_v10 = vadd.f32 %v5744_v55, %v5743_v24 }
 0x3e4   : > { %v5746_v32 = vpop.f32.mrf.mxu0  ;;  %v5809_v51 = vadd.f32 %v5808_v47, %v5807_v17 }
 0x3e5   : > { %v5810_v12 = vpop.f32.mrf.mxu1  ;;  %5163 = vst [vmem:[%s8710_s19 + $0x50] sm:$0xff] %v5131_v20  ;;  %v5037_v31 = vadd.f32 %v5745_v10, %v8704_v42 }
 0x3e6   : > { %v5747_v61 = vpop.f32.mrf.mxu0 }
 0x3e7   : > { %v5811_v52 = vpop.f32.mrf.mxu1  ;;  %v5134_v9 = vadd.f32 %v5809_v51, %v5037_v31  ;;  %v5748_v48 = vadd.f32 %v5747_v61, %v5746_v32 }
 0x3e8   : > { %v5749_v59 = vpop.f32.mrf.mxu0  ;;  %v5812_v38 = vadd.f32 %v5811_v52, %v5810_v12 }
 0x3e9   : > { %v5813_v26 = vpop.f32.mrf.mxu1  ;;  %5164 = vst [vmem:[%s8710_s19 + $0x58] sm:$0xff] %v5134_v9  ;;  %v5042_v50 = vadd.f32 %v5748_v48, %v8704_v42 }
 0x3ea   : > { %v5750_v1 = vpop.f32.mrf.mxu0 }
 0x3eb   : > { %v5814_v62 = vpop.f32.mrf.mxu1  ;;  %v5139_v13 = vadd.f32 %v5812_v38, %v5042_v50  ;;  %v5751_v5 = vadd.f32 %v5750_v1, %v5749_v59 }
 0x3ec   : > { %v5752_v22 = vpop.f32.mrf.mxu0  ;;  %v5815_v30 = vadd.f32 %v5814_v62, %v5813_v26 }
 0x3ed   : > { %v5816_v35 = vpop.f32.mrf.mxu1  ;;  %5165 = vst [vmem:[%s8710_s19 + $0x60] sm:$0xff] %v5139_v13  ;;  %v5045_v4 = vadd.f32 %v5751_v5, %v8704_v42 }
 0x3ee   : > { %v5753_v41 = vpop.f32.mrf.mxu0 }
 0x3ef   : > { %v5817_v6 = vpop.f32.mrf.mxu1  ;;  %v5142_v36 = vadd.f32 %v5815_v30, %v5045_v4  ;;  %v5754_v34 = vadd.f32 %v5753_v41, %v5752_v22 }
 0x3f0   : > { %v5755_v33 = vpop.f32.mrf.mxu0  ;;  %v5818_v19 = vadd.f32 %v5817_v6, %v5816_v35 }
 0x3f1   : > { %v5819_v58 = vpop.f32.mrf.mxu1  ;;  %5166 = vst [vmem:[%s8710_s19 + $0x68] sm:$0xff] %v5142_v36  ;;  %v5050_v44 = vadd.f32 %v5754_v34, %v8704_v42 }
 0x3f2   : > { %v5756_v0 = vpop.f32.mrf.mxu0 }
 0x3f3   : > { %v5820_v8 = vpop.f32.mrf.mxu1  ;;  %v5147_v11 = vadd.f32 %v5818_v19, %v5050_v44  ;;  %v5757_v15 = vadd.f32 %v5756_v0, %v5755_v33 }
 0x3f4   : > { %v5821_v7 = vadd.f32 %v5820_v8, %v5819_v58 }
 0x3f5   : > { %5167 = vst [vmem:[%s8710_s19 + $0x70] sm:$0xff] %v5147_v11  ;;  %v5053_v39 = vadd.f32 %v5757_v15, %v8704_v42 }
 0x3f7   : > { %v5150_v28 = vadd.f32 %v5821_v7, %v5053_v39 }
 0x3f9   : > { %5168 = vst [vmem:[%s8710_s19 + $0x78] sm:$0xff] %v5150_v28 }
 0x3fa PF: > { %s15_s22 = sadd.s32 1, %s5968_s22   ;;  %s9151_s18 = smov %s5960_s20 }
 0x3fb   : > { %p12_p8 = scmp.ge.s32.totalorder %s15_s22, 6   ;;  %s9152_s19 = smov %s5964_s21 }
 0x3fc   : > { %s9153_s20 = smov %s9156_s23  ;;  %s9154_s21 = smov %s9160_s24 }
 0x3fd   :  { %14 = sbr.rel (!%p12_p8) target bundleno = 3 (0x3), region = 80 }

</bundles_post_ra>
